<compile_context>
chip_gen: v5e
topology: v5e:2x2
jax: 0.10.0
libtpu: 0.0.40
codegen_flags: <defaults>
</compile_context>

<pallas_src>
import math
import functools

import jax
import jax.numpy as jnp
from jax.experimental import pallas as pl
from jax.experimental.pallas import tpu as pltpu

# ----------------------------- configuration ------------------------------
EMB = 32          # emb_dim
NHEAD = 2
HEAD = EMB // NHEAD
FF = 64           # feed-forward hidden dim of the encoder layer
NUM_LAYER = 2
NUM_BLOCK = 2     # -> layers1/layers2 + FusionAttention3D, mode='so'
MAX_LEN = 64
BSZ = 2
SEQ = 8
WINDOW = 100
BIDIRECTIONAL = True
EPS = 1e-5
NEG = -1e9

# packing layout constants
W1_OFF = 128                       # lane-aligned start of FFN-in weight in w_in pack
W_IN_COLS = W1_OFF + FF            # (E, 192): [:, 0:96]=W_qkv, [:, 128:192]=W_ffn1
W_OUT_ROWS = EMB + FF              # (96, E):  [0:32]=W_o,     [32:96]=W_ffn2
# vec pack rows (one param per sublane, params start at lane 0)
V_BQKV, V_BO, V_B1, V_B2, V_G1, V_BE1, V_G2, V_BE2 = range(8)
VEC_LANES = 128


# ------------------------------ Pallas kernel ------------------------------
def _layernorm(x, gamma, beta):
    mu = jnp.mean(x, axis=-1, keepdims=True)
    var = jnp.mean((x - mu) ** 2, axis=-1, keepdims=True)
    return (x - mu) * jax.lax.rsqrt(var + EPS) * gamma + beta


def fused_forward_kernel(src_ref, misc_ref, mask_ref, win_ref, wout_ref, vec_ref,
                         o_ref, *, bsz, seq):
    """Whole BatchTransformer forward, single invocation, batch folded into rows.

    src_ref  : (B*S, E)                  input (pre-PE), batch-major rows
    misc_ref : (B*S + 8, E)              rows [0:B*S] = PE tiled over batch,
                                         row  [B*S]   = fusion weight
    mask_ref : (B, NUM_BLOCK, S, S)      additive masks (block0=samm, block1=othm)
    win_ref  : (NB, NL, E, 192)          [:, 0:96]=W_qkv, [:, 128:192]=W_ffn1
    wout_ref : (NB, NL, 96, E)           [0:32]=W_o, [32:96]=W_ffn2
    vec_ref  : (NB, NL, 8, 128)          biases / LN params, one per sublane
    o_ref    : (B*S, E)
    """
    bs = bsz * seq
    scale = 1.0 / math.sqrt(HEAD)

    pe = misc_ref[0:bs, :]                                  # (B*S, E)
    fw = misc_ref[bs:bs + 1, :]                             # (1, E) fusion weight
    x0 = src_ref[...] + pe                                  # PositionEncoding

    block_outs = []
    for blk in range(NUM_BLOCK):                 # static unroll over blocks
        x = x0
        for lyr in range(NUM_LAYER):             # static unroll over layers
            wqkv = win_ref[blk, lyr, :, 0:3 * EMB]          # (E, 3E)
            w1 = win_ref[blk, lyr, :, W1_OFF:W1_OFF + FF]   # (E, FF)
            wo = wout_ref[blk, lyr, 0:EMB, :]               # (E, E)
            w2 = wout_ref[blk, lyr, EMB:EMB + FF, :]        # (FF, E)
            bqkv = vec_ref[blk, lyr, V_BQKV:V_BQKV + 1, 0:3 * EMB]
            bo = vec_ref[blk, lyr, V_BO:V_BO + 1, 0:EMB]
            b1 = vec_ref[blk, lyr, V_B1:V_B1 + 1, 0:FF]
            b2 = vec_ref[blk, lyr, V_B2:V_B2 + 1, 0:EMB]
            g1 = vec_ref[blk, lyr, V_G1:V_G1 + 1, 0:EMB]
            be1 = vec_ref[blk, lyr, V_BE1:V_BE1 + 1, 0:EMB]
            g2 = vec_ref[blk, lyr, V_G2:V_G2 + 1, 0:EMB]
            be2 = vec_ref[blk, lyr, V_BE2:V_BE2 + 1, 0:EMB]

            # --- fused QKV projection over ALL batch rows: (B*S,E)@(E,3E) ---
            qkv = (jnp.dot(x, wqkv, preferred_element_type=jnp.float32)
                   + bqkv)                                  # (B*S, 3E)

            # --- multi-head attention (masked part needs per-batch scores) ---
            ctx_rows = []
            for b in range(bsz):                 # static, B=2
                qkv_b = qkv[b * seq:(b + 1) * seq, :]       # (S, 3E)
                mask = mask_ref[b, blk]                     # (S, S)
                head_ctx = []
                for h in range(NHEAD):           # static, NHEAD=2
                    qh = qkv_b[:, h * HEAD:(h + 1) * HEAD]
                    kh = qkv_b[:, EMB + h * HEAD:EMB + (h + 1) * HEAD]
                    vh = qkv_b[:, 2 * EMB + h * HEAD:2 * EMB + (h + 1) * HEAD]
                    s = jnp.dot(qh, kh.T,
                                preferred_element_type=jnp.float32) * scale + mask
                    s = s - jnp.max(s, axis=-1, keepdims=True)
                    p = jnp.exp(s)
                    p = p * pl.reciprocal(jnp.sum(p, axis=-1, keepdims=True),
                                          approx=True)
                    head_ctx.append(jnp.dot(p, vh,
                                            preferred_element_type=jnp.float32))
                ctx_rows.append(jnp.concatenate(head_ctx, axis=-1))   # (S, E)
            ctx = jnp.concatenate(ctx_rows, axis=0)                   # (B*S, E)

            # --- single W_o projection for all heads & batch rows ---
            attn = jnp.dot(ctx, wo, preferred_element_type=jnp.float32) + bo

            # --- residual + LN, ReLU FFN + residual + LN (post-norm, no dropout) ---
            y = _layernorm(x + attn, g1, be1)
            h1 = jnp.maximum(
                jnp.dot(y, w1, preferred_element_type=jnp.float32) + b1, 0.0)
            ffo = jnp.dot(h1, w2, preferred_element_type=jnp.float32) + b2
            x = _layernorm(y + ffo, g2, be2)
        block_outs.append(x)

    # --- FusionAttention3D gate: 2-way softmax == sigmoid of score difference ---
    # TODO(synk): FusionAttention3D's exact definition (and its use of utt_mask) is not
    # in the provided source; reconstructed as score = x @ w (+ b), softmax over the
    # block dim, weighted sum of block outputs.  The bias cancels in the 2-way softmax
    # (depends only on s0 - s1), so it is dropped from the kernel operands entirely.
    s0 = jnp.sum(block_outs[0] * fw, axis=-1, keepdims=True)          # (B*S, 1)
    s1 = jnp.sum(block_outs[1] * fw, axis=-1, keepdims=True)
    a0 = pl.reciprocal(1.0 + jnp.exp(s1 - s0), approx=True)           # weight of block 0
    o_ref[...] = (a0 * block_outs[0]
                  + (1.0 - a0) * block_outs[1]).astype(o_ref.dtype)


# ------------------------------ kernel wrapper ------------------------------
def batch_transformer_forward(src, utt_mask, spk_mask, params,
                              window=WINDOW, mode="so"):
    """num_block=2 forward: layers1 on same-speaker mask, layers2 on other-speaker
    mask (mode='so'), then FusionAttention3D over the stack.
    One grid-less fused pallas_call (all operands full-resident in VMEM)."""
    B, S, E = src.shape
    bs = B * S

    uttm, samm, othm = build_mixed_mask_local(utt_mask, spk_mask, window,
                                              BIDIRECTIONAL)
    if mode == "so":
        m1, m2 = samm, othm
    elif mode == "us":
        m1, m2 = uttm, samm
    elif mode == "uo":
        m1, m2 = uttm, othm
    else:
        raise NotImplementedError
    masks = jnp.stack([m1, m2], axis=1)                      # (B, NUM_BLOCK, S, S)

    # misc pack: PE tiled over batch rows + fusion weight (sublane-aligned extra rows)
    pe_tiled = jnp.tile(params["pe"][:S], (B, 1))            # (B*S, E)
    misc = jnp.zeros((bs + 8, E), jnp.float32)
    misc = misc.at[:bs].set(pe_tiled).at[bs].set(params["fusion_w"][0])

    src_flat = src.reshape(bs, E)

    # advisory cost estimate (tiny kernel; keep XLA from serializing around it)
    flops_layer = (2 * bs * EMB * 3 * EMB                    # QKV
                   + 2 * B * NHEAD * S * S * HEAD * 2        # scores + P@V
                   + 2 * bs * EMB * EMB                      # W_o
                   + 2 * bs * EMB * FF * 2)                  # FFN
    flops = NUM_BLOCK * NUM_LAYER * flops_layer + 6 * bs * EMB
    transcendentals = NUM_BLOCK * NUM_LAYER * B * NHEAD * S * S + bs
    operands = (src_flat, misc, masks, params["w_in"], params["w_out"], params["vec"])
    bytes_accessed = 4 * (sum(int(a.size) for a in operands) + bs * EMB)

    kernel = functools.partial(fused_forward_kernel, bsz=B, seq=S)
    out_flat = pl.pallas_call(
        kernel,
        out_shape=jax.ShapeDtypeStruct((bs, E), jnp.float32),
        cost_estimate=pl.CostEstimate(flops=flops,
                                      transcendentals=transcendentals,
                                      bytes_accessed=bytes_accessed),
    )(*operands)
    return out_flat.reshape(B, S, E)


# ------------------------------ glue (plain JAX) ----------------------------
def sinusoidal_pe(max_len, d):
    pos = jnp.arange(max_len, dtype=jnp.float32)[:, None]
    div = jnp.exp(jnp.arange(0, d, 2, dtype=jnp.float32) * (-math.log(10000.0) / d))
    pe = jnp.zeros((max_len, d), jnp.float32)
    pe = pe.at[:, 0::2].set(jnp.sin(pos * div))
    pe = pe.at[:, 1::2].set(jnp.cos(pos * div))
    return pe


def build_mixed_mask_local(utt_mask, spk_mask, window, bidirectional):
    # TODO(synk): build_mixed_mask_local is not in the provided source; this is the
    # standard reconstruction (local window + key validity; same / other speaker split,
    # diagonal always kept so no row is fully masked).
    B, S = utt_mask.shape
    idx = jnp.arange(S)
    dist = idx[None, :] - idx[:, None]            # j - i
    if bidirectional:
        local = jnp.abs(dist) <= window
    else:
        local = (dist <= 0) & (dist >= -window)
    key_valid = utt_mask[:, None, :] > 0          # (B, 1, S)
    base = local[None] & key_valid                # (B, S, S)
    same = spk_mask[:, :, None] == spk_mask[:, None, :]
    eye = jnp.eye(S, dtype=bool)[None]
    uttm = base
    samm = (base & same) | (base & eye)
    othm = (base & ~same) | (base & eye)
    to_add = lambda m: jnp.where(m, 0.0, NEG).astype(jnp.float32)
    return to_add(uttm), to_add(samm), to_add(othm)


def xavier_uniform(key, shape):
    fan_in, fan_out = shape[0], shape[-1]
    lim = math.sqrt(6.0 / (fan_in + fan_out))
    return jax.random.uniform(key, shape, jnp.float32, -lim, lim)


def init_params(key):
    """Builds the packed parameter layout consumed by the kernel."""
    n_keys = NUM_BLOCK * NUM_LAYER * 6 + 1
    keys = jax.random.split(key, n_keys)
    ki = iter(range(n_keys - 1))

    w_in = jnp.zeros((NUM_BLOCK, NUM_LAYER, EMB, W_IN_COLS), jnp.float32)
    w_out = jnp.zeros((NUM_BLOCK, NUM_LAYER, W_OUT_ROWS, EMB), jnp.float32)
    vec = jnp.zeros((NUM_BLOCK, NUM_LAYER, 8, VEC_LANES), jnp.float32)

    for blk in range(NUM_BLOCK):
        for lyr in range(NUM_LAYER):
            wq = xavier_uniform(keys[next(ki)], (EMB, EMB))
            wk = xavier_uniform(keys[next(ki)], (EMB, EMB))
            wv = xavier_uniform(keys[next(ki)], (EMB, EMB))
            wo = xavier_uniform(keys[next(ki)], (EMB, EMB))
            w1 = xavier_uniform(keys[next(ki)], (EMB, FF))
            w2 = xavier_uniform(keys[next(ki)], (FF, EMB))
            wqkv = jnp.concatenate([wq, wk, wv], axis=1)          # (E, 3E), [Q|K|V]
            w_in = w_in.at[blk, lyr, :, 0:3 * EMB].set(wqkv)
            w_in = w_in.at[blk, lyr, :, W1_OFF:W1_OFF + FF].set(w1)
            w_out = w_out.at[blk, lyr, 0:EMB, :].set(wo)
            w_out = w_out.at[blk, lyr, EMB:EMB + FF, :].set(w2)
            # biases default to zero; LayerNorm gammas to one
            vec = vec.at[blk, lyr, V_G1, 0:EMB].set(1.0)
            vec = vec.at[blk, lyr, V_G2, 0:EMB].set(1.0)

    params = {
        "pe": sinusoidal_pe(MAX_LEN, EMB),        # (MAX_LEN, E)
        "w_in": w_in,                             # (NB, NL, E, 192)
        "w_out": w_out,                           # (NB, NL, 96, E)
        "vec": vec,                               # (NB, NL, 8, 128)
        "fusion_w": xavier_uniform(keys[-1], (1, EMB)),
        # fusion bias intentionally omitted: it cancels in the 2-way softmax gate.
    }
    return params


# ----------------------------------- main -----------------------------------
if __name__ == "__main__":
    root = jax.random.PRNGKey(0)
    k_param, k_src, k_spk = jax.random.split(root, 3)

    params = init_params(k_param)

    src = jax.random.normal(k_src, (BSZ, SEQ, EMB), jnp.float32)
    utt_mask = jnp.ones((BSZ, SEQ), jnp.float32).at[1, SEQ - 1].set(0.0)  # pad
    spk_mask = jax.random.randint(k_spk, (BSZ, SEQ), 0, 2).astype(jnp.int32)

    fwd = jax.jit(functools.partial(batch_transformer_forward, mode="so"))
    out = fwd(src, utt_mask, spk_mask, params)
    jax.block_until_ready(out)

    assert out.shape == (BSZ, SEQ, EMB), out.shape
    assert bool(jnp.all(jnp.isfinite(out)))
    print("KERNEL_OK")
</pallas_src>

<mosaic_0001>
module attributes {stable_mosaic.version = 11 : i64} {
  func.func @fused_forward_kernel(%arg0: memref<16x32xf32, #tpu.memory_space<vmem>>, %arg1: memref<24x32xf32, #tpu.memory_space<vmem>>, %arg2: memref<2x2x8x8xf32, #tpu.memory_space<vmem>>, %arg3: memref<2x2x32x192xf32, #tpu.memory_space<vmem>>, %arg4: memref<2x2x96x32xf32, #tpu.memory_space<vmem>>, %arg5: memref<2x2x8x128xf32, #tpu.memory_space<vmem>>, %arg6: memref<16x32xf32, #tpu.memory_space<vmem>>) attributes {dimension_semantics = [], scalar_prefetch = 0 : i64, scratch_operands = 0 : i64, tpu.core_type = #tpu.core_type<tc>} {
    %c0 = arith.constant 0 : index
    %c0_0 = arith.constant 0 : index
    %0 = vector.load %arg1[%c0, %c0_0] : memref<24x32xf32, #tpu.memory_space<vmem>>, vector<16x32xf32>
    %c16 = arith.constant 16 : index
    %c0_1 = arith.constant 0 : index
    %1 = vector.load %arg1[%c16, %c0_1] : memref<24x32xf32, #tpu.memory_space<vmem>>, vector<1x32xf32>
    %c0_2 = arith.constant 0 : index
    %c0_3 = arith.constant 0 : index
    %2 = vector.load %arg0[%c0_2, %c0_3] : memref<16x32xf32, #tpu.memory_space<vmem>>, vector<16x32xf32>
    %3 = arith.addf %2, %0 : vector<16x32xf32>
    %c0_4 = arith.constant 0 : index
    %c0_5 = arith.constant 0 : index
    %c0_6 = arith.constant 0 : index
    %c0_7 = arith.constant 0 : index
    %4 = vector.load %arg3[%c0_4, %c0_5, %c0_6, %c0_7] : memref<2x2x32x192xf32, #tpu.memory_space<vmem>>, vector<1x1x32x96xf32>
    %5 = vector.shape_cast %4 : vector<1x1x32x96xf32> to vector<32x96xf32>
    %c0_8 = arith.constant 0 : index
    %c0_9 = arith.constant 0 : index
    %c0_10 = arith.constant 0 : index
    %c128 = arith.constant 128 : index
    %6 = vector.load %arg3[%c0_8, %c0_9, %c0_10, %c128] : memref<2x2x32x192xf32, #tpu.memory_space<vmem>>, vector<1x1x32x64xf32>
    %7 = vector.shape_cast %6 : vector<1x1x32x64xf32> to vector<32x64xf32>
    %c0_11 = arith.constant 0 : index
    %c0_12 = arith.constant 0 : index
    %c0_13 = arith.constant 0 : index
    %c0_14 = arith.constant 0 : index
    %8 = vector.load %arg4[%c0_11, %c0_12, %c0_13, %c0_14] : memref<2x2x96x32xf32, #tpu.memory_space<vmem>>, vector<1x1x32x32xf32>
    %9 = vector.shape_cast %8 : vector<1x1x32x32xf32> to vector<32x32xf32>
    %c0_15 = arith.constant 0 : index
    %c0_16 = arith.constant 0 : index
    %c32 = arith.constant 32 : index
    %c0_17 = arith.constant 0 : index
    %10 = vector.load %arg4[%c0_15, %c0_16, %c32, %c0_17] : memref<2x2x96x32xf32, #tpu.memory_space<vmem>>, vector<1x1x64x32xf32>
    %11 = vector.shape_cast %10 : vector<1x1x64x32xf32> to vector<64x32xf32>
    %c0_18 = arith.constant 0 : index
    %c0_19 = arith.constant 0 : index
    %c0_20 = arith.constant 0 : index
    %c0_21 = arith.constant 0 : index
    %12 = vector.load %arg5[%c0_18, %c0_19, %c0_20, %c0_21] : memref<2x2x8x128xf32, #tpu.memory_space<vmem>>, vector<1x1x1x96xf32>
    %13 = vector.shape_cast %12 : vector<1x1x1x96xf32> to vector<1x96xf32>
    %c0_22 = arith.constant 0 : index
    %c0_23 = arith.constant 0 : index
    %c1 = arith.constant 1 : index
    %c0_24 = arith.constant 0 : index
    %14 = vector.load %arg5[%c0_22, %c0_23, %c1, %c0_24] : memref<2x2x8x128xf32, #tpu.memory_space<vmem>>, vector<1x1x1x32xf32>
    %15 = vector.shape_cast %14 : vector<1x1x1x32xf32> to vector<1x32xf32>
    %c0_25 = arith.constant 0 : index
    %c0_26 = arith.constant 0 : index
    %c2 = arith.constant 2 : index
    %c0_27 = arith.constant 0 : index
    %16 = vector.load %arg5[%c0_25, %c0_26, %c2, %c0_27] : memref<2x2x8x128xf32, #tpu.memory_space<vmem>>, vector<1x1x1x64xf32>
    %17 = vector.shape_cast %16 : vector<1x1x1x64xf32> to vector<1x64xf32>
    %c0_28 = arith.constant 0 : index
    %c0_29 = arith.constant 0 : index
    %c3 = arith.constant 3 : index
    %c0_30 = arith.constant 0 : index
    %18 = vector.load %arg5[%c0_28, %c0_29, %c3, %c0_30] : memref<2x2x8x128xf32, #tpu.memory_space<vmem>>, vector<1x1x1x32xf32>
    %19 = vector.shape_cast %18 : vector<1x1x1x32xf32> to vector<1x32xf32>
    %c0_31 = arith.constant 0 : index
    %c0_32 = arith.constant 0 : index
    %c4 = arith.constant 4 : index
    %c0_33 = arith.constant 0 : index
    %20 = vector.load %arg5[%c0_31, %c0_32, %c4, %c0_33] : memref<2x2x8x128xf32, #tpu.memory_space<vmem>>, vector<1x1x1x32xf32>
    %21 = vector.shape_cast %20 : vector<1x1x1x32xf32> to vector<1x32xf32>
    %c0_34 = arith.constant 0 : index
    %c0_35 = arith.constant 0 : index
    %c5 = arith.constant 5 : index
    %c0_36 = arith.constant 0 : index
    %22 = vector.load %arg5[%c0_34, %c0_35, %c5, %c0_36] : memref<2x2x8x128xf32, #tpu.memory_space<vmem>>, vector<1x1x1x32xf32>
    %23 = vector.shape_cast %22 : vector<1x1x1x32xf32> to vector<1x32xf32>
    %c0_37 = arith.constant 0 : index
    %c0_38 = arith.constant 0 : index
    %c6 = arith.constant 6 : index
    %c0_39 = arith.constant 0 : index
    %24 = vector.load %arg5[%c0_37, %c0_38, %c6, %c0_39] : memref<2x2x8x128xf32, #tpu.memory_space<vmem>>, vector<1x1x1x32xf32>
    %25 = vector.shape_cast %24 : vector<1x1x1x32xf32> to vector<1x32xf32>
    %c0_40 = arith.constant 0 : index
    %c0_41 = arith.constant 0 : index
    %c7 = arith.constant 7 : index
    %c0_42 = arith.constant 0 : index
    %26 = vector.load %arg5[%c0_40, %c0_41, %c7, %c0_42] : memref<2x2x8x128xf32, #tpu.memory_space<vmem>>, vector<1x1x1x32xf32>
    %27 = vector.shape_cast %26 : vector<1x1x1x32xf32> to vector<1x32xf32>
    %cst = arith.constant dense<0.000000e+00> : vector<16x96xf32>
    %28 = tpu.matmul %3, %5, %cst {dimension_numbers = #tpu.dot_dimension_numbers<[1], [0], [0], [1], [0, 0, 1, 1], [], []>} : vector<16x32xf32>, vector<32x96xf32>, vector<16x96xf32> -> vector<16x96xf32>
    %29 = vector.broadcast %13 : vector<1x96xf32> to vector<16x96xf32>
    %30 = arith.addf %28, %29 : vector<16x96xf32>
    %31 = vector.extract_strided_slice %30 {offsets = [0, 0], sizes = [8, 96], strides = [1, 1]} : vector<16x96xf32> to vector<8x96xf32>
    %c0_43 = arith.constant 0 : index
    %c0_44 = arith.constant 0 : index
    %c0_45 = arith.constant 0 : index
    %c0_46 = arith.constant 0 : index
    %32 = vector.load %arg2[%c0_43, %c0_44, %c0_45, %c0_46] : memref<2x2x8x8xf32, #tpu.memory_space<vmem>>, vector<1x1x8x8xf32>
    %33 = vector.shape_cast %32 : vector<1x1x8x8xf32> to vector<8x8xf32>
    %34 = vector.extract_strided_slice %31 {offsets = [0, 0], sizes = [8, 16], strides = [1, 1]} : vector<8x96xf32> to vector<8x16xf32>
    %35 = vector.extract_strided_slice %31 {offsets = [0, 32], sizes = [8, 16], strides = [1, 1]} : vector<8x96xf32> to vector<8x16xf32>
    %36 = vector.extract_strided_slice %31 {offsets = [0, 64], sizes = [8, 16], strides = [1, 1]} : vector<8x96xf32> to vector<8x16xf32>
    %37 = tpu.transpose %35, [1, 0] : vector<8x16xf32> -> vector<16x8xf32>
    %cst_47 = arith.constant dense<0.000000e+00> : vector<8x8xf32>
    %38 = tpu.matmul %34, %37, %cst_47 {dimension_numbers = #tpu.dot_dimension_numbers<[1], [0], [0], [1], [0, 0, 1, 1], [], []>} : vector<8x16xf32>, vector<16x8xf32>, vector<8x8xf32> -> vector<8x8xf32>
    %cst_48 = arith.constant 2.500000e-01 : f32
    %39 = vector.broadcast %cst_48 : f32 to vector<8x8xf32>
    %40 = arith.mulf %38, %39 : vector<8x8xf32>
    %41 = arith.addf %40, %33 : vector<8x8xf32>
    %cst_49 = arith.constant dense<0xFF800000> : vector<8xf32>
    %42 = vector.multi_reduction <maximumf>, %41, %cst_49 [1] : vector<8x8xf32> to vector<8xf32>
    %43 = vector.shape_cast %42 : vector<8xf32> to vector<8x1xf32>
    %44 = vector.broadcast %43 : vector<8x1xf32> to vector<8x8xf32>
    %45 = arith.subf %41, %44 : vector<8x8xf32>
    %46 = math.exp %45 : vector<8x8xf32>
    %cst_50 = arith.constant dense<0.000000e+00> : vector<8xf32>
    %47 = vector.multi_reduction <add>, %46, %cst_50 [1] : vector<8x8xf32> to vector<8xf32>
    %48 = vector.shape_cast %47 : vector<8xf32> to vector<8x1xf32>
    %49 = tpu.reciprocal %48 {approx = true} : vector<8x1xf32> -> vector<8x1xf32>
    %50 = vector.broadcast %49 : vector<8x1xf32> to vector<8x8xf32>
    %51 = arith.mulf %46, %50 : vector<8x8xf32>
    %cst_51 = arith.constant dense<0.000000e+00> : vector<8x16xf32>
    %52 = tpu.matmul %51, %36, %cst_51 {dimension_numbers = #tpu.dot_dimension_numbers<[1], [0], [0], [1], [0, 0, 1, 1], [], []>} : vector<8x8xf32>, vector<8x16xf32>, vector<8x16xf32> -> vector<8x16xf32>
    %53 = vector.extract_strided_slice %31 {offsets = [0, 16], sizes = [8, 16], strides = [1, 1]} : vector<8x96xf32> to vector<8x16xf32>
    %54 = vector.extract_strided_slice %31 {offsets = [0, 48], sizes = [8, 16], strides = [1, 1]} : vector<8x96xf32> to vector<8x16xf32>
    %55 = vector.extract_strided_slice %31 {offsets = [0, 80], sizes = [8, 16], strides = [1, 1]} : vector<8x96xf32> to vector<8x16xf32>
    %56 = tpu.transpose %54, [1, 0] : vector<8x16xf32> -> vector<16x8xf32>
    %cst_52 = arith.constant dense<0.000000e+00> : vector<8x8xf32>
    %57 = tpu.matmul %53, %56, %cst_52 {dimension_numbers = #tpu.dot_dimension_numbers<[1], [0], [0], [1], [0, 0, 1, 1], [], []>} : vector<8x16xf32>, vector<16x8xf32>, vector<8x8xf32> -> vector<8x8xf32>
    %cst_53 = arith.constant 2.500000e-01 : f32
    %58 = vector.broadcast %cst_53 : f32 to vector<8x8xf32>
    %59 = arith.mulf %57, %58 : vector<8x8xf32>
    %60 = arith.addf %59, %33 : vector<8x8xf32>
    %cst_54 = arith.constant dense<0xFF800000> : vector<8xf32>
    %61 = vector.multi_reduction <maximumf>, %60, %cst_54 [1] : vector<8x8xf32> to vector<8xf32>
    %62 = vector.shape_cast %61 : vector<8xf32> to vector<8x1xf32>
    %63 = vector.broadcast %62 : vector<8x1xf32> to vector<8x8xf32>
    %64 = arith.subf %60, %63 : vector<8x8xf32>
    %65 = math.exp %64 : vector<8x8xf32>
    %cst_55 = arith.constant dense<0.000000e+00> : vector<8xf32>
    %66 = vector.multi_reduction <add>, %65, %cst_55 [1] : vector<8x8xf32> to vector<8xf32>
    %67 = vector.shape_cast %66 : vector<8xf32> to vector<8x1xf32>
    %68 = tpu.reciprocal %67 {approx = true} : vector<8x1xf32> -> vector<8x1xf32>
    %69 = vector.broadcast %68 : vector<8x1xf32> to vector<8x8xf32>
    %70 = arith.mulf %65, %69 : vector<8x8xf32>
    %cst_56 = arith.constant dense<0.000000e+00> : vector<8x16xf32>
    %71 = tpu.matmul %70, %55, %cst_56 {dimension_numbers = #tpu.dot_dimension_numbers<[1], [0], [0], [1], [0, 0, 1, 1], [], []>} : vector<8x8xf32>, vector<8x16xf32>, vector<8x16xf32> -> vector<8x16xf32>
    %72 = tpu.concatenate %52, %71 in 1 : vector<8x16xf32>, vector<8x16xf32> -> vector<8x32xf32>
    %73 = vector.extract_strided_slice %30 {offsets = [8, 0], sizes = [8, 96], strides = [1, 1]} : vector<16x96xf32> to vector<8x96xf32>
    %c1_57 = arith.constant 1 : index
    %c0_58 = arith.constant 0 : index
    %c0_59 = arith.constant 0 : index
    %c0_60 = arith.constant 0 : index
    %74 = vector.load %arg2[%c1_57, %c0_58, %c0_59, %c0_60] : memref<2x2x8x8xf32, #tpu.memory_space<vmem>>, vector<1x1x8x8xf32>
    %75 = vector.shape_cast %74 : vector<1x1x8x8xf32> to vector<8x8xf32>
    %76 = vector.extract_strided_slice %73 {offsets = [0, 0], sizes = [8, 16], strides = [1, 1]} : vector<8x96xf32> to vector<8x16xf32>
    %77 = vector.extract_strided_slice %73 {offsets = [0, 32], sizes = [8, 16], strides = [1, 1]} : vector<8x96xf32> to vector<8x16xf32>
    %78 = vector.extract_strided_slice %73 {offsets = [0, 64], sizes = [8, 16], strides = [1, 1]} : vector<8x96xf32> to vector<8x16xf32>
    %79 = tpu.transpose %77, [1, 0] : vector<8x16xf32> -> vector<16x8xf32>
    %cst_61 = arith.constant dense<0.000000e+00> : vector<8x8xf32>
    %80 = tpu.matmul %76, %79, %cst_61 {dimension_numbers = #tpu.dot_dimension_numbers<[1], [0], [0], [1], [0, 0, 1, 1], [], []>} : vector<8x16xf32>, vector<16x8xf32>, vector<8x8xf32> -> vector<8x8xf32>
    %cst_62 = arith.constant 2.500000e-01 : f32
    %81 = vector.broadcast %cst_62 : f32 to vector<8x8xf32>
    %82 = arith.mulf %80, %81 : vector<8x8xf32>
    %83 = arith.addf %82, %75 : vector<8x8xf32>
    %cst_63 = arith.constant dense<0xFF800000> : vector<8xf32>
    %84 = vector.multi_reduction <maximumf>, %83, %cst_63 [1] : vector<8x8xf32> to vector<8xf32>
    %85 = vector.shape_cast %84 : vector<8xf32> to vector<8x1xf32>
    %86 = vector.broadcast %85 : vector<8x1xf32> to vector<8x8xf32>
    %87 = arith.subf %83, %86 : vector<8x8xf32>
    %88 = math.exp %87 : vector<8x8xf32>
    %cst_64 = arith.constant dense<0.000000e+00> : vector<8xf32>
    %89 = vector.multi_reduction <add>, %88, %cst_64 [1] : vector<8x8xf32> to vector<8xf32>
    %90 = vector.shape_cast %89 : vector<8xf32> to vector<8x1xf32>
    %91 = tpu.reciprocal %90 {approx = true} : vector<8x1xf32> -> vector<8x1xf32>
    %92 = vector.broadcast %91 : vector<8x1xf32> to vector<8x8xf32>
    %93 = arith.mulf %88, %92 : vector<8x8xf32>
    %cst_65 = arith.constant dense<0.000000e+00> : vector<8x16xf32>
    %94 = tpu.matmul %93, %78, %cst_65 {dimension_numbers = #tpu.dot_dimension_numbers<[1], [0], [0], [1], [0, 0, 1, 1], [], []>} : vector<8x8xf32>, vector<8x16xf32>, vector<8x16xf32> -> vector<8x16xf32>
    %95 = vector.extract_strided_slice %73 {offsets = [0, 16], sizes = [8, 16], strides = [1, 1]} : vector<8x96xf32> to vector<8x16xf32>
    %96 = vector.extract_strided_slice %73 {offsets = [0, 48], sizes = [8, 16], strides = [1, 1]} : vector<8x96xf32> to vector<8x16xf32>
    %97 = vector.extract_strided_slice %73 {offsets = [0, 80], sizes = [8, 16], strides = [1, 1]} : vector<8x96xf32> to vector<8x16xf32>
    %98 = tpu.transpose %96, [1, 0] : vector<8x16xf32> -> vector<16x8xf32>
    %cst_66 = arith.constant dense<0.000000e+00> : vector<8x8xf32>
    %99 = tpu.matmul %95, %98, %cst_66 {dimension_numbers = #tpu.dot_dimension_numbers<[1], [0], [0], [1], [0, 0, 1, 1], [], []>} : vector<8x16xf32>, vector<16x8xf32>, vector<8x8xf32> -> vector<8x8xf32>
    %cst_67 = arith.constant 2.500000e-01 : f32
    %100 = vector.broadcast %cst_67 : f32 to vector<8x8xf32>
    %101 = arith.mulf %99, %100 : vector<8x8xf32>
    %102 = arith.addf %101, %75 : vector<8x8xf32>
    %cst_68 = arith.constant dense<0xFF800000> : vector<8xf32>
    %103 = vector.multi_reduction <maximumf>, %102, %cst_68 [1] : vector<8x8xf32> to vector<8xf32>
    %104 = vector.shape_cast %103 : vector<8xf32> to vector<8x1xf32>
    %105 = vector.broadcast %104 : vector<8x1xf32> to vector<8x8xf32>
    %106 = arith.subf %102, %105 : vector<8x8xf32>
    %107 = math.exp %106 : vector<8x8xf32>
    %cst_69 = arith.constant dense<0.000000e+00> : vector<8xf32>
    %108 = vector.multi_reduction <add>, %107, %cst_69 [1] : vector<8x8xf32> to vector<8xf32>
    %109 = vector.shape_cast %108 : vector<8xf32> to vector<8x1xf32>
    %110 = tpu.reciprocal %109 {approx = true} : vector<8x1xf32> -> vector<8x1xf32>
    %111 = vector.broadcast %110 : vector<8x1xf32> to vector<8x8xf32>
    %112 = arith.mulf %107, %111 : vector<8x8xf32>
    %cst_70 = arith.constant dense<0.000000e+00> : vector<8x16xf32>
    %113 = tpu.matmul %112, %97, %cst_70 {dimension_numbers = #tpu.dot_dimension_numbers<[1], [0], [0], [1], [0, 0, 1, 1], [], []>} : vector<8x8xf32>, vector<8x16xf32>, vector<8x16xf32> -> vector<8x16xf32>
    %114 = tpu.concatenate %94, %113 in 1 : vector<8x16xf32>, vector<8x16xf32> -> vector<8x32xf32>
    %115 = tpu.concatenate %72, %114 in 0 : vector<8x32xf32>, vector<8x32xf32> -> vector<16x32xf32>
    %cst_71 = arith.constant dense<0.000000e+00> : vector<16x32xf32>
    %116 = tpu.matmul %115, %9, %cst_71 {dimension_numbers = #tpu.dot_dimension_numbers<[1], [0], [0], [1], [0, 0, 1, 1], [], []>} : vector<16x32xf32>, vector<32x32xf32>, vector<16x32xf32> -> vector<16x32xf32>
    %117 = vector.broadcast %15 : vector<1x32xf32> to vector<16x32xf32>
    %118 = arith.addf %116, %117 : vector<16x32xf32>
    %119 = arith.addf %3, %118 : vector<16x32xf32>
    %cst_72 = arith.constant dense<0.000000e+00> : vector<16xf32>
    %120 = vector.multi_reduction <add>, %119, %cst_72 [1] : vector<16x32xf32> to vector<16xf32>
    %121 = vector.shape_cast %120 : vector<16xf32> to vector<16x1xf32>
    %cst_73 = arith.constant 3.200000e+01 : f32
    %122 = vector.broadcast %cst_73 : f32 to vector<16x1xf32>
    %123 = arith.divf %121, %122 : vector<16x1xf32>
    %124 = vector.broadcast %123 : vector<16x1xf32> to vector<16x32xf32>
    %125 = arith.subf %119, %124 : vector<16x32xf32>
    %126 = arith.mulf %125, %125 : vector<16x32xf32>
    %cst_74 = arith.constant dense<0.000000e+00> : vector<16xf32>
    %127 = vector.multi_reduction <add>, %126, %cst_74 [1] : vector<16x32xf32> to vector<16xf32>
    %128 = vector.shape_cast %127 : vector<16xf32> to vector<16x1xf32>
    %cst_75 = arith.constant 3.200000e+01 : f32
    %129 = vector.broadcast %cst_75 : f32 to vector<16x1xf32>
    %130 = arith.divf %128, %129 : vector<16x1xf32>
    %131 = vector.broadcast %123 : vector<16x1xf32> to vector<16x32xf32>
    %132 = arith.subf %119, %131 : vector<16x32xf32>
    %cst_76 = arith.constant 9.99999974E-6 : f32
    %133 = vector.broadcast %cst_76 : f32 to vector<16x1xf32>
    %134 = arith.addf %130, %133 : vector<16x1xf32>
    %135 = math.rsqrt %134 : vector<16x1xf32>
    %136 = vector.broadcast %135 : vector<16x1xf32> to vector<16x32xf32>
    %137 = arith.mulf %132, %136 : vector<16x32xf32>
    %138 = vector.broadcast %21 : vector<1x32xf32> to vector<16x32xf32>
    %139 = arith.mulf %137, %138 : vector<16x32xf32>
    %140 = vector.broadcast %23 : vector<1x32xf32> to vector<16x32xf32>
    %141 = arith.addf %139, %140 : vector<16x32xf32>
    %cst_77 = arith.constant dense<0.000000e+00> : vector<16x64xf32>
    %142 = tpu.matmul %141, %7, %cst_77 {dimension_numbers = #tpu.dot_dimension_numbers<[1], [0], [0], [1], [0, 0, 1, 1], [], []>} : vector<16x32xf32>, vector<32x64xf32>, vector<16x64xf32> -> vector<16x64xf32>
    %143 = vector.broadcast %17 : vector<1x64xf32> to vector<16x64xf32>
    %144 = arith.addf %142, %143 : vector<16x64xf32>
    %cst_78 = arith.constant 0.000000e+00 : f32
    %145 = vector.broadcast %cst_78 : f32 to vector<16x64xf32>
    %146 = arith.maximumf %144, %145 : vector<16x64xf32>
    %cst_79 = arith.constant dense<0.000000e+00> : vector<16x32xf32>
    %147 = tpu.matmul %146, %11, %cst_79 {dimension_numbers = #tpu.dot_dimension_numbers<[1], [0], [0], [1], [0, 0, 1, 1], [], []>} : vector<16x64xf32>, vector<64x32xf32>, vector<16x32xf32> -> vector<16x32xf32>
    %148 = vector.broadcast %19 : vector<1x32xf32> to vector<16x32xf32>
    %149 = arith.addf %147, %148 : vector<16x32xf32>
    %150 = arith.addf %141, %149 : vector<16x32xf32>
    %cst_80 = arith.constant dense<0.000000e+00> : vector<16xf32>
    %151 = vector.multi_reduction <add>, %150, %cst_80 [1] : vector<16x32xf32> to vector<16xf32>
    %152 = vector.shape_cast %151 : vector<16xf32> to vector<16x1xf32>
    %cst_81 = arith.constant 3.200000e+01 : f32
    %153 = vector.broadcast %cst_81 : f32 to vector<16x1xf32>
    %154 = arith.divf %152, %153 : vector<16x1xf32>
    %155 = vector.broadcast %154 : vector<16x1xf32> to vector<16x32xf32>
    %156 = arith.subf %150, %155 : vector<16x32xf32>
    %157 = arith.mulf %156, %156 : vector<16x32xf32>
    %cst_82 = arith.constant dense<0.000000e+00> : vector<16xf32>
    %158 = vector.multi_reduction <add>, %157, %cst_82 [1] : vector<16x32xf32> to vector<16xf32>
    %159 = vector.shape_cast %158 : vector<16xf32> to vector<16x1xf32>
    %cst_83 = arith.constant 3.200000e+01 : f32
    %160 = vector.broadcast %cst_83 : f32 to vector<16x1xf32>
    %161 = arith.divf %159, %160 : vector<16x1xf32>
    %162 = vector.broadcast %154 : vector<16x1xf32> to vector<16x32xf32>
    %163 = arith.subf %150, %162 : vector<16x32xf32>
    %cst_84 = arith.constant 9.99999974E-6 : f32
    %164 = vector.broadcast %cst_84 : f32 to vector<16x1xf32>
    %165 = arith.addf %161, %164 : vector<16x1xf32>
    %166 = math.rsqrt %165 : vector<16x1xf32>
    %167 = vector.broadcast %166 : vector<16x1xf32> to vector<16x32xf32>
    %168 = arith.mulf %163, %167 : vector<16x32xf32>
    %169 = vector.broadcast %25 : vector<1x32xf32> to vector<16x32xf32>
    %170 = arith.mulf %168, %169 : vector<16x32xf32>
    %171 = vector.broadcast %27 : vector<1x32xf32> to vector<16x32xf32>
    %172 = arith.addf %170, %171 : vector<16x32xf32>
    %c0_85 = arith.constant 0 : index
    %c1_86 = arith.constant 1 : index
    %c0_87 = arith.constant 0 : index
    %c0_88 = arith.constant 0 : index
    %173 = vector.load %arg3[%c0_85, %c1_86, %c0_87, %c0_88] : memref<2x2x32x192xf32, #tpu.memory_space<vmem>>, vector<1x1x32x96xf32>
    %174 = vector.shape_cast %173 : vector<1x1x32x96xf32> to vector<32x96xf32>
    %c0_89 = arith.constant 0 : index
    %c1_90 = arith.constant 1 : index
    %c0_91 = arith.constant 0 : index
    %c128_92 = arith.constant 128 : index
    %175 = vector.load %arg3[%c0_89, %c1_90, %c0_91, %c128_92] : memref<2x2x32x192xf32, #tpu.memory_space<vmem>>, vector<1x1x32x64xf32>
    %176 = vector.shape_cast %175 : vector<1x1x32x64xf32> to vector<32x64xf32>
    %c0_93 = arith.constant 0 : index
    %c1_94 = arith.constant 1 : index
    %c0_95 = arith.constant 0 : index
    %c0_96 = arith.constant 0 : index
    %177 = vector.load %arg4[%c0_93, %c1_94, %c0_95, %c0_96] : memref<2x2x96x32xf32, #tpu.memory_space<vmem>>, vector<1x1x32x32xf32>
    %178 = vector.shape_cast %177 : vector<1x1x32x32xf32> to vector<32x32xf32>
    %c0_97 = arith.constant 0 : index
    %c1_98 = arith.constant 1 : index
    %c32_99 = arith.constant 32 : index
    %c0_100 = arith.constant 0 : index
    %179 = vector.load %arg4[%c0_97, %c1_98, %c32_99, %c0_100] : memref<2x2x96x32xf32, #tpu.memory_space<vmem>>, vector<1x1x64x32xf32>
    %180 = vector.shape_cast %179 : vector<1x1x64x32xf32> to vector<64x32xf32>
    %c0_101 = arith.constant 0 : index
    %c1_102 = arith.constant 1 : index
    %c0_103 = arith.constant 0 : index
    %c0_104 = arith.constant 0 : index
    %181 = vector.load %arg5[%c0_101, %c1_102, %c0_103, %c0_104] : memref<2x2x8x128xf32, #tpu.memory_space<vmem>>, vector<1x1x1x96xf32>
    %182 = vector.shape_cast %181 : vector<1x1x1x96xf32> to vector<1x96xf32>
    %c0_105 = arith.constant 0 : index
    %c1_106 = arith.constant 1 : index
    %c1_107 = arith.constant 1 : index
    %c0_108 = arith.constant 0 : index
    %183 = vector.load %arg5[%c0_105, %c1_106, %c1_107, %c0_108] : memref<2x2x8x128xf32, #tpu.memory_space<vmem>>, vector<1x1x1x32xf32>
    %184 = vector.shape_cast %183 : vector<1x1x1x32xf32> to vector<1x32xf32>
    %c0_109 = arith.constant 0 : index
    %c1_110 = arith.constant 1 : index
    %c2_111 = arith.constant 2 : index
    %c0_112 = arith.constant 0 : index
    %185 = vector.load %arg5[%c0_109, %c1_110, %c2_111, %c0_112] : memref<2x2x8x128xf32, #tpu.memory_space<vmem>>, vector<1x1x1x64xf32>
    %186 = vector.shape_cast %185 : vector<1x1x1x64xf32> to vector<1x64xf32>
    %c0_113 = arith.constant 0 : index
    %c1_114 = arith.constant 1 : index
    %c3_115 = arith.constant 3 : index
    %c0_116 = arith.constant 0 : index
    %187 = vector.load %arg5[%c0_113, %c1_114, %c3_115, %c0_116] : memref<2x2x8x128xf32, #tpu.memory_space<vmem>>, vector<1x1x1x32xf32>
    %188 = vector.shape_cast %187 : vector<1x1x1x32xf32> to vector<1x32xf32>
    %c0_117 = arith.constant 0 : index
    %c1_118 = arith.constant 1 : index
    %c4_119 = arith.constant 4 : index
    %c0_120 = arith.constant 0 : index
    %189 = vector.load %arg5[%c0_117, %c1_118, %c4_119, %c0_120] : memref<2x2x8x128xf32, #tpu.memory_space<vmem>>, vector<1x1x1x32xf32>
    %190 = vector.shape_cast %189 : vector<1x1x1x32xf32> to vector<1x32xf32>
    %c0_121 = arith.constant 0 : index
    %c1_122 = arith.constant 1 : index
    %c5_123 = arith.constant 5 : index
    %c0_124 = arith.constant 0 : index
    %191 = vector.load %arg5[%c0_121, %c1_122, %c5_123, %c0_124] : memref<2x2x8x128xf32, #tpu.memory_space<vmem>>, vector<1x1x1x32xf32>
    %192 = vector.shape_cast %191 : vector<1x1x1x32xf32> to vector<1x32xf32>
    %c0_125 = arith.constant 0 : index
    %c1_126 = arith.constant 1 : index
    %c6_127 = arith.constant 6 : index
    %c0_128 = arith.constant 0 : index
    %193 = vector.load %arg5[%c0_125, %c1_126, %c6_127, %c0_128] : memref<2x2x8x128xf32, #tpu.memory_space<vmem>>, vector<1x1x1x32xf32>
    %194 = vector.shape_cast %193 : vector<1x1x1x32xf32> to vector<1x32xf32>
    %c0_129 = arith.constant 0 : index
    %c1_130 = arith.constant 1 : index
    %c7_131 = arith.constant 7 : index
    %c0_132 = arith.constant 0 : index
    %195 = vector.load %arg5[%c0_129, %c1_130, %c7_131, %c0_132] : memref<2x2x8x128xf32, #tpu.memory_space<vmem>>, vector<1x1x1x32xf32>
    %196 = vector.shape_cast %195 : vector<1x1x1x32xf32> to vector<1x32xf32>
    %cst_133 = arith.constant dense<0.000000e+00> : vector<16x96xf32>
    %197 = tpu.matmul %172, %174, %cst_133 {dimension_numbers = #tpu.dot_dimension_numbers<[1], [0], [0], [1], [0, 0, 1, 1], [], []>} : vector<16x32xf32>, vector<32x96xf32>, vector<16x96xf32> -> vector<16x96xf32>
    %198 = vector.broadcast %182 : vector<1x96xf32> to vector<16x96xf32>
    %199 = arith.addf %197, %198 : vector<16x96xf32>
    %200 = vector.extract_strided_slice %199 {offsets = [0, 0], sizes = [8, 96], strides = [1, 1]} : vector<16x96xf32> to vector<8x96xf32>
    %c0_134 = arith.constant 0 : index
    %c0_135 = arith.constant 0 : index
    %c0_136 = arith.constant 0 : index
    %c0_137 = arith.constant 0 : index
    %201 = vector.load %arg2[%c0_134, %c0_135, %c0_136, %c0_137] : memref<2x2x8x8xf32, #tpu.memory_space<vmem>>, vector<1x1x8x8xf32>
    %202 = vector.shape_cast %201 : vector<1x1x8x8xf32> to vector<8x8xf32>
    %203 = vector.extract_strided_slice %200 {offsets = [0, 0], sizes = [8, 16], strides = [1, 1]} : vector<8x96xf32> to vector<8x16xf32>
    %204 = vector.extract_strided_slice %200 {offsets = [0, 32], sizes = [8, 16], strides = [1, 1]} : vector<8x96xf32> to vector<8x16xf32>
    %205 = vector.extract_strided_slice %200 {offsets = [0, 64], sizes = [8, 16], strides = [1, 1]} : vector<8x96xf32> to vector<8x16xf32>
    %206 = tpu.transpose %204, [1, 0] : vector<8x16xf32> -> vector<16x8xf32>
    %cst_138 = arith.constant dense<0.000000e+00> : vector<8x8xf32>
    %207 = tpu.matmul %203, %206, %cst_138 {dimension_numbers = #tpu.dot_dimension_numbers<[1], [0], [0], [1], [0, 0, 1, 1], [], []>} : vector<8x16xf32>, vector<16x8xf32>, vector<8x8xf32> -> vector<8x8xf32>
    %cst_139 = arith.constant 2.500000e-01 : f32
    %208 = vector.broadcast %cst_139 : f32 to vector<8x8xf32>
    %209 = arith.mulf %207, %208 : vector<8x8xf32>
    %210 = arith.addf %209, %202 : vector<8x8xf32>
    %cst_140 = arith.constant dense<0xFF800000> : vector<8xf32>
    %211 = vector.multi_reduction <maximumf>, %210, %cst_140 [1] : vector<8x8xf32> to vector<8xf32>
    %212 = vector.shape_cast %211 : vector<8xf32> to vector<8x1xf32>
    %213 = vector.broadcast %212 : vector<8x1xf32> to vector<8x8xf32>
    %214 = arith.subf %210, %213 : vector<8x8xf32>
    %215 = math.exp %214 : vector<8x8xf32>
    %cst_141 = arith.constant dense<0.000000e+00> : vector<8xf32>
    %216 = vector.multi_reduction <add>, %215, %cst_141 [1] : vector<8x8xf32> to vector<8xf32>
    %217 = vector.shape_cast %216 : vector<8xf32> to vector<8x1xf32>
    %218 = tpu.reciprocal %217 {approx = true} : vector<8x1xf32> -> vector<8x1xf32>
    %219 = vector.broadcast %218 : vector<8x1xf32> to vector<8x8xf32>
    %220 = arith.mulf %215, %219 : vector<8x8xf32>
    %cst_142 = arith.constant dense<0.000000e+00> : vector<8x16xf32>
    %221 = tpu.matmul %220, %205, %cst_142 {dimension_numbers = #tpu.dot_dimension_numbers<[1], [0], [0], [1], [0, 0, 1, 1], [], []>} : vector<8x8xf32>, vector<8x16xf32>, vector<8x16xf32> -> vector<8x16xf32>
    %222 = vector.extract_strided_slice %200 {offsets = [0, 16], sizes = [8, 16], strides = [1, 1]} : vector<8x96xf32> to vector<8x16xf32>
    %223 = vector.extract_strided_slice %200 {offsets = [0, 48], sizes = [8, 16], strides = [1, 1]} : vector<8x96xf32> to vector<8x16xf32>
    %224 = vector.extract_strided_slice %200 {offsets = [0, 80], sizes = [8, 16], strides = [1, 1]} : vector<8x96xf32> to vector<8x16xf32>
    %225 = tpu.transpose %223, [1, 0] : vector<8x16xf32> -> vector<16x8xf32>
    %cst_143 = arith.constant dense<0.000000e+00> : vector<8x8xf32>
    %226 = tpu.matmul %222, %225, %cst_143 {dimension_numbers = #tpu.dot_dimension_numbers<[1], [0], [0], [1], [0, 0, 1, 1], [], []>} : vector<8x16xf32>, vector<16x8xf32>, vector<8x8xf32> -> vector<8x8xf32>
    %cst_144 = arith.constant 2.500000e-01 : f32
    %227 = vector.broadcast %cst_144 : f32 to vector<8x8xf32>
    %228 = arith.mulf %226, %227 : vector<8x8xf32>
    %229 = arith.addf %228, %202 : vector<8x8xf32>
    %cst_145 = arith.constant dense<0xFF800000> : vector<8xf32>
    %230 = vector.multi_reduction <maximumf>, %229, %cst_145 [1] : vector<8x8xf32> to vector<8xf32>
    %231 = vector.shape_cast %230 : vector<8xf32> to vector<8x1xf32>
    %232 = vector.broadcast %231 : vector<8x1xf32> to vector<8x8xf32>
    %233 = arith.subf %229, %232 : vector<8x8xf32>
    %234 = math.exp %233 : vector<8x8xf32>
    %cst_146 = arith.constant dense<0.000000e+00> : vector<8xf32>
    %235 = vector.multi_reduction <add>, %234, %cst_146 [1] : vector<8x8xf32> to vector<8xf32>
    %236 = vector.shape_cast %235 : vector<8xf32> to vector<8x1xf32>
    %237 = tpu.reciprocal %236 {approx = true} : vector<8x1xf32> -> vector<8x1xf32>
    %238 = vector.broadcast %237 : vector<8x1xf32> to vector<8x8xf32>
    %239 = arith.mulf %234, %238 : vector<8x8xf32>
    %cst_147 = arith.constant dense<0.000000e+00> : vector<8x16xf32>
    %240 = tpu.matmul %239, %224, %cst_147 {dimension_numbers = #tpu.dot_dimension_numbers<[1], [0], [0], [1], [0, 0, 1, 1], [], []>} : vector<8x8xf32>, vector<8x16xf32>, vector<8x16xf32> -> vector<8x16xf32>
    %241 = tpu.concatenate %221, %240 in 1 : vector<8x16xf32>, vector<8x16xf32> -> vector<8x32xf32>
    %242 = vector.extract_strided_slice %199 {offsets = [8, 0], sizes = [8, 96], strides = [1, 1]} : vector<16x96xf32> to vector<8x96xf32>
    %c1_148 = arith.constant 1 : index
    %c0_149 = arith.constant 0 : index
    %c0_150 = arith.constant 0 : index
    %c0_151 = arith.constant 0 : index
    %243 = vector.load %arg2[%c1_148, %c0_149, %c0_150, %c0_151] : memref<2x2x8x8xf32, #tpu.memory_space<vmem>>, vector<1x1x8x8xf32>
    %244 = vector.shape_cast %243 : vector<1x1x8x8xf32> to vector<8x8xf32>
    %245 = vector.extract_strided_slice %242 {offsets = [0, 0], sizes = [8, 16], strides = [1, 1]} : vector<8x96xf32> to vector<8x16xf32>
    %246 = vector.extract_strided_slice %242 {offsets = [0, 32], sizes = [8, 16], strides = [1, 1]} : vector<8x96xf32> to vector<8x16xf32>
    %247 = vector.extract_strided_slice %242 {offsets = [0, 64], sizes = [8, 16], strides = [1, 1]} : vector<8x96xf32> to vector<8x16xf32>
    %248 = tpu.transpose %246, [1, 0] : vector<8x16xf32> -> vector<16x8xf32>
    %cst_152 = arith.constant dense<0.000000e+00> : vector<8x8xf32>
    %249 = tpu.matmul %245, %248, %cst_152 {dimension_numbers = #tpu.dot_dimension_numbers<[1], [0], [0], [1], [0, 0, 1, 1], [], []>} : vector<8x16xf32>, vector<16x8xf32>, vector<8x8xf32> -> vector<8x8xf32>
    %cst_153 = arith.constant 2.500000e-01 : f32
    %250 = vector.broadcast %cst_153 : f32 to vector<8x8xf32>
    %251 = arith.mulf %249, %250 : vector<8x8xf32>
    %252 = arith.addf %251, %244 : vector<8x8xf32>
    %cst_154 = arith.constant dense<0xFF800000> : vector<8xf32>
    %253 = vector.multi_reduction <maximumf>, %252, %cst_154 [1] : vector<8x8xf32> to vector<8xf32>
    %254 = vector.shape_cast %253 : vector<8xf32> to vector<8x1xf32>
    %255 = vector.broadcast %254 : vector<8x1xf32> to vector<8x8xf32>
    %256 = arith.subf %252, %255 : vector<8x8xf32>
    %257 = math.exp %256 : vector<8x8xf32>
    %cst_155 = arith.constant dense<0.000000e+00> : vector<8xf32>
    %258 = vector.multi_reduction <add>, %257, %cst_155 [1] : vector<8x8xf32> to vector<8xf32>
    %259 = vector.shape_cast %258 : vector<8xf32> to vector<8x1xf32>
    %260 = tpu.reciprocal %259 {approx = true} : vector<8x1xf32> -> vector<8x1xf32>
    %261 = vector.broadcast %260 : vector<8x1xf32> to vector<8x8xf32>
    %262 = arith.mulf %257, %261 : vector<8x8xf32>
    %cst_156 = arith.constant dense<0.000000e+00> : vector<8x16xf32>
    %263 = tpu.matmul %262, %247, %cst_156 {dimension_numbers = #tpu.dot_dimension_numbers<[1], [0], [0], [1], [0, 0, 1, 1], [], []>} : vector<8x8xf32>, vector<8x16xf32>, vector<8x16xf32> -> vector<8x16xf32>
    %264 = vector.extract_strided_slice %242 {offsets = [0, 16], sizes = [8, 16], strides = [1, 1]} : vector<8x96xf32> to vector<8x16xf32>
    %265 = vector.extract_strided_slice %242 {offsets = [0, 48], sizes = [8, 16], strides = [1, 1]} : vector<8x96xf32> to vector<8x16xf32>
    %266 = vector.extract_strided_slice %242 {offsets = [0, 80], sizes = [8, 16], strides = [1, 1]} : vector<8x96xf32> to vector<8x16xf32>
    %267 = tpu.transpose %265, [1, 0] : vector<8x16xf32> -> vector<16x8xf32>
    %cst_157 = arith.constant dense<0.000000e+00> : vector<8x8xf32>
    %268 = tpu.matmul %264, %267, %cst_157 {dimension_numbers = #tpu.dot_dimension_numbers<[1], [0], [0], [1], [0, 0, 1, 1], [], []>} : vector<8x16xf32>, vector<16x8xf32>, vector<8x8xf32> -> vector<8x8xf32>
    %cst_158 = arith.constant 2.500000e-01 : f32
    %269 = vector.broadcast %cst_158 : f32 to vector<8x8xf32>
    %270 = arith.mulf %268, %269 : vector<8x8xf32>
    %271 = arith.addf %270, %244 : vector<8x8xf32>
    %cst_159 = arith.constant dense<0xFF800000> : vector<8xf32>
    %272 = vector.multi_reduction <maximumf>, %271, %cst_159 [1] : vector<8x8xf32> to vector<8xf32>
    %273 = vector.shape_cast %272 : vector<8xf32> to vector<8x1xf32>
    %274 = vector.broadcast %273 : vector<8x1xf32> to vector<8x8xf32>
    %275 = arith.subf %271, %274 : vector<8x8xf32>
    %276 = math.exp %275 : vector<8x8xf32>
    %cst_160 = arith.constant dense<0.000000e+00> : vector<8xf32>
    %277 = vector.multi_reduction <add>, %276, %cst_160 [1] : vector<8x8xf32> to vector<8xf32>
    %278 = vector.shape_cast %277 : vector<8xf32> to vector<8x1xf32>
    %279 = tpu.reciprocal %278 {approx = true} : vector<8x1xf32> -> vector<8x1xf32>
    %280 = vector.broadcast %279 : vector<8x1xf32> to vector<8x8xf32>
    %281 = arith.mulf %276, %280 : vector<8x8xf32>
    %cst_161 = arith.constant dense<0.000000e+00> : vector<8x16xf32>
    %282 = tpu.matmul %281, %266, %cst_161 {dimension_numbers = #tpu.dot_dimension_numbers<[1], [0], [0], [1], [0, 0, 1, 1], [], []>} : vector<8x8xf32>, vector<8x16xf32>, vector<8x16xf32> -> vector<8x16xf32>
    %283 = tpu.concatenate %263, %282 in 1 : vector<8x16xf32>, vector<8x16xf32> -> vector<8x32xf32>
    %284 = tpu.concatenate %241, %283 in 0 : vector<8x32xf32>, vector<8x32xf32> -> vector<16x32xf32>
    %cst_162 = arith.constant dense<0.000000e+00> : vector<16x32xf32>
    %285 = tpu.matmul %284, %178, %cst_162 {dimension_numbers = #tpu.dot_dimension_numbers<[1], [0], [0], [1], [0, 0, 1, 1], [], []>} : vector<16x32xf32>, vector<32x32xf32>, vector<16x32xf32> -> vector<16x32xf32>
    %286 = vector.broadcast %184 : vector<1x32xf32> to vector<16x32xf32>
    %287 = arith.addf %285, %286 : vector<16x32xf32>
    %288 = arith.addf %172, %287 : vector<16x32xf32>
    %cst_163 = arith.constant dense<0.000000e+00> : vector<16xf32>
    %289 = vector.multi_reduction <add>, %288, %cst_163 [1] : vector<16x32xf32> to vector<16xf32>
    %290 = vector.shape_cast %289 : vector<16xf32> to vector<16x1xf32>
    %cst_164 = arith.constant 3.200000e+01 : f32
    %291 = vector.broadcast %cst_164 : f32 to vector<16x1xf32>
    %292 = arith.divf %290, %291 : vector<16x1xf32>
    %293 = vector.broadcast %292 : vector<16x1xf32> to vector<16x32xf32>
    %294 = arith.subf %288, %293 : vector<16x32xf32>
    %295 = arith.mulf %294, %294 : vector<16x32xf32>
    %cst_165 = arith.constant dense<0.000000e+00> : vector<16xf32>
    %296 = vector.multi_reduction <add>, %295, %cst_165 [1] : vector<16x32xf32> to vector<16xf32>
    %297 = vector.shape_cast %296 : vector<16xf32> to vector<16x1xf32>
    %cst_166 = arith.constant 3.200000e+01 : f32
    %298 = vector.broadcast %cst_166 : f32 to vector<16x1xf32>
    %299 = arith.divf %297, %298 : vector<16x1xf32>
    %300 = vector.broadcast %292 : vector<16x1xf32> to vector<16x32xf32>
    %301 = arith.subf %288, %300 : vector<16x32xf32>
    %cst_167 = arith.constant 9.99999974E-6 : f32
    %302 = vector.broadcast %cst_167 : f32 to vector<16x1xf32>
    %303 = arith.addf %299, %302 : vector<16x1xf32>
    %304 = math.rsqrt %303 : vector<16x1xf32>
    %305 = vector.broadcast %304 : vector<16x1xf32> to vector<16x32xf32>
    %306 = arith.mulf %301, %305 : vector<16x32xf32>
    %307 = vector.broadcast %190 : vector<1x32xf32> to vector<16x32xf32>
    %308 = arith.mulf %306, %307 : vector<16x32xf32>
    %309 = vector.broadcast %192 : vector<1x32xf32> to vector<16x32xf32>
    %310 = arith.addf %308, %309 : vector<16x32xf32>
    %cst_168 = arith.constant dense<0.000000e+00> : vector<16x64xf32>
    %311 = tpu.matmul %310, %176, %cst_168 {dimension_numbers = #tpu.dot_dimension_numbers<[1], [0], [0], [1], [0, 0, 1, 1], [], []>} : vector<16x32xf32>, vector<32x64xf32>, vector<16x64xf32> -> vector<16x64xf32>
    %312 = vector.broadcast %186 : vector<1x64xf32> to vector<16x64xf32>
    %313 = arith.addf %311, %312 : vector<16x64xf32>
    %cst_169 = arith.constant 0.000000e+00 : f32
    %314 = vector.broadcast %cst_169 : f32 to vector<16x64xf32>
    %315 = arith.maximumf %313, %314 : vector<16x64xf32>
    %cst_170 = arith.constant dense<0.000000e+00> : vector<16x32xf32>
    %316 = tpu.matmul %315, %180, %cst_170 {dimension_numbers = #tpu.dot_dimension_numbers<[1], [0], [0], [1], [0, 0, 1, 1], [], []>} : vector<16x64xf32>, vector<64x32xf32>, vector<16x32xf32> -> vector<16x32xf32>
    %317 = vector.broadcast %188 : vector<1x32xf32> to vector<16x32xf32>
    %318 = arith.addf %316, %317 : vector<16x32xf32>
    %319 = arith.addf %310, %318 : vector<16x32xf32>
    %cst_171 = arith.constant dense<0.000000e+00> : vector<16xf32>
    %320 = vector.multi_reduction <add>, %319, %cst_171 [1] : vector<16x32xf32> to vector<16xf32>
    %321 = vector.shape_cast %320 : vector<16xf32> to vector<16x1xf32>
    %cst_172 = arith.constant 3.200000e+01 : f32
    %322 = vector.broadcast %cst_172 : f32 to vector<16x1xf32>
    %323 = arith.divf %321, %322 : vector<16x1xf32>
    %324 = vector.broadcast %323 : vector<16x1xf32> to vector<16x32xf32>
    %325 = arith.subf %319, %324 : vector<16x32xf32>
    %326 = arith.mulf %325, %325 : vector<16x32xf32>
    %cst_173 = arith.constant dense<0.000000e+00> : vector<16xf32>
    %327 = vector.multi_reduction <add>, %326, %cst_173 [1] : vector<16x32xf32> to vector<16xf32>
    %328 = vector.shape_cast %327 : vector<16xf32> to vector<16x1xf32>
    %cst_174 = arith.constant 3.200000e+01 : f32
    %329 = vector.broadcast %cst_174 : f32 to vector<16x1xf32>
    %330 = arith.divf %328, %329 : vector<16x1xf32>
    %331 = vector.broadcast %323 : vector<16x1xf32> to vector<16x32xf32>
    %332 = arith.subf %319, %331 : vector<16x32xf32>
    %cst_175 = arith.constant 9.99999974E-6 : f32
    %333 = vector.broadcast %cst_175 : f32 to vector<16x1xf32>
    %334 = arith.addf %330, %333 : vector<16x1xf32>
    %335 = math.rsqrt %334 : vector<16x1xf32>
    %336 = vector.broadcast %335 : vector<16x1xf32> to vector<16x32xf32>
    %337 = arith.mulf %332, %336 : vector<16x32xf32>
    %338 = vector.broadcast %194 : vector<1x32xf32> to vector<16x32xf32>
    %339 = arith.mulf %337, %338 : vector<16x32xf32>
    %340 = vector.broadcast %196 : vector<1x32xf32> to vector<16x32xf32>
    %341 = arith.addf %339, %340 : vector<16x32xf32>
    %c1_176 = arith.constant 1 : index
    %c0_177 = arith.constant 0 : index
    %c0_178 = arith.constant 0 : index
    %c0_179 = arith.constant 0 : index
    %342 = vector.load %arg3[%c1_176, %c0_177, %c0_178, %c0_179] : memref<2x2x32x192xf32, #tpu.memory_space<vmem>>, vector<1x1x32x96xf32>
    %343 = vector.shape_cast %342 : vector<1x1x32x96xf32> to vector<32x96xf32>
    %c1_180 = arith.constant 1 : index
    %c0_181 = arith.constant 0 : index
    %c0_182 = arith.constant 0 : index
    %c128_183 = arith.constant 128 : index
    %344 = vector.load %arg3[%c1_180, %c0_181, %c0_182, %c128_183] : memref<2x2x32x192xf32, #tpu.memory_space<vmem>>, vector<1x1x32x64xf32>
    %345 = vector.shape_cast %344 : vector<1x1x32x64xf32> to vector<32x64xf32>
    %c1_184 = arith.constant 1 : index
    %c0_185 = arith.constant 0 : index
    %c0_186 = arith.constant 0 : index
    %c0_187 = arith.constant 0 : index
    %346 = vector.load %arg4[%c1_184, %c0_185, %c0_186, %c0_187] : memref<2x2x96x32xf32, #tpu.memory_space<vmem>>, vector<1x1x32x32xf32>
    %347 = vector.shape_cast %346 : vector<1x1x32x32xf32> to vector<32x32xf32>
    %c1_188 = arith.constant 1 : index
    %c0_189 = arith.constant 0 : index
    %c32_190 = arith.constant 32 : index
    %c0_191 = arith.constant 0 : index
    %348 = vector.load %arg4[%c1_188, %c0_189, %c32_190, %c0_191] : memref<2x2x96x32xf32, #tpu.memory_space<vmem>>, vector<1x1x64x32xf32>
    %349 = vector.shape_cast %348 : vector<1x1x64x32xf32> to vector<64x32xf32>
    %c1_192 = arith.constant 1 : index
    %c0_193 = arith.constant 0 : index
    %c0_194 = arith.constant 0 : index
    %c0_195 = arith.constant 0 : index
    %350 = vector.load %arg5[%c1_192, %c0_193, %c0_194, %c0_195] : memref<2x2x8x128xf32, #tpu.memory_space<vmem>>, vector<1x1x1x96xf32>
    %351 = vector.shape_cast %350 : vector<1x1x1x96xf32> to vector<1x96xf32>
    %c1_196 = arith.constant 1 : index
    %c0_197 = arith.constant 0 : index
    %c1_198 = arith.constant 1 : index
    %c0_199 = arith.constant 0 : index
    %352 = vector.load %arg5[%c1_196, %c0_197, %c1_198, %c0_199] : memref<2x2x8x128xf32, #tpu.memory_space<vmem>>, vector<1x1x1x32xf32>
    %353 = vector.shape_cast %352 : vector<1x1x1x32xf32> to vector<1x32xf32>
    %c1_200 = arith.constant 1 : index
    %c0_201 = arith.constant 0 : index
    %c2_202 = arith.constant 2 : index
    %c0_203 = arith.constant 0 : index
    %354 = vector.load %arg5[%c1_200, %c0_201, %c2_202, %c0_203] : memref<2x2x8x128xf32, #tpu.memory_space<vmem>>, vector<1x1x1x64xf32>
    %355 = vector.shape_cast %354 : vector<1x1x1x64xf32> to vector<1x64xf32>
    %c1_204 = arith.constant 1 : index
    %c0_205 = arith.constant 0 : index
    %c3_206 = arith.constant 3 : index
    %c0_207 = arith.constant 0 : index
    %356 = vector.load %arg5[%c1_204, %c0_205, %c3_206, %c0_207] : memref<2x2x8x128xf32, #tpu.memory_space<vmem>>, vector<1x1x1x32xf32>
    %357 = vector.shape_cast %356 : vector<1x1x1x32xf32> to vector<1x32xf32>
    %c1_208 = arith.constant 1 : index
    %c0_209 = arith.constant 0 : index
    %c4_210 = arith.constant 4 : index
    %c0_211 = arith.constant 0 : index
    %358 = vector.load %arg5[%c1_208, %c0_209, %c4_210, %c0_211] : memref<2x2x8x128xf32, #tpu.memory_space<vmem>>, vector<1x1x1x32xf32>
    %359 = vector.shape_cast %358 : vector<1x1x1x32xf32> to vector<1x32xf32>
    %c1_212 = arith.constant 1 : index
    %c0_213 = arith.constant 0 : index
    %c5_214 = arith.constant 5 : index
    %c0_215 = arith.constant 0 : index
    %360 = vector.load %arg5[%c1_212, %c0_213, %c5_214, %c0_215] : memref<2x2x8x128xf32, #tpu.memory_space<vmem>>, vector<1x1x1x32xf32>
    %361 = vector.shape_cast %360 : vector<1x1x1x32xf32> to vector<1x32xf32>
    %c1_216 = arith.constant 1 : index
    %c0_217 = arith.constant 0 : index
    %c6_218 = arith.constant 6 : index
    %c0_219 = arith.constant 0 : index
    %362 = vector.load %arg5[%c1_216, %c0_217, %c6_218, %c0_219] : memref<2x2x8x128xf32, #tpu.memory_space<vmem>>, vector<1x1x1x32xf32>
    %363 = vector.shape_cast %362 : vector<1x1x1x32xf32> to vector<1x32xf32>
    %c1_220 = arith.constant 1 : index
    %c0_221 = arith.constant 0 : index
    %c7_222 = arith.constant 7 : index
    %c0_223 = arith.constant 0 : index
    %364 = vector.load %arg5[%c1_220, %c0_221, %c7_222, %c0_223] : memref<2x2x8x128xf32, #tpu.memory_space<vmem>>, vector<1x1x1x32xf32>
    %365 = vector.shape_cast %364 : vector<1x1x1x32xf32> to vector<1x32xf32>
    %cst_224 = arith.constant dense<0.000000e+00> : vector<16x96xf32>
    %366 = tpu.matmul %3, %343, %cst_224 {dimension_numbers = #tpu.dot_dimension_numbers<[1], [0], [0], [1], [0, 0, 1, 1], [], []>} : vector<16x32xf32>, vector<32x96xf32>, vector<16x96xf32> -> vector<16x96xf32>
    %367 = vector.broadcast %351 : vector<1x96xf32> to vector<16x96xf32>
    %368 = arith.addf %366, %367 : vector<16x96xf32>
    %369 = vector.extract_strided_slice %368 {offsets = [0, 0], sizes = [8, 96], strides = [1, 1]} : vector<16x96xf32> to vector<8x96xf32>
    %c0_225 = arith.constant 0 : index
    %c1_226 = arith.constant 1 : index
    %c0_227 = arith.constant 0 : index
    %c0_228 = arith.constant 0 : index
    %370 = vector.load %arg2[%c0_225, %c1_226, %c0_227, %c0_228] : memref<2x2x8x8xf32, #tpu.memory_space<vmem>>, vector<1x1x8x8xf32>
    %371 = vector.shape_cast %370 : vector<1x1x8x8xf32> to vector<8x8xf32>
    %372 = vector.extract_strided_slice %369 {offsets = [0, 0], sizes = [8, 16], strides = [1, 1]} : vector<8x96xf32> to vector<8x16xf32>
    %373 = vector.extract_strided_slice %369 {offsets = [0, 32], sizes = [8, 16], strides = [1, 1]} : vector<8x96xf32> to vector<8x16xf32>
    %374 = vector.extract_strided_slice %369 {offsets = [0, 64], sizes = [8, 16], strides = [1, 1]} : vector<8x96xf32> to vector<8x16xf32>
    %375 = tpu.transpose %373, [1, 0] : vector<8x16xf32> -> vector<16x8xf32>
    %cst_229 = arith.constant dense<0.000000e+00> : vector<8x8xf32>
    %376 = tpu.matmul %372, %375, %cst_229 {dimension_numbers = #tpu.dot_dimension_numbers<[1], [0], [0], [1], [0, 0, 1, 1], [], []>} : vector<8x16xf32>, vector<16x8xf32>, vector<8x8xf32> -> vector<8x8xf32>
    %cst_230 = arith.constant 2.500000e-01 : f32
    %377 = vector.broadcast %cst_230 : f32 to vector<8x8xf32>
    %378 = arith.mulf %376, %377 : vector<8x8xf32>
    %379 = arith.addf %378, %371 : vector<8x8xf32>
    %cst_231 = arith.constant dense<0xFF800000> : vector<8xf32>
    %380 = vector.multi_reduction <maximumf>, %379, %cst_231 [1] : vector<8x8xf32> to vector<8xf32>
    %381 = vector.shape_cast %380 : vector<8xf32> to vector<8x1xf32>
    %382 = vector.broadcast %381 : vector<8x1xf32> to vector<8x8xf32>
    %383 = arith.subf %379, %382 : vector<8x8xf32>
    %384 = math.exp %383 : vector<8x8xf32>
    %cst_232 = arith.constant dense<0.000000e+00> : vector<8xf32>
    %385 = vector.multi_reduction <add>, %384, %cst_232 [1] : vector<8x8xf32> to vector<8xf32>
    %386 = vector.shape_cast %385 : vector<8xf32> to vector<8x1xf32>
    %387 = tpu.reciprocal %386 {approx = true} : vector<8x1xf32> -> vector<8x1xf32>
    %388 = vector.broadcast %387 : vector<8x1xf32> to vector<8x8xf32>
    %389 = arith.mulf %384, %388 : vector<8x8xf32>
    %cst_233 = arith.constant dense<0.000000e+00> : vector<8x16xf32>
    %390 = tpu.matmul %389, %374, %cst_233 {dimension_numbers = #tpu.dot_dimension_numbers<[1], [0], [0], [1], [0, 0, 1, 1], [], []>} : vector<8x8xf32>, vector<8x16xf32>, vector<8x16xf32> -> vector<8x16xf32>
    %391 = vector.extract_strided_slice %369 {offsets = [0, 16], sizes = [8, 16], strides = [1, 1]} : vector<8x96xf32> to vector<8x16xf32>
    %392 = vector.extract_strided_slice %369 {offsets = [0, 48], sizes = [8, 16], strides = [1, 1]} : vector<8x96xf32> to vector<8x16xf32>
    %393 = vector.extract_strided_slice %369 {offsets = [0, 80], sizes = [8, 16], strides = [1, 1]} : vector<8x96xf32> to vector<8x16xf32>
    %394 = tpu.transpose %392, [1, 0] : vector<8x16xf32> -> vector<16x8xf32>
    %cst_234 = arith.constant dense<0.000000e+00> : vector<8x8xf32>
    %395 = tpu.matmul %391, %394, %cst_234 {dimension_numbers = #tpu.dot_dimension_numbers<[1], [0], [0], [1], [0, 0, 1, 1], [], []>} : vector<8x16xf32>, vector<16x8xf32>, vector<8x8xf32> -> vector<8x8xf32>
    %cst_235 = arith.constant 2.500000e-01 : f32
    %396 = vector.broadcast %cst_235 : f32 to vector<8x8xf32>
    %397 = arith.mulf %395, %396 : vector<8x8xf32>
    %398 = arith.addf %397, %371 : vector<8x8xf32>
    %cst_236 = arith.constant dense<0xFF800000> : vector<8xf32>
    %399 = vector.multi_reduction <maximumf>, %398, %cst_236 [1] : vector<8x8xf32> to vector<8xf32>
    %400 = vector.shape_cast %399 : vector<8xf32> to vector<8x1xf32>
    %401 = vector.broadcast %400 : vector<8x1xf32> to vector<8x8xf32>
    %402 = arith.subf %398, %401 : vector<8x8xf32>
    %403 = math.exp %402 : vector<8x8xf32>
    %cst_237 = arith.constant dense<0.000000e+00> : vector<8xf32>
    %404 = vector.multi_reduction <add>, %403, %cst_237 [1] : vector<8x8xf32> to vector<8xf32>
    %405 = vector.shape_cast %404 : vector<8xf32> to vector<8x1xf32>
    %406 = tpu.reciprocal %405 {approx = true} : vector<8x1xf32> -> vector<8x1xf32>
    %407 = vector.broadcast %406 : vector<8x1xf32> to vector<8x8xf32>
    %408 = arith.mulf %403, %407 : vector<8x8xf32>
    %cst_238 = arith.constant dense<0.000000e+00> : vector<8x16xf32>
    %409 = tpu.matmul %408, %393, %cst_238 {dimension_numbers = #tpu.dot_dimension_numbers<[1], [0], [0], [1], [0, 0, 1, 1], [], []>} : vector<8x8xf32>, vector<8x16xf32>, vector<8x16xf32> -> vector<8x16xf32>
    %410 = tpu.concatenate %390, %409 in 1 : vector<8x16xf32>, vector<8x16xf32> -> vector<8x32xf32>
    %411 = vector.extract_strided_slice %368 {offsets = [8, 0], sizes = [8, 96], strides = [1, 1]} : vector<16x96xf32> to vector<8x96xf32>
    %c1_239 = arith.constant 1 : index
    %c1_240 = arith.constant 1 : index
    %c0_241 = arith.constant 0 : index
    %c0_242 = arith.constant 0 : index
    %412 = vector.load %arg2[%c1_239, %c1_240, %c0_241, %c0_242] : memref<2x2x8x8xf32, #tpu.memory_space<vmem>>, vector<1x1x8x8xf32>
    %413 = vector.shape_cast %412 : vector<1x1x8x8xf32> to vector<8x8xf32>
    %414 = vector.extract_strided_slice %411 {offsets = [0, 0], sizes = [8, 16], strides = [1, 1]} : vector<8x96xf32> to vector<8x16xf32>
    %415 = vector.extract_strided_slice %411 {offsets = [0, 32], sizes = [8, 16], strides = [1, 1]} : vector<8x96xf32> to vector<8x16xf32>
    %416 = vector.extract_strided_slice %411 {offsets = [0, 64], sizes = [8, 16], strides = [1, 1]} : vector<8x96xf32> to vector<8x16xf32>
    %417 = tpu.transpose %415, [1, 0] : vector<8x16xf32> -> vector<16x8xf32>
    %cst_243 = arith.constant dense<0.000000e+00> : vector<8x8xf32>
    %418 = tpu.matmul %414, %417, %cst_243 {dimension_numbers = #tpu.dot_dimension_numbers<[1], [0], [0], [1], [0, 0, 1, 1], [], []>} : vector<8x16xf32>, vector<16x8xf32>, vector<8x8xf32> -> vector<8x8xf32>
    %cst_244 = arith.constant 2.500000e-01 : f32
    %419 = vector.broadcast %cst_244 : f32 to vector<8x8xf32>
    %420 = arith.mulf %418, %419 : vector<8x8xf32>
    %421 = arith.addf %420, %413 : vector<8x8xf32>
    %cst_245 = arith.constant dense<0xFF800000> : vector<8xf32>
    %422 = vector.multi_reduction <maximumf>, %421, %cst_245 [1] : vector<8x8xf32> to vector<8xf32>
    %423 = vector.shape_cast %422 : vector<8xf32> to vector<8x1xf32>
    %424 = vector.broadcast %423 : vector<8x1xf32> to vector<8x8xf32>
    %425 = arith.subf %421, %424 : vector<8x8xf32>
    %426 = math.exp %425 : vector<8x8xf32>
    %cst_246 = arith.constant dense<0.000000e+00> : vector<8xf32>
    %427 = vector.multi_reduction <add>, %426, %cst_246 [1] : vector<8x8xf32> to vector<8xf32>
    %428 = vector.shape_cast %427 : vector<8xf32> to vector<8x1xf32>
    %429 = tpu.reciprocal %428 {approx = true} : vector<8x1xf32> -> vector<8x1xf32>
    %430 = vector.broadcast %429 : vector<8x1xf32> to vector<8x8xf32>
    %431 = arith.mulf %426, %430 : vector<8x8xf32>
    %cst_247 = arith.constant dense<0.000000e+00> : vector<8x16xf32>
    %432 = tpu.matmul %431, %416, %cst_247 {dimension_numbers = #tpu.dot_dimension_numbers<[1], [0], [0], [1], [0, 0, 1, 1], [], []>} : vector<8x8xf32>, vector<8x16xf32>, vector<8x16xf32> -> vector<8x16xf32>
    %433 = vector.extract_strided_slice %411 {offsets = [0, 16], sizes = [8, 16], strides = [1, 1]} : vector<8x96xf32> to vector<8x16xf32>
    %434 = vector.extract_strided_slice %411 {offsets = [0, 48], sizes = [8, 16], strides = [1, 1]} : vector<8x96xf32> to vector<8x16xf32>
    %435 = vector.extract_strided_slice %411 {offsets = [0, 80], sizes = [8, 16], strides = [1, 1]} : vector<8x96xf32> to vector<8x16xf32>
    %436 = tpu.transpose %434, [1, 0] : vector<8x16xf32> -> vector<16x8xf32>
    %cst_248 = arith.constant dense<0.000000e+00> : vector<8x8xf32>
    %437 = tpu.matmul %433, %436, %cst_248 {dimension_numbers = #tpu.dot_dimension_numbers<[1], [0], [0], [1], [0, 0, 1, 1], [], []>} : vector<8x16xf32>, vector<16x8xf32>, vector<8x8xf32> -> vector<8x8xf32>
    %cst_249 = arith.constant 2.500000e-01 : f32
    %438 = vector.broadcast %cst_249 : f32 to vector<8x8xf32>
    %439 = arith.mulf %437, %438 : vector<8x8xf32>
    %440 = arith.addf %439, %413 : vector<8x8xf32>
    %cst_250 = arith.constant dense<0xFF800000> : vector<8xf32>
    %441 = vector.multi_reduction <maximumf>, %440, %cst_250 [1] : vector<8x8xf32> to vector<8xf32>
    %442 = vector.shape_cast %441 : vector<8xf32> to vector<8x1xf32>
    %443 = vector.broadcast %442 : vector<8x1xf32> to vector<8x8xf32>
    %444 = arith.subf %440, %443 : vector<8x8xf32>
    %445 = math.exp %444 : vector<8x8xf32>
    %cst_251 = arith.constant dense<0.000000e+00> : vector<8xf32>
    %446 = vector.multi_reduction <add>, %445, %cst_251 [1] : vector<8x8xf32> to vector<8xf32>
    %447 = vector.shape_cast %446 : vector<8xf32> to vector<8x1xf32>
    %448 = tpu.reciprocal %447 {approx = true} : vector<8x1xf32> -> vector<8x1xf32>
    %449 = vector.broadcast %448 : vector<8x1xf32> to vector<8x8xf32>
    %450 = arith.mulf %445, %449 : vector<8x8xf32>
    %cst_252 = arith.constant dense<0.000000e+00> : vector<8x16xf32>
    %451 = tpu.matmul %450, %435, %cst_252 {dimension_numbers = #tpu.dot_dimension_numbers<[1], [0], [0], [1], [0, 0, 1, 1], [], []>} : vector<8x8xf32>, vector<8x16xf32>, vector<8x16xf32> -> vector<8x16xf32>
    %452 = tpu.concatenate %432, %451 in 1 : vector<8x16xf32>, vector<8x16xf32> -> vector<8x32xf32>
    %453 = tpu.concatenate %410, %452 in 0 : vector<8x32xf32>, vector<8x32xf32> -> vector<16x32xf32>
    %cst_253 = arith.constant dense<0.000000e+00> : vector<16x32xf32>
    %454 = tpu.matmul %453, %347, %cst_253 {dimension_numbers = #tpu.dot_dimension_numbers<[1], [0], [0], [1], [0, 0, 1, 1], [], []>} : vector<16x32xf32>, vector<32x32xf32>, vector<16x32xf32> -> vector<16x32xf32>
    %455 = vector.broadcast %353 : vector<1x32xf32> to vector<16x32xf32>
    %456 = arith.addf %454, %455 : vector<16x32xf32>
    %457 = arith.addf %3, %456 : vector<16x32xf32>
    %cst_254 = arith.constant dense<0.000000e+00> : vector<16xf32>
    %458 = vector.multi_reduction <add>, %457, %cst_254 [1] : vector<16x32xf32> to vector<16xf32>
    %459 = vector.shape_cast %458 : vector<16xf32> to vector<16x1xf32>
    %cst_255 = arith.constant 3.200000e+01 : f32
    %460 = vector.broadcast %cst_255 : f32 to vector<16x1xf32>
    %461 = arith.divf %459, %460 : vector<16x1xf32>
    %462 = vector.broadcast %461 : vector<16x1xf32> to vector<16x32xf32>
    %463 = arith.subf %457, %462 : vector<16x32xf32>
    %464 = arith.mulf %463, %463 : vector<16x32xf32>
    %cst_256 = arith.constant dense<0.000000e+00> : vector<16xf32>
    %465 = vector.multi_reduction <add>, %464, %cst_256 [1] : vector<16x32xf32> to vector<16xf32>
    %466 = vector.shape_cast %465 : vector<16xf32> to vector<16x1xf32>
    %cst_257 = arith.constant 3.200000e+01 : f32
    %467 = vector.broadcast %cst_257 : f32 to vector<16x1xf32>
    %468 = arith.divf %466, %467 : vector<16x1xf32>
    %469 = vector.broadcast %461 : vector<16x1xf32> to vector<16x32xf32>
    %470 = arith.subf %457, %469 : vector<16x32xf32>
    %cst_258 = arith.constant 9.99999974E-6 : f32
    %471 = vector.broadcast %cst_258 : f32 to vector<16x1xf32>
    %472 = arith.addf %468, %471 : vector<16x1xf32>
    %473 = math.rsqrt %472 : vector<16x1xf32>
    %474 = vector.broadcast %473 : vector<16x1xf32> to vector<16x32xf32>
    %475 = arith.mulf %470, %474 : vector<16x32xf32>
    %476 = vector.broadcast %359 : vector<1x32xf32> to vector<16x32xf32>
    %477 = arith.mulf %475, %476 : vector<16x32xf32>
    %478 = vector.broadcast %361 : vector<1x32xf32> to vector<16x32xf32>
    %479 = arith.addf %477, %478 : vector<16x32xf32>
    %cst_259 = arith.constant dense<0.000000e+00> : vector<16x64xf32>
    %480 = tpu.matmul %479, %345, %cst_259 {dimension_numbers = #tpu.dot_dimension_numbers<[1], [0], [0], [1], [0, 0, 1, 1], [], []>} : vector<16x32xf32>, vector<32x64xf32>, vector<16x64xf32> -> vector<16x64xf32>
    %481 = vector.broadcast %355 : vector<1x64xf32> to vector<16x64xf32>
    %482 = arith.addf %480, %481 : vector<16x64xf32>
    %cst_260 = arith.constant 0.000000e+00 : f32
    %483 = vector.broadcast %cst_260 : f32 to vector<16x64xf32>
    %484 = arith.maximumf %482, %483 : vector<16x64xf32>
    %cst_261 = arith.constant dense<0.000000e+00> : vector<16x32xf32>
    %485 = tpu.matmul %484, %349, %cst_261 {dimension_numbers = #tpu.dot_dimension_numbers<[1], [0], [0], [1], [0, 0, 1, 1], [], []>} : vector<16x64xf32>, vector<64x32xf32>, vector<16x32xf32> -> vector<16x32xf32>
    %486 = vector.broadcast %357 : vector<1x32xf32> to vector<16x32xf32>
    %487 = arith.addf %485, %486 : vector<16x32xf32>
    %488 = arith.addf %479, %487 : vector<16x32xf32>
    %cst_262 = arith.constant dense<0.000000e+00> : vector<16xf32>
    %489 = vector.multi_reduction <add>, %488, %cst_262 [1] : vector<16x32xf32> to vector<16xf32>
    %490 = vector.shape_cast %489 : vector<16xf32> to vector<16x1xf32>
    %cst_263 = arith.constant 3.200000e+01 : f32
    %491 = vector.broadcast %cst_263 : f32 to vector<16x1xf32>
    %492 = arith.divf %490, %491 : vector<16x1xf32>
    %493 = vector.broadcast %492 : vector<16x1xf32> to vector<16x32xf32>
    %494 = arith.subf %488, %493 : vector<16x32xf32>
    %495 = arith.mulf %494, %494 : vector<16x32xf32>
    %cst_264 = arith.constant dense<0.000000e+00> : vector<16xf32>
    %496 = vector.multi_reduction <add>, %495, %cst_264 [1] : vector<16x32xf32> to vector<16xf32>
    %497 = vector.shape_cast %496 : vector<16xf32> to vector<16x1xf32>
    %cst_265 = arith.constant 3.200000e+01 : f32
    %498 = vector.broadcast %cst_265 : f32 to vector<16x1xf32>
    %499 = arith.divf %497, %498 : vector<16x1xf32>
    %500 = vector.broadcast %492 : vector<16x1xf32> to vector<16x32xf32>
    %501 = arith.subf %488, %500 : vector<16x32xf32>
    %cst_266 = arith.constant 9.99999974E-6 : f32
    %502 = vector.broadcast %cst_266 : f32 to vector<16x1xf32>
    %503 = arith.addf %499, %502 : vector<16x1xf32>
    %504 = math.rsqrt %503 : vector<16x1xf32>
    %505 = vector.broadcast %504 : vector<16x1xf32> to vector<16x32xf32>
    %506 = arith.mulf %501, %505 : vector<16x32xf32>
    %507 = vector.broadcast %363 : vector<1x32xf32> to vector<16x32xf32>
    %508 = arith.mulf %506, %507 : vector<16x32xf32>
    %509 = vector.broadcast %365 : vector<1x32xf32> to vector<16x32xf32>
    %510 = arith.addf %508, %509 : vector<16x32xf32>
    %c1_267 = arith.constant 1 : index
    %c1_268 = arith.constant 1 : index
    %c0_269 = arith.constant 0 : index
    %c0_270 = arith.constant 0 : index
    %511 = vector.load %arg3[%c1_267, %c1_268, %c0_269, %c0_270] : memref<2x2x32x192xf32, #tpu.memory_space<vmem>>, vector<1x1x32x96xf32>
    %512 = vector.shape_cast %511 : vector<1x1x32x96xf32> to vector<32x96xf32>
    %c1_271 = arith.constant 1 : index
    %c1_272 = arith.constant 1 : index
    %c0_273 = arith.constant 0 : index
    %c128_274 = arith.constant 128 : index
    %513 = vector.load %arg3[%c1_271, %c1_272, %c0_273, %c128_274] : memref<2x2x32x192xf32, #tpu.memory_space<vmem>>, vector<1x1x32x64xf32>
    %514 = vector.shape_cast %513 : vector<1x1x32x64xf32> to vector<32x64xf32>
    %c1_275 = arith.constant 1 : index
    %c1_276 = arith.constant 1 : index
    %c0_277 = arith.constant 0 : index
    %c0_278 = arith.constant 0 : index
    %515 = vector.load %arg4[%c1_275, %c1_276, %c0_277, %c0_278] : memref<2x2x96x32xf32, #tpu.memory_space<vmem>>, vector<1x1x32x32xf32>
    %516 = vector.shape_cast %515 : vector<1x1x32x32xf32> to vector<32x32xf32>
    %c1_279 = arith.constant 1 : index
    %c1_280 = arith.constant 1 : index
    %c32_281 = arith.constant 32 : index
    %c0_282 = arith.constant 0 : index
    %517 = vector.load %arg4[%c1_279, %c1_280, %c32_281, %c0_282] : memref<2x2x96x32xf32, #tpu.memory_space<vmem>>, vector<1x1x64x32xf32>
    %518 = vector.shape_cast %517 : vector<1x1x64x32xf32> to vector<64x32xf32>
    %c1_283 = arith.constant 1 : index
    %c1_284 = arith.constant 1 : index
    %c0_285 = arith.constant 0 : index
    %c0_286 = arith.constant 0 : index
    %519 = vector.load %arg5[%c1_283, %c1_284, %c0_285, %c0_286] : memref<2x2x8x128xf32, #tpu.memory_space<vmem>>, vector<1x1x1x96xf32>
    %520 = vector.shape_cast %519 : vector<1x1x1x96xf32> to vector<1x96xf32>
    %c1_287 = arith.constant 1 : index
    %c1_288 = arith.constant 1 : index
    %c1_289 = arith.constant 1 : index
    %c0_290 = arith.constant 0 : index
    %521 = vector.load %arg5[%c1_287, %c1_288, %c1_289, %c0_290] : memref<2x2x8x128xf32, #tpu.memory_space<vmem>>, vector<1x1x1x32xf32>
    %522 = vector.shape_cast %521 : vector<1x1x1x32xf32> to vector<1x32xf32>
    %c1_291 = arith.constant 1 : index
    %c1_292 = arith.constant 1 : index
    %c2_293 = arith.constant 2 : index
    %c0_294 = arith.constant 0 : index
    %523 = vector.load %arg5[%c1_291, %c1_292, %c2_293, %c0_294] : memref<2x2x8x128xf32, #tpu.memory_space<vmem>>, vector<1x1x1x64xf32>
    %524 = vector.shape_cast %523 : vector<1x1x1x64xf32> to vector<1x64xf32>
    %c1_295 = arith.constant 1 : index
    %c1_296 = arith.constant 1 : index
    %c3_297 = arith.constant 3 : index
    %c0_298 = arith.constant 0 : index
    %525 = vector.load %arg5[%c1_295, %c1_296, %c3_297, %c0_298] : memref<2x2x8x128xf32, #tpu.memory_space<vmem>>, vector<1x1x1x32xf32>
    %526 = vector.shape_cast %525 : vector<1x1x1x32xf32> to vector<1x32xf32>
    %c1_299 = arith.constant 1 : index
    %c1_300 = arith.constant 1 : index
    %c4_301 = arith.constant 4 : index
    %c0_302 = arith.constant 0 : index
    %527 = vector.load %arg5[%c1_299, %c1_300, %c4_301, %c0_302] : memref<2x2x8x128xf32, #tpu.memory_space<vmem>>, vector<1x1x1x32xf32>
    %528 = vector.shape_cast %527 : vector<1x1x1x32xf32> to vector<1x32xf32>
    %c1_303 = arith.constant 1 : index
    %c1_304 = arith.constant 1 : index
    %c5_305 = arith.constant 5 : index
    %c0_306 = arith.constant 0 : index
    %529 = vector.load %arg5[%c1_303, %c1_304, %c5_305, %c0_306] : memref<2x2x8x128xf32, #tpu.memory_space<vmem>>, vector<1x1x1x32xf32>
    %530 = vector.shape_cast %529 : vector<1x1x1x32xf32> to vector<1x32xf32>
    %c1_307 = arith.constant 1 : index
    %c1_308 = arith.constant 1 : index
    %c6_309 = arith.constant 6 : index
    %c0_310 = arith.constant 0 : index
    %531 = vector.load %arg5[%c1_307, %c1_308, %c6_309, %c0_310] : memref<2x2x8x128xf32, #tpu.memory_space<vmem>>, vector<1x1x1x32xf32>
    %532 = vector.shape_cast %531 : vector<1x1x1x32xf32> to vector<1x32xf32>
    %c1_311 = arith.constant 1 : index
    %c1_312 = arith.constant 1 : index
    %c7_313 = arith.constant 7 : index
    %c0_314 = arith.constant 0 : index
    %533 = vector.load %arg5[%c1_311, %c1_312, %c7_313, %c0_314] : memref<2x2x8x128xf32, #tpu.memory_space<vmem>>, vector<1x1x1x32xf32>
    %534 = vector.shape_cast %533 : vector<1x1x1x32xf32> to vector<1x32xf32>
    %cst_315 = arith.constant dense<0.000000e+00> : vector<16x96xf32>
    %535 = tpu.matmul %510, %512, %cst_315 {dimension_numbers = #tpu.dot_dimension_numbers<[1], [0], [0], [1], [0, 0, 1, 1], [], []>} : vector<16x32xf32>, vector<32x96xf32>, vector<16x96xf32> -> vector<16x96xf32>
    %536 = vector.broadcast %520 : vector<1x96xf32> to vector<16x96xf32>
    %537 = arith.addf %535, %536 : vector<16x96xf32>
    %538 = vector.extract_strided_slice %537 {offsets = [0, 0], sizes = [8, 96], strides = [1, 1]} : vector<16x96xf32> to vector<8x96xf32>
    %c0_316 = arith.constant 0 : index
    %c1_317 = arith.constant 1 : index
    %c0_318 = arith.constant 0 : index
    %c0_319 = arith.constant 0 : index
    %539 = vector.load %arg2[%c0_316, %c1_317, %c0_318, %c0_319] : memref<2x2x8x8xf32, #tpu.memory_space<vmem>>, vector<1x1x8x8xf32>
    %540 = vector.shape_cast %539 : vector<1x1x8x8xf32> to vector<8x8xf32>
    %541 = vector.extract_strided_slice %538 {offsets = [0, 0], sizes = [8, 16], strides = [1, 1]} : vector<8x96xf32> to vector<8x16xf32>
    %542 = vector.extract_strided_slice %538 {offsets = [0, 32], sizes = [8, 16], strides = [1, 1]} : vector<8x96xf32> to vector<8x16xf32>
    %543 = vector.extract_strided_slice %538 {offsets = [0, 64], sizes = [8, 16], strides = [1, 1]} : vector<8x96xf32> to vector<8x16xf32>
    %544 = tpu.transpose %542, [1, 0] : vector<8x16xf32> -> vector<16x8xf32>
    %cst_320 = arith.constant dense<0.000000e+00> : vector<8x8xf32>
    %545 = tpu.matmul %541, %544, %cst_320 {dimension_numbers = #tpu.dot_dimension_numbers<[1], [0], [0], [1], [0, 0, 1, 1], [], []>} : vector<8x16xf32>, vector<16x8xf32>, vector<8x8xf32> -> vector<8x8xf32>
    %cst_321 = arith.constant 2.500000e-01 : f32
    %546 = vector.broadcast %cst_321 : f32 to vector<8x8xf32>
    %547 = arith.mulf %545, %546 : vector<8x8xf32>
    %548 = arith.addf %547, %540 : vector<8x8xf32>
    %cst_322 = arith.constant dense<0xFF800000> : vector<8xf32>
    %549 = vector.multi_reduction <maximumf>, %548, %cst_322 [1] : vector<8x8xf32> to vector<8xf32>
    %550 = vector.shape_cast %549 : vector<8xf32> to vector<8x1xf32>
    %551 = vector.broadcast %550 : vector<8x1xf32> to vector<8x8xf32>
    %552 = arith.subf %548, %551 : vector<8x8xf32>
    %553 = math.exp %552 : vector<8x8xf32>
    %cst_323 = arith.constant dense<0.000000e+00> : vector<8xf32>
    %554 = vector.multi_reduction <add>, %553, %cst_323 [1] : vector<8x8xf32> to vector<8xf32>
    %555 = vector.shape_cast %554 : vector<8xf32> to vector<8x1xf32>
    %556 = tpu.reciprocal %555 {approx = true} : vector<8x1xf32> -> vector<8x1xf32>
    %557 = vector.broadcast %556 : vector<8x1xf32> to vector<8x8xf32>
    %558 = arith.mulf %553, %557 : vector<8x8xf32>
    %cst_324 = arith.constant dense<0.000000e+00> : vector<8x16xf32>
    %559 = tpu.matmul %558, %543, %cst_324 {dimension_numbers = #tpu.dot_dimension_numbers<[1], [0], [0], [1], [0, 0, 1, 1], [], []>} : vector<8x8xf32>, vector<8x16xf32>, vector<8x16xf32> -> vector<8x16xf32>
    %560 = vector.extract_strided_slice %538 {offsets = [0, 16], sizes = [8, 16], strides = [1, 1]} : vector<8x96xf32> to vector<8x16xf32>
    %561 = vector.extract_strided_slice %538 {offsets = [0, 48], sizes = [8, 16], strides = [1, 1]} : vector<8x96xf32> to vector<8x16xf32>
    %562 = vector.extract_strided_slice %538 {offsets = [0, 80], sizes = [8, 16], strides = [1, 1]} : vector<8x96xf32> to vector<8x16xf32>
    %563 = tpu.transpose %561, [1, 0] : vector<8x16xf32> -> vector<16x8xf32>
    %cst_325 = arith.constant dense<0.000000e+00> : vector<8x8xf32>
    %564 = tpu.matmul %560, %563, %cst_325 {dimension_numbers = #tpu.dot_dimension_numbers<[1], [0], [0], [1], [0, 0, 1, 1], [], []>} : vector<8x16xf32>, vector<16x8xf32>, vector<8x8xf32> -> vector<8x8xf32>
    %cst_326 = arith.constant 2.500000e-01 : f32
    %565 = vector.broadcast %cst_326 : f32 to vector<8x8xf32>
    %566 = arith.mulf %564, %565 : vector<8x8xf32>
    %567 = arith.addf %566, %540 : vector<8x8xf32>
    %cst_327 = arith.constant dense<0xFF800000> : vector<8xf32>
    %568 = vector.multi_reduction <maximumf>, %567, %cst_327 [1] : vector<8x8xf32> to vector<8xf32>
    %569 = vector.shape_cast %568 : vector<8xf32> to vector<8x1xf32>
    %570 = vector.broadcast %569 : vector<8x1xf32> to vector<8x8xf32>
    %571 = arith.subf %567, %570 : vector<8x8xf32>
    %572 = math.exp %571 : vector<8x8xf32>
    %cst_328 = arith.constant dense<0.000000e+00> : vector<8xf32>
    %573 = vector.multi_reduction <add>, %572, %cst_328 [1] : vector<8x8xf32> to vector<8xf32>
    %574 = vector.shape_cast %573 : vector<8xf32> to vector<8x1xf32>
    %575 = tpu.reciprocal %574 {approx = true} : vector<8x1xf32> -> vector<8x1xf32>
    %576 = vector.broadcast %575 : vector<8x1xf32> to vector<8x8xf32>
    %577 = arith.mulf %572, %576 : vector<8x8xf32>
    %cst_329 = arith.constant dense<0.000000e+00> : vector<8x16xf32>
    %578 = tpu.matmul %577, %562, %cst_329 {dimension_numbers = #tpu.dot_dimension_numbers<[1], [0], [0], [1], [0, 0, 1, 1], [], []>} : vector<8x8xf32>, vector<8x16xf32>, vector<8x16xf32> -> vector<8x16xf32>
    %579 = tpu.concatenate %559, %578 in 1 : vector<8x16xf32>, vector<8x16xf32> -> vector<8x32xf32>
    %580 = vector.extract_strided_slice %537 {offsets = [8, 0], sizes = [8, 96], strides = [1, 1]} : vector<16x96xf32> to vector<8x96xf32>
    %c1_330 = arith.constant 1 : index
    %c1_331 = arith.constant 1 : index
    %c0_332 = arith.constant 0 : index
    %c0_333 = arith.constant 0 : index
    %581 = vector.load %arg2[%c1_330, %c1_331, %c0_332, %c0_333] : memref<2x2x8x8xf32, #tpu.memory_space<vmem>>, vector<1x1x8x8xf32>
    %582 = vector.shape_cast %581 : vector<1x1x8x8xf32> to vector<8x8xf32>
    %583 = vector.extract_strided_slice %580 {offsets = [0, 0], sizes = [8, 16], strides = [1, 1]} : vector<8x96xf32> to vector<8x16xf32>
    %584 = vector.extract_strided_slice %580 {offsets = [0, 32], sizes = [8, 16], strides = [1, 1]} : vector<8x96xf32> to vector<8x16xf32>
    %585 = vector.extract_strided_slice %580 {offsets = [0, 64], sizes = [8, 16], strides = [1, 1]} : vector<8x96xf32> to vector<8x16xf32>
    %586 = tpu.transpose %584, [1, 0] : vector<8x16xf32> -> vector<16x8xf32>
    %cst_334 = arith.constant dense<0.000000e+00> : vector<8x8xf32>
    %587 = tpu.matmul %583, %586, %cst_334 {dimension_numbers = #tpu.dot_dimension_numbers<[1], [0], [0], [1], [0, 0, 1, 1], [], []>} : vector<8x16xf32>, vector<16x8xf32>, vector<8x8xf32> -> vector<8x8xf32>
    %cst_335 = arith.constant 2.500000e-01 : f32
    %588 = vector.broadcast %cst_335 : f32 to vector<8x8xf32>
    %589 = arith.mulf %587, %588 : vector<8x8xf32>
    %590 = arith.addf %589, %582 : vector<8x8xf32>
    %cst_336 = arith.constant dense<0xFF800000> : vector<8xf32>
    %591 = vector.multi_reduction <maximumf>, %590, %cst_336 [1] : vector<8x8xf32> to vector<8xf32>
    %592 = vector.shape_cast %591 : vector<8xf32> to vector<8x1xf32>
    %593 = vector.broadcast %592 : vector<8x1xf32> to vector<8x8xf32>
    %594 = arith.subf %590, %593 : vector<8x8xf32>
    %595 = math.exp %594 : vector<8x8xf32>
    %cst_337 = arith.constant dense<0.000000e+00> : vector<8xf32>
    %596 = vector.multi_reduction <add>, %595, %cst_337 [1] : vector<8x8xf32> to vector<8xf32>
    %597 = vector.shape_cast %596 : vector<8xf32> to vector<8x1xf32>
    %598 = tpu.reciprocal %597 {approx = true} : vector<8x1xf32> -> vector<8x1xf32>
    %599 = vector.broadcast %598 : vector<8x1xf32> to vector<8x8xf32>
    %600 = arith.mulf %595, %599 : vector<8x8xf32>
    %cst_338 = arith.constant dense<0.000000e+00> : vector<8x16xf32>
    %601 = tpu.matmul %600, %585, %cst_338 {dimension_numbers = #tpu.dot_dimension_numbers<[1], [0], [0], [1], [0, 0, 1, 1], [], []>} : vector<8x8xf32>, vector<8x16xf32>, vector<8x16xf32> -> vector<8x16xf32>
    %602 = vector.extract_strided_slice %580 {offsets = [0, 16], sizes = [8, 16], strides = [1, 1]} : vector<8x96xf32> to vector<8x16xf32>
    %603 = vector.extract_strided_slice %580 {offsets = [0, 48], sizes = [8, 16], strides = [1, 1]} : vector<8x96xf32> to vector<8x16xf32>
    %604 = vector.extract_strided_slice %580 {offsets = [0, 80], sizes = [8, 16], strides = [1, 1]} : vector<8x96xf32> to vector<8x16xf32>
    %605 = tpu.transpose %603, [1, 0] : vector<8x16xf32> -> vector<16x8xf32>
    %cst_339 = arith.constant dense<0.000000e+00> : vector<8x8xf32>
    %606 = tpu.matmul %602, %605, %cst_339 {dimension_numbers = #tpu.dot_dimension_numbers<[1], [0], [0], [1], [0, 0, 1, 1], [], []>} : vector<8x16xf32>, vector<16x8xf32>, vector<8x8xf32> -> vector<8x8xf32>
    %cst_340 = arith.constant 2.500000e-01 : f32
    %607 = vector.broadcast %cst_340 : f32 to vector<8x8xf32>
    %608 = arith.mulf %606, %607 : vector<8x8xf32>
    %609 = arith.addf %608, %582 : vector<8x8xf32>
    %cst_341 = arith.constant dense<0xFF800000> : vector<8xf32>
    %610 = vector.multi_reduction <maximumf>, %609, %cst_341 [1] : vector<8x8xf32> to vector<8xf32>
    %611 = vector.shape_cast %610 : vector<8xf32> to vector<8x1xf32>
    %612 = vector.broadcast %611 : vector<8x1xf32> to vector<8x8xf32>
    %613 = arith.subf %609, %612 : vector<8x8xf32>
    %614 = math.exp %613 : vector<8x8xf32>
    %cst_342 = arith.constant dense<0.000000e+00> : vector<8xf32>
    %615 = vector.multi_reduction <add>, %614, %cst_342 [1] : vector<8x8xf32> to vector<8xf32>
    %616 = vector.shape_cast %615 : vector<8xf32> to vector<8x1xf32>
    %617 = tpu.reciprocal %616 {approx = true} : vector<8x1xf32> -> vector<8x1xf32>
    %618 = vector.broadcast %617 : vector<8x1xf32> to vector<8x8xf32>
    %619 = arith.mulf %614, %618 : vector<8x8xf32>
    %cst_343 = arith.constant dense<0.000000e+00> : vector<8x16xf32>
    %620 = tpu.matmul %619, %604, %cst_343 {dimension_numbers = #tpu.dot_dimension_numbers<[1], [0], [0], [1], [0, 0, 1, 1], [], []>} : vector<8x8xf32>, vector<8x16xf32>, vector<8x16xf32> -> vector<8x16xf32>
    %621 = tpu.concatenate %601, %620 in 1 : vector<8x16xf32>, vector<8x16xf32> -> vector<8x32xf32>
    %622 = tpu.concatenate %579, %621 in 0 : vector<8x32xf32>, vector<8x32xf32> -> vector<16x32xf32>
    %cst_344 = arith.constant dense<0.000000e+00> : vector<16x32xf32>
    %623 = tpu.matmul %622, %516, %cst_344 {dimension_numbers = #tpu.dot_dimension_numbers<[1], [0], [0], [1], [0, 0, 1, 1], [], []>} : vector<16x32xf32>, vector<32x32xf32>, vector<16x32xf32> -> vector<16x32xf32>
    %624 = vector.broadcast %522 : vector<1x32xf32> to vector<16x32xf32>
    %625 = arith.addf %623, %624 : vector<16x32xf32>
    %626 = arith.addf %510, %625 : vector<16x32xf32>
    %cst_345 = arith.constant dense<0.000000e+00> : vector<16xf32>
    %627 = vector.multi_reduction <add>, %626, %cst_345 [1] : vector<16x32xf32> to vector<16xf32>
    %628 = vector.shape_cast %627 : vector<16xf32> to vector<16x1xf32>
    %cst_346 = arith.constant 3.200000e+01 : f32
    %629 = vector.broadcast %cst_346 : f32 to vector<16x1xf32>
    %630 = arith.divf %628, %629 : vector<16x1xf32>
    %631 = vector.broadcast %630 : vector<16x1xf32> to vector<16x32xf32>
    %632 = arith.subf %626, %631 : vector<16x32xf32>
    %633 = arith.mulf %632, %632 : vector<16x32xf32>
    %cst_347 = arith.constant dense<0.000000e+00> : vector<16xf32>
    %634 = vector.multi_reduction <add>, %633, %cst_347 [1] : vector<16x32xf32> to vector<16xf32>
    %635 = vector.shape_cast %634 : vector<16xf32> to vector<16x1xf32>
    %cst_348 = arith.constant 3.200000e+01 : f32
    %636 = vector.broadcast %cst_348 : f32 to vector<16x1xf32>
    %637 = arith.divf %635, %636 : vector<16x1xf32>
    %638 = vector.broadcast %630 : vector<16x1xf32> to vector<16x32xf32>
    %639 = arith.subf %626, %638 : vector<16x32xf32>
    %cst_349 = arith.constant 9.99999974E-6 : f32
    %640 = vector.broadcast %cst_349 : f32 to vector<16x1xf32>
    %641 = arith.addf %637, %640 : vector<16x1xf32>
    %642 = math.rsqrt %641 : vector<16x1xf32>
    %643 = vector.broadcast %642 : vector<16x1xf32> to vector<16x32xf32>
    %644 = arith.mulf %639, %643 : vector<16x32xf32>
    %645 = vector.broadcast %528 : vector<1x32xf32> to vector<16x32xf32>
    %646 = arith.mulf %644, %645 : vector<16x32xf32>
    %647 = vector.broadcast %530 : vector<1x32xf32> to vector<16x32xf32>
    %648 = arith.addf %646, %647 : vector<16x32xf32>
    %cst_350 = arith.constant dense<0.000000e+00> : vector<16x64xf32>
    %649 = tpu.matmul %648, %514, %cst_350 {dimension_numbers = #tpu.dot_dimension_numbers<[1], [0], [0], [1], [0, 0, 1, 1], [], []>} : vector<16x32xf32>, vector<32x64xf32>, vector<16x64xf32> -> vector<16x64xf32>
    %650 = vector.broadcast %524 : vector<1x64xf32> to vector<16x64xf32>
    %651 = arith.addf %649, %650 : vector<16x64xf32>
    %cst_351 = arith.constant 0.000000e+00 : f32
    %652 = vector.broadcast %cst_351 : f32 to vector<16x64xf32>
    %653 = arith.maximumf %651, %652 : vector<16x64xf32>
    %cst_352 = arith.constant dense<0.000000e+00> : vector<16x32xf32>
    %654 = tpu.matmul %653, %518, %cst_352 {dimension_numbers = #tpu.dot_dimension_numbers<[1], [0], [0], [1], [0, 0, 1, 1], [], []>} : vector<16x64xf32>, vector<64x32xf32>, vector<16x32xf32> -> vector<16x32xf32>
    %655 = vector.broadcast %526 : vector<1x32xf32> to vector<16x32xf32>
    %656 = arith.addf %654, %655 : vector<16x32xf32>
    %657 = arith.addf %648, %656 : vector<16x32xf32>
    %cst_353 = arith.constant dense<0.000000e+00> : vector<16xf32>
    %658 = vector.multi_reduction <add>, %657, %cst_353 [1] : vector<16x32xf32> to vector<16xf32>
    %659 = vector.shape_cast %658 : vector<16xf32> to vector<16x1xf32>
    %cst_354 = arith.constant 3.200000e+01 : f32
    %660 = vector.broadcast %cst_354 : f32 to vector<16x1xf32>
    %661 = arith.divf %659, %660 : vector<16x1xf32>
    %662 = vector.broadcast %661 : vector<16x1xf32> to vector<16x32xf32>
    %663 = arith.subf %657, %662 : vector<16x32xf32>
    %664 = arith.mulf %663, %663 : vector<16x32xf32>
    %cst_355 = arith.constant dense<0.000000e+00> : vector<16xf32>
    %665 = vector.multi_reduction <add>, %664, %cst_355 [1] : vector<16x32xf32> to vector<16xf32>
    %666 = vector.shape_cast %665 : vector<16xf32> to vector<16x1xf32>
    %cst_356 = arith.constant 3.200000e+01 : f32
    %667 = vector.broadcast %cst_356 : f32 to vector<16x1xf32>
    %668 = arith.divf %666, %667 : vector<16x1xf32>
    %669 = vector.broadcast %661 : vector<16x1xf32> to vector<16x32xf32>
    %670 = arith.subf %657, %669 : vector<16x32xf32>
    %cst_357 = arith.constant 9.99999974E-6 : f32
    %671 = vector.broadcast %cst_357 : f32 to vector<16x1xf32>
    %672 = arith.addf %668, %671 : vector<16x1xf32>
    %673 = math.rsqrt %672 : vector<16x1xf32>
    %674 = vector.broadcast %673 : vector<16x1xf32> to vector<16x32xf32>
    %675 = arith.mulf %670, %674 : vector<16x32xf32>
    %676 = vector.broadcast %532 : vector<1x32xf32> to vector<16x32xf32>
    %677 = arith.mulf %675, %676 : vector<16x32xf32>
    %678 = vector.broadcast %534 : vector<1x32xf32> to vector<16x32xf32>
    %679 = arith.addf %677, %678 : vector<16x32xf32>
    %680 = vector.broadcast %1 : vector<1x32xf32> to vector<16x32xf32>
    %681 = arith.mulf %341, %680 : vector<16x32xf32>
    %cst_358 = arith.constant dense<0.000000e+00> : vector<16xf32>
    %682 = vector.multi_reduction <add>, %681, %cst_358 [1] : vector<16x32xf32> to vector<16xf32>
    %683 = vector.shape_cast %682 : vector<16xf32> to vector<16x1xf32>
    %684 = vector.broadcast %1 : vector<1x32xf32> to vector<16x32xf32>
    %685 = arith.mulf %679, %684 : vector<16x32xf32>
    %cst_359 = arith.constant dense<0.000000e+00> : vector<16xf32>
    %686 = vector.multi_reduction <add>, %685, %cst_359 [1] : vector<16x32xf32> to vector<16xf32>
    %687 = vector.shape_cast %686 : vector<16xf32> to vector<16x1xf32>
    %688 = arith.subf %687, %683 : vector<16x1xf32>
    %689 = math.exp %688 : vector<16x1xf32>
    %cst_360 = arith.constant 1.000000e+00 : f32
    %690 = vector.broadcast %cst_360 : f32 to vector<16x1xf32>
    %691 = arith.addf %690, %689 : vector<16x1xf32>
    %692 = tpu.reciprocal %691 {approx = true} : vector<16x1xf32> -> vector<16x1xf32>
    %693 = vector.broadcast %692 : vector<16x1xf32> to vector<16x32xf32>
    %694 = arith.mulf %693, %341 : vector<16x32xf32>
    %cst_361 = arith.constant 1.000000e+00 : f32
    %695 = vector.broadcast %cst_361 : f32 to vector<16x1xf32>
    %696 = arith.subf %695, %692 : vector<16x1xf32>
    %697 = vector.broadcast %696 : vector<16x1xf32> to vector<16x32xf32>
    %698 = arith.mulf %697, %679 : vector<16x32xf32>
    %699 = arith.addf %694, %698 : vector<16x32xf32>
    %c0_362 = arith.constant 0 : index
    %c0_363 = arith.constant 0 : index
    %700 = vector.load %arg6[%c0_362, %c0_363] : memref<16x32xf32, #tpu.memory_space<vmem>>, vector<16x32xf32>
    tpu.vector_store %arg6[%c0_362, %c0_363], %699 {strides = array<i32>} : memref<16x32xf32, #tpu.memory_space<vmem>>, vector<16x32xf32>,
    return
  }
}

</mosaic_0001>

<bundles_post_ra>
// kernel: batch_transformer_forward.1
= control target key start
LH: loop header
LB: loop body
LE: loop exit
PB: predicated region body
PF: predicated region fallthrough
CT: control target
= control target key end

     0   :  { %vm60_vm0 = vcmask 261120   ;;  %s3394_s0 = inlined_call_operand.vmem [shape: f32[16,32], index: 0, kind: input, shape index: {}]   ;;  %s3395_s1 = inlined_call_operand.vmem [shape: f32[24,32], index: 1, kind: input, shape index: {}]   ;;  %s3396_s2 = inlined_call_operand.vmem [shape: f32[2,2,8,8], index: 2, kind: input, shape index: {}]   ;;  %s3397_s3 = inlined_call_operand.vmem [shape: f32[2,2,32,192], index: 3, kind: input, shape index: {}]   ;;  %s3398_s4 = inlined_call_operand.vmem [shape: f32[2,2,96,32], index: 4, kind: input, shape index: {}]   ;;  %s3399_s5 = inlined_call_operand.vmem [shape: f32[2,2,8,128], index: 5, kind: input, shape index: {}]   ;;  %s3400_s6 = inlined_call_operand.hbm [shape: f32[16,32], index: 6, kind: output, shape index: {}]  }
   0x1   :  { %v34_v0 = vld [vmem:[%s3397_s3 + $0x30] sm:$0xff]  ;;  %v33_v1 = vld [vmem:[%s3397_s3 + $0x20] sm:$0xff] }
   0x2   :  { %79 = vmatpush.msra.mxu0 %v34_v0  ;;  %v32_v2 = vld [vmem:[%s3397_s3 + $0x10] sm:$0xff]  ;;  %v24_v3 = vld [vmem:[%s3395_s1] sm:$0xff] }
   0x3   :  { %v27_v4 = vld [vmem:[%s3394_s0] sm:$0xff] }
   0x4   :  { %v31_v5 = vld [vmem:[%s3397_s3] sm:$0xff]  ;;  %80 = vmatpush.msra.mxu0 %v33_v1  ;;  %v2632_v6 = vadd.f32 %v27_v4, %v24_v3 }
   0x6   :  { %81 = vmatpush.msra.mxu0 %v32_v2 }
   0x8   :  { %82 = vmatpush.msra.mxu0 %v31_v5 }
   0x9   :  { %2227 = vmatmul.msk.f32.vlgmr.msra.gmra.mxu0 %vm60_vm0, %v2632_v6 }
   0xa   :  { %11 = vsyncpa [#allocation3], 0  ;;  %v2404_v7 = vld [vmem:[%s3399_s5] ss:$0 sm:$0xff]  ;;  %s2569_s11 = smov 112   ;;  %s2570_s12 = smov 96  }
   0xb   :  { %s2571_s13 = smov 80   ;;  %vm94_vm1 = vcmask 130048   ;;  %v25_v13 = vld [vmem:[%s3395_s1 + $0x8] sm:$0xff]  ;;  %v2659_v17 = vld [vmem:[%s3396_s2] sm:$0xff]  ;;  %vm121_vm2 = vcmask 64512   ;;  %s2573_s20 = smov 48  }
   0xc   :  { %v28_v14 = vld [vmem:[%s3394_s0 + $0x8] sm:$0xff]  ;;  %s2572_s0 = smov 64   ;;  %v2687_v51 = vld [vmem:[%s3396_s2 + $0x10] sm:$0xff]  ;;  %s2574_s23 = smov 16   ;;  %vm493_vm10 = vcmask 523264  }
   0xd   :  { %v2652_v15 = vadd.f32 %v28_v14, %v25_v13  ;;  %v42_v14 = vld [vmem:[%s3398_s4 + $0x18] sm:$0xff] }
  0x11   :  { %2228 = vmatmul.msk.f32.gmra.mxu0 %vm60_vm0, %v2652_v15 }
  0x86   :  { %v84_v8 = vpop.f32.mrf.mxu0 }
  0x87   :  { %v85_v9 = vadd.f32 %v2404_v7, %v84_v8 }
  0x89   :  { %159 = vrot.lane.b32.xlu1 %v85_v9, %s2569_s11  ;;  %92 = vrot.lane.b32.xlu0 %v85_v9, %s2570_s12 }
  0x8e   :  { %v87_v28 = vpop.f32.mrf.mxu0 }
  0x8f   :  { %v2665_v29 = vadd.f32 %v2404_v7, %v87_v28 }
  0x91   :  { %161 = vrot.lane.b32.xlu0 %v85_v9, %s2571_s13 }
  0xfb   :  { %v93_v10 = vpop.permute.xlu0 %92  ;;  %v160_v12 = vpop.permute.xlu1 %159 }
  0xfc   :  { %2229 = vmatpush.xpose.msk.msra.mxu1 %vm94_vm1, %v93_v10 }
  0xff   :  { %2230 = vmatmul.msk.f32.vlgmr.msra.gmra.mxu1 %vm94_vm1, %v85_v9 }
 0x103   :  { %v162_v11 = vpop.permute.xlu0 %161 }
 0x104   :  { %2232 = vmatpush.xpose.msk.msra.mxu3 %vm94_vm1, %v162_v11 }
 0x107   :  { %2233 = vmatmul.msk.f32.vlgmr.msra.gmra.mxu3 %vm94_vm1, %v160_v12 }
 0x17c   :  { %v116_v16 = vpop.f32.mrf.mxu1 }
 0x17d   :  { %v119_v18 = vmul.f32 0.25, %v116_v16  ;;  %v41_v16 = vld [vmem:[%s3398_s4 + $0x10] sm:$0xff] }
 0x17f   :  { %v120_v19 = vadd.f32 %v119_v18, %v2659_v17  ;;  %v40_v18 = vld [vmem:[%s3398_s4 + $0x8] sm:$0xff] }
 0x181   :  { %v122_v20 = vsel %vm121_vm2, %v120_v19, -inf }
 0x182   :  { %123 = vmax.xlane.f32.xlu1 %v122_v20 }
 0x18a   :  { %v184_v21 = vpop.f32.mrf.mxu3 }
 0x18b   :  { %v187_v22 = vmul.f32 0.25, %v184_v21 }
 0x18d   :  { %v188_v23 = vadd.f32 %v187_v22, %v2659_v17 }
 0x18f   :  { %v189_v24 = vsel %vm121_vm2, %v188_v23, -inf }
 0x190   :  { %190 = vmax.xlane.f32.xlu2 %v189_v24  ;;  %v2405_v24 = vld [vmem:[%s3399_s5 + $0x1] ss:$0 sm:$0xff] }
 0x19b   :  { %299 = vrot.lane.b32.xlu1 %v2665_v29, %s2569_s11 }
 0x1f5   :  { %v124_v25 = vpop.xlane.xlu1 %123 }
 0x1f6   :  { %v125_v26 = vsub.f32 %v120_v19, %v124_v25  ;;  %v39_v19 = vld [vmem:[%s3398_s4] sm:$0xff] }
 0x1f8   :  { %v126_v27 = vmul.f32 1.442695, %v125_v26 }
 0x1fa   :  { %2437 = vpow2.f32 %v126_v27 }
 0x200   :  { %v2438_v30 = vpop.eup %2437 }
 0x201   :  { %v128_v31 = vsel %vm121_vm2, %v2438_v30, 0.0 }
 0x202   :  { %129 = vadd.xlane.f32.xlu2 %v128_v31  ;;  %v2575_v31 = vmov 32.0  }
 0x203   :  { %v191_v32 = vpop.xlane.xlu2 %190 }
 0x204   :  { %v192_v33 = vsub.f32 %v188_v23, %v191_v32 }
 0x206   :  { %v193_v34 = vmul.f32 1.442695, %v192_v33 }
 0x208   :  { %2439 = vpow2.f32 %v193_v34 }
 0x20d   :  { %v300_v46 = vpop.permute.xlu1 %299 }
 0x20e   :  { %v2440_v35 = vpop.eup %2439 }
 0x20f   :  { %v195_v36 = vsel %vm121_vm2, %v2440_v35, 0.0 }
 0x210   :  { %196 = vadd.xlane.f32.xlu0 %v195_v36 }
 0x21a   :  { %133 = vrot.lane.b32.xlu2 %v85_v9, %s2572_s0 }
 0x222   :  { %200 = vrot.lane.b32.xlu2 %v85_v9, %s2573_s20 }
 0x22a   :  { %301 = vrot.lane.b32.xlu2 %v2665_v29, %s2571_s13 }
 0x232   :  { %234 = vrot.lane.b32.xlu2 %v2665_v29, %s2570_s12 }
 0x275   :  { %v130_v37 = vpop.xlane.xlu2 %129 }
 0x276   :  { %2441 = vrcp.f32 %v130_v37 }
 0x27c   :  { %v2442_v38 = vpop.eup %2441 }
 0x27d   :  { %v134_v39 = vpop.permute.xlu2 %133  ;;  %v132_v40 = vmul.f32 %v2442_v38, %v2438_v30 }
 0x27e   :  { %154 = vmatpush.msra.mxu2 %v134_v39 }
 0x27f   :  { %2231 = vmatmul.msk.f32.vlgmr.msra.gmra.mxu2 %vm121_vm2, %v132_v40 }
 0x283   :  { %v197_v41 = vpop.xlane.xlu0 %196 }
 0x284   :  { %2443 = vrcp.f32 %v197_v41 }
 0x285   :  { %v201_v42 = vpop.permute.xlu2 %200 }
 0x286   :  { %221 = vmatpush.msrb.mxu2 %v201_v42 }
 0x28a   :  { %v2444_v43 = vpop.eup %2443 }
 0x28b   :  { %v199_v44 = vmul.f32 %v2444_v43, %v2440_v35 }
 0x28d   :  { %2234 = vmatmul.msk.f32.vlgmr.msrb.gmra.mxu2 %vm121_vm2, %v199_v44  ;;  %v302_v45 = vpop.permute.xlu2 %301 }
 0x28e   :  { %2239 = vmatpush.xpose.msk.msra.mxu2 %vm94_vm1, %v302_v45 }
 0x295   :  { %2240 = vmatmul.msk.f32.vlgmr.msra.gmra.mxu2 %vm94_vm1, %v300_v46  ;;  %v235_v47 = vpop.permute.xlu2 %234 }
 0x296   :  { %2236 = vmatpush.xpose.msk.msrb.mxu1 %vm94_vm1, %v235_v47  ;;  %v38_v47 = vld [vmem:[%s3397_s3 + $0x38] sm:$0xff] }
 0x297   :  { %479 = vmatpush.msrb.mxu2 %v38_v47 }
 0x299   :  { %2237 = vmatmul.msk.f32.vlgmr.msrb.gmra.mxu1 %vm94_vm1, %v2665_v29 }
 0x302   :  { %v156_v48 = vpop.f32.mrf.mxu2 }
 0x310   :  { %v223_v49 = vpop.f32.mrf.mxu2 }
 0x316   :  { %v257_v50 = vpop.f32.mrf.mxu1 }
 0x317   :  { %v260_v52 = vmul.f32 0.25, %v257_v50  ;;  %v35_v50 = vld [vmem:[%s3397_s3 + $0x8] sm:$0xff] }
 0x318   :  { %v324_v53 = vpop.f32.mrf.mxu2 }
 0x319   :  { %v327_v54 = vmul.f32 0.25, %v324_v53  ;;  %v261_v55 = vadd.f32 %v2687_v51, %v260_v52 }
 0x31b   :  { %v262_v56 = vsel %vm121_vm2, %v261_v55, -inf  ;;  %v328_v57 = vadd.f32 %v2687_v51, %v327_v54 }
 0x31c   :  { %263 = vmax.xlane.f32.xlu2 %v262_v56 }
 0x31d   :  { %v329_v58 = vsel %vm121_vm2, %v328_v57, -inf }
 0x31e   :  { %330 = vmax.xlane.f32.xlu0 %v329_v58 }
 0x332   :  { %340 = vrot.lane.b32.xlu0 %v2665_v29, %s2573_s20 }
 0x38f   :  { %v264_v59 = vpop.xlane.xlu2 %263 }
 0x390   :  { %v265_v60 = vsub.f32 %v261_v55, %v264_v59 }
 0x391   :  { %v331_v61 = vpop.xlane.xlu0 %330 }
 0x392   :  { %v266_v62 = vmul.f32 1.442695, %v265_v60  ;;  %v332_v63 = vsub.f32 %v328_v57, %v331_v61  ;;  %v2406_v61 = vld [vmem:[%s3399_s5 + $0x4] ss:$0 sm:$0xff] }
 0x394   :  { %2445 = vpow2.f32 %v266_v62  ;;  %v333_v0 = vmul.f32 1.442695, %v332_v63 }
 0x396   :  { %2447 = vpow2.f32 %v333_v0  ;;  %v2407_v0 = vld [vmem:[%s3399_s5 + $0x5] ss:$0 sm:$0xff] }
 0x39a   :  { %v2446_v1 = vpop.eup %2445 }
 0x39b   :  { %v268_v2 = vsel %vm121_vm2, %v2446_v1, 0.0 }
 0x39c   :  { %v2448_v3 = vpop.eup %2447  ;;  %269 = vadd.xlane.f32.xlu1 %v268_v2 }
 0x39d   :  { %v335_v4 = vsel %vm121_vm2, %v2448_v3, 0.0 }
 0x39e   :  { %336 = vadd.xlane.f32.xlu0 %v335_v4 }
 0x3a4   :  { %v341_v5 = vpop.permute.xlu0 %340 }
 0x3a5   :  { %361 = vmatpush.msra.mxu1 %v341_v5 }
 0x3b2   :  { %273 = vrot.lane.b32.xlu0 %v2665_v29, %s2572_s0 }
 0x3ba   :  { %227 = vrot.lane.b32.xlu0 %v223_v49, %s2574_s23  ;;  %v36_v49 = vld [vmem:[%s3397_s3 + $0x18] sm:$0xff] }
 0x40f   :  { %v270_v9 = vpop.xlane.xlu1 %269 }
 0x411   :  { %v337_v7 = vpop.xlane.xlu0 %336 }
 0x412   :  { %2449 = vrcp.f32 %v337_v7 }
 0x413   :  { %2451 = vrcp.f32 %v270_v9  ;;  %v50_v9 = vld [vmem:[%s3398_s4 + $0x58] sm:$0xff] }
 0x414   :  { %2453 = vrcp.f32 %v2575_v31  ;;  %v2408_v31 = vld [vmem:[%s3399_s5 + $0x2] ss:$0 sm:$0xff] }
 0x418   :  { %v2450_v8 = vpop.eup %2449 }
 0x419   :  { %v339_v10 = vmul.f32 %v2450_v8, %v2448_v3  ;;  %v2452_v11 = vpop.eup %2451 }
 0x41a   :  { %v272_v13 = vmul.f32 %v2452_v11, %v2446_v1  ;;  %v2454_v32 = vpop.eup %2453  ;;  %v48_v11 = vld [vmem:[%s3398_s4 + $0x48] sm:$0xff] }
 0x41b   :  { %2241 = vmatmul.msk.f32.vlgmr.msra.gmra.mxu1 %vm121_vm2, %v339_v10  ;;  %v410_v33 = vmul.f32 32.0, %v2454_v32  ;;  %vm414_vm3 = vweird.f32 %v2454_v32  ;;  %v49_v10 = vld [vmem:[%s3398_s4 + $0x50] sm:$0xff] }
 0x41d   :  { %v411_v34 = vsub.f32 1.0, %v410_v33 }
 0x41f   :  { %v412_v35 = vmul.f32 %v2454_v32, %v411_v34 }
 0x421   :  { %v413_v36 = vadd.f32 %v2454_v32, %v412_v35 }
 0x423   :  { %v2724_v37 = vsel %vm414_vm3, %v2454_v32, %v413_v36 }
 0x424   :  { %v274_v12 = vpop.permute.xlu0 %273 }
 0x425   :  { %294 = vmatpush.msrb.mxu3 %v274_v12  ;;  %v47_v12 = vld [vmem:[%s3398_s4 + $0x40] sm:$0xff] }
 0x426   :  { %2238 = vmatmul.msk.f32.vlgmr.msrb.gmra.mxu3 %vm121_vm2, %v272_v13  ;;  %v46_v13 = vld [vmem:[%s3398_s4 + $0x38] sm:$0xff] }
 0x427   :  { %390 = vmatpush.msra.mxu3 %v42_v14  ;;  %v45_v14 = vld [vmem:[%s3398_s4 + $0x30] sm:$0xff] }
 0x429   :  { %391 = vmatpush.msra.mxu3 %v41_v16  ;;  %v44_v16 = vld [vmem:[%s3398_s4 + $0x28] sm:$0xff] }
 0x42b   :  { %392 = vmatpush.msra.mxu3 %v40_v18 }
 0x42c   :  { %v228_v20 = vpop.permute.xlu0 %227 }
 0x42d   :  { %v230_v21 = vsel %vm94_vm1, %v156_v48, %v228_v20  ;;  %393 = vmatpush.msra.mxu3 %v39_v19  ;;  %v37_v48 = vld [vmem:[%s3397_s3 + $0x28] sm:$0xff]  ;;  %v43_v20 = vld [vmem:[%s3398_s4 + $0x20] sm:$0xff] }
 0x42e   :  { %2242 = vmatmul.msk.f32.vlgmr.msra.gmra.mxu3 %vm60_vm0, %v230_v21  ;;  %480 = vmatpush.msrb.mxu2 %v37_v48 }
 0x430   :  { %481 = vmatpush.msrb.mxu2 %v36_v49 }
 0x432   :  { %482 = vmatpush.msrb.mxu2 %v35_v50 }
 0x434   :  { %508 = vmatpush.msra.mxu2 %v50_v9 }
 0x436   :  { %509 = vmatpush.msra.mxu2 %v49_v10  ;;  %v2410_v10 = vld [vmem:[%s3399_s5 + $0x6] ss:$0 sm:$0xff] }
 0x438   :  { %510 = vmatpush.msra.mxu2 %v48_v11 }
 0x43a   :  { %511 = vmatpush.msra.mxu2 %v47_v12 }
 0x43c   :  { %512 = vmatpush.msra.mxu2 %v46_v13  ;;  %v2411_v13 = vld [vmem:[%s3399_s5 + $0x7] ss:$0 sm:$0xff] }
 0x43e   :  { %513 = vmatpush.msra.mxu2 %v45_v14 }
 0x440   :  { %514 = vmatpush.msra.mxu2 %v44_v16 }
 0x442   :  { %515 = vmatpush.msra.mxu2 %v43_v20 }
 0x498   :  { %v363_v22 = vpop.f32.mrf.mxu1 }
 0x499   :  { %367 = vrot.lane.b32.xlu2 %v363_v22, %s2574_s23 }
 0x4a9   :  { %v296_v23 = vpop.f32.mrf.mxu3 }
 0x4b1   :  { %v395_v25 = vpop.f32.mrf.mxu3 }
 0x4b2   :  { %v396_v26 = vadd.f32 %v2405_v24, %v395_v25 }
 0x4b4   :  { %v401_v27 = vadd.f32 %v396_v26, %v2632_v6 }
 0x4b6   :  { %v403_v28 = vsel %vm60_vm0, %v401_v27, 0.0 }
 0x4b7   :  { %404 = vadd.xlane.f32.xlu0 %v403_v28 }
 0x4f3   :  { %v368_v29 = vpop.permute.xlu2 %367 }
 0x4f4   :  { %v370_v30 = vsel %vm94_vm1, %v296_v23, %v368_v29 }
 0x4f5   :  { %2243 = vmatmul.msk.f32.gmra.mxu3 %vm60_vm0, %v370_v30 }
 0x52a   :  { %v405_v38 = vpop.xlane.xlu0 %404 }
 0x52b   :  { %v416_v39 = vmul.f32 %v2724_v37, %v405_v38 }
 0x52d   :  { %v418_v40 = vsub.f32 %v401_v27, %v416_v39 }
 0x52f   :  { %v420_v41 = vmul.f32 %v418_v40, %v418_v40 }
 0x531   :  { %v422_v42 = vsel %vm60_vm0, %v420_v41, 0.0 }
 0x532   :  { %423 = vadd.xlane.f32.xlu1 %v422_v42 }
 0x578   :  { %v398_v43 = vpop.f32.mrf.mxu3 }
 0x579   :  { %v399_v44 = vadd.f32 %v2405_v24, %v398_v43 }
 0x57b   :  { %v402_v45 = vadd.f32 %v399_v44, %v2652_v15 }
 0x57d   :  { %v406_v46 = vsel %vm60_vm0, %v402_v45, 0.0 }
 0x57e   :  { %407 = vadd.xlane.f32.xlu1 %v406_v46 }
 0x5a5   :  { %v424_v52 = vpop.xlane.xlu1 %423 }
 0x5a6   :  { %v428_v53 = vmul.f32 %v424_v52, %v2724_v37 }
 0x5a8   :  { %v430_v54 = vadd.f32 1e-05, %v428_v53 }
 0x5aa   :  { %2455 = vrsqrt.f32 %v430_v54  ;;  %vm438_vm5 = vweird.f32 %v430_v54 }
 0x5b0   :  { %v2456_v55 = vpop.eup %2455 }
 0x5b1   :  { %v433_v56 = vmul.f32 %v2456_v55, %v430_v54  ;;  %vm439_vm4 = vweird.f32 %v2456_v55 }
 0x5b2   :  { %vm440_vm6 = vmor %vm438_vm5, %vm439_vm4 }
 0x5b3   :  { %v434_v57 = vmul.f32 %v2456_v55, %v433_v56  ;;  %v2250_v56 = vld [vmem:[%s3397_s3 + $0x60] sm:$0xff] }
 0x5b5   :  { %v435_v58 = vmul.f32 0.5, %v434_v57  ;;  %v2249_v57 = vld [vmem:[%s3397_s3 + $0x50] sm:$0xff] }
 0x5b7   :  { %v436_v59 = vsub.f32 1.5, %v435_v58  ;;  %v2248_v58 = vld [vmem:[%s3397_s3 + $0x40] sm:$0xff] }
 0x5b9   :  { %v437_v60 = vmul.f32 %v2456_v55, %v436_v59 }
 0x5bb   :  { %v441_v62 = vsel %vm440_vm6, %v2456_v55, %v437_v60  ;;  %v2251_v55 = vld [vmem:[%s3397_s3 + $0x70] sm:$0xff] }
 0x5bc   :  { %v452_v63 = vmul.f32 %v441_v62, %v418_v40  ;;  %v2409_v40 = vld [vmem:[%s3399_s5 + $0x3] ss:$0 sm:$0xff]  ;;  %625 = vmatpush.msrb.mxu1 %v2251_v55 }
 0x5be   :  { %v455_v1 = vmul.f32 %v2406_v61, %v452_v63  ;;  %626 = vmatpush.msrb.mxu1 %v2250_v56 }
 0x5c0   :  { %v458_v2 = vadd.f32 %v2407_v0, %v455_v1  ;;  %627 = vmatpush.msrb.mxu1 %v2249_v57 }
 0x5c2   :  { %2244 = vmatmul.msk.f32.vlgmr.msrb.gmra.mxu2 %vm60_vm0, %v458_v2  ;;  %628 = vmatpush.msrb.mxu1 %v2248_v58 }
 0x5f1   :  { %v408_v3 = vpop.xlane.xlu1 %407 }
 0x5f2   :  { %v417_v4 = vmul.f32 %v2724_v37, %v408_v3 }
 0x5f4   :  { %v419_v5 = vsub.f32 %v402_v45, %v417_v4 }
 0x5f6   :  { %v421_v7 = vmul.f32 %v419_v5, %v419_v5 }
 0x5f8   :  { %v425_v8 = vsel %vm60_vm0, %v421_v7, 0.0 }
 0x5f9   :  { %426 = vadd.xlane.f32.xlu2 %v425_v8 }
 0x645   :  { %v484_v33 = vpop.f32.mrf.mxu2 }
 0x646   :  { %v485_v34 = vadd.f32 %v2408_v31, %v484_v33 }
 0x648   :  { %v490_v35 = vmax.f32 %v485_v34, 0.0 }
 0x66c   :  { %v427_v18 = vpop.xlane.xlu2 %426 }
 0x66d   :  { %v429_v19 = vmul.f32 %v427_v18, %v2724_v37 }
 0x66f   :  { %v431_v21 = vadd.f32 1e-05, %v429_v19 }
 0x671   :  { %2457 = vrsqrt.f32 %v431_v21  ;;  %vm448_vm8 = vweird.f32 %v431_v21 }
 0x677   :  { %v2458_v22 = vpop.eup %2457 }
 0x678   :  { %v443_v23 = vmul.f32 %v2458_v22, %v431_v21  ;;  %vm449_vm7 = vweird.f32 %v2458_v22 }
 0x679   :  { %vm450_vm9 = vmor %vm448_vm8, %vm449_vm7 }
 0x67a   :  { %v444_v24 = vmul.f32 %v2458_v22, %v443_v23 }
 0x67c   :  { %v445_v25 = vmul.f32 0.5, %v444_v24 }
 0x67e   :  { %v446_v26 = vsub.f32 1.5, %v445_v25 }
 0x680   :  { %v447_v27 = vmul.f32 %v2458_v22, %v446_v26 }
 0x682   :  { %v451_v28 = vsel %vm450_vm9, %v2458_v22, %v447_v27  ;;  %v2412_v27 = vld [vmem:[%s3399_s5 + $0x8] ss:$0 sm:$0xff] }
 0x683   :  { %v453_v29 = vmul.f32 %v451_v28, %v419_v5 }
 0x685   :  { %v456_v30 = vmul.f32 %v2406_v61, %v453_v29 }
 0x687   :  { %v459_v32 = vadd.f32 %v2407_v0, %v456_v30 }
 0x689   :  { %2245 = vmatmul.msk.f32.gmra.mxu2 %vm60_vm0, %v459_v32 }
 0x691   :  { %2246 = vmatmul.msk.f32.vlgmr.msra.gmra.mxu2 %vm493_vm10, %v490_v35 }
 0x70c   :  { %v487_v36 = vpop.f32.mrf.mxu2 }
 0x70d   :  { %v488_v38 = vadd.f32 %v2408_v31, %v487_v36 }
 0x70f   :  { %v491_v39 = vmax.f32 %v488_v38, 0.0 }
 0x711   :  { %2247 = vmatmul.msk.f32.gmra.mxu2 %vm493_vm10, %v491_v39 }
 0x714   :  { %v517_v41 = vpop.f32.mrf.mxu2 }
 0x715   :  { %v518_v42 = vadd.f32 %v2409_v40, %v517_v41 }
 0x717   :  { %v523_v43 = vadd.f32 %v518_v42, %v458_v2 }
 0x719   :  { %v525_v44 = vsel %vm60_vm0, %v523_v43, 0.0 }
 0x71a   :  { %526 = vadd.xlane.f32.xlu1 %v525_v44 }
 0x78d   :  { %v527_v45 = vpop.xlane.xlu1 %526 }
 0x78e   :  { %v531_v46 = vmul.f32 %v527_v45, %v2724_v37 }
 0x790   :  { %v533_v47 = vsub.f32 %v523_v43, %v531_v46 }
 0x792   :  { %v535_v48 = vmul.f32 %v533_v47, %v533_v47 }
 0x794   :  { %v520_v49 = vpop.f32.mrf.mxu2  ;;  %v537_v50 = vsel %vm60_vm0, %v535_v48, 0.0 }
 0x795   :  { %v521_v52 = vadd.f32 %v2409_v40, %v520_v49  ;;  %538 = vadd.xlane.f32.xlu1 %v537_v50 }
 0x797   :  { %v524_v53 = vadd.f32 %v521_v52, %v459_v32 }
 0x799   :  { %v528_v54 = vsel %vm60_vm0, %v524_v53, 0.0 }
 0x79d   :  { %529 = vadd.xlane.f32.xlu1 %v528_v54 }
 0x808   :  { %v539_v59 = vpop.xlane.xlu1 %538 }
 0x809   :  { %v543_v60 = vmul.f32 %v539_v59, %v2724_v37 }
 0x80b   :  { %v545_v61 = vadd.f32 1e-05, %v543_v60 }
 0x80d   :  { %2459 = vrsqrt.f32 %v545_v61  ;;  %vm553_vm12 = vweird.f32 %v545_v61 }
 0x810   :  { %v530_v62 = vpop.xlane.xlu1 %529 }
 0x811   :  { %v532_v63 = vmul.f32 %v530_v62, %v2724_v37 }
 0x813   :  { %v2460_v0 = vpop.eup %2459  ;;  %v534_v1 = vsub.f32 %v524_v53, %v532_v63 }
 0x814   :  { %v548_v2 = vmul.f32 %v2460_v0, %v545_v61  ;;  %vm554_vm11 = vweird.f32 %v2460_v0 }
 0x815   :  { %v536_v3 = vmul.f32 %v534_v1, %v534_v1  ;;  %vm555_vm13 = vmor %vm553_vm12, %vm554_vm11 }
 0x816   :  { %v549_v4 = vmul.f32 %v2460_v0, %v548_v2 }
 0x817   :  { %v540_v5 = vsel %vm60_vm0, %v536_v3, 0.0 }
 0x818   :  { %v550_v7 = vmul.f32 0.5, %v549_v4  ;;  %541 = vadd.xlane.f32.xlu1 %v540_v5 }
 0x81a   :  { %v551_v8 = vsub.f32 1.5, %v550_v7 }
 0x81c   :  { %v552_v9 = vmul.f32 %v2460_v0, %v551_v8 }
 0x81e   :  { %v556_v11 = vsel %vm555_vm13, %v2460_v0, %v552_v9 }
 0x81f   :  { %v567_v12 = vmul.f32 %v556_v11, %v533_v47 }
 0x821   :  { %v570_v14 = vmul.f32 %v2410_v10, %v567_v12 }
 0x823   :  { %v2811_v16 = vadd.f32 %v2411_v13, %v570_v14 }
 0x825   :  { %2276 = vmatmul.msk.f32.vlgmr.msrb.gmra.mxu1 %vm60_vm0, %v2811_v16 }
 0x88b   :  { %v542_v18 = vpop.xlane.xlu1 %541 }
 0x88c   :  { %v544_v19 = vmul.f32 %v542_v18, %v2724_v37 }
 0x88e   :  { %v546_v20 = vadd.f32 1e-05, %v544_v19 }
 0x890   :  { %2461 = vrsqrt.f32 %v546_v20  ;;  %vm563_vm15 = vweird.f32 %v546_v20 }
 0x896   :  { %v2462_v21 = vpop.eup %2461 }
 0x897   :  { %v558_v22 = vmul.f32 %v2462_v21, %v546_v20  ;;  %vm564_vm14 = vweird.f32 %v2462_v21 }
 0x898   :  { %vm565_vm3 = vmor %vm563_vm15, %vm564_vm14 }
 0x899   :  { %v559_v23 = vmul.f32 %v2462_v21, %v558_v22 }
 0x89b   :  { %v560_v24 = vmul.f32 0.5, %v559_v23 }
 0x89d   :  { %v561_v25 = vsub.f32 1.5, %v560_v24 }
 0x89f   :  { %v562_v26 = vmul.f32 %v2462_v21, %v561_v25 }
 0x8a1   :  { %v566_v28 = vsel %vm565_vm3, %v2462_v21, %v562_v26 }
 0x8a2   :  { %v630_v29 = vpop.f32.mrf.mxu1  ;;  %v568_v30 = vmul.f32 %v566_v28, %v534_v1  ;;  %v2299_v28 = vld [vmem:[%s3397_s3 + $0xb0] sm:$0xff] }
 0x8a3   :  { %v2819_v31 = vadd.f32 %v2412_v27, %v630_v29 }
 0x8a4   :  { %v571_v32 = vmul.f32 %v2410_v10, %v568_v30  ;;  %v2298_v30 = vld [vmem:[%s3397_s3 + $0xa0] sm:$0xff] }
 0x8a5   :  { %704 = vrot.lane.b32.xlu2 %v2819_v31, %s2571_s13  ;;  %637 = vrot.lane.b32.xlu0 %v2819_v31, %s2570_s12 }
 0x8a6   :  { %v2825_v33 = vadd.f32 %v2411_v13, %v571_v32  ;;  %v2297_v32 = vld [vmem:[%s3397_s3 + $0x90] sm:$0xff] }
 0x8a8   :  { %2277 = vmatmul.msk.f32.gmra.mxu1 %vm60_vm0, %v2825_v33 }
 0x8ad   :  { %676 = vrot.lane.b32.xlu2 %v2819_v31, %s2572_s0  ;;  %702 = vrot.lane.b32.xlu0 %v2819_v31, %s2569_s11 }
 0x8ff   :  { %v705_v34 = vpop.permute.xlu2 %704 }
 0x900   :  { %2281 = vmatpush.xpose.msk.msra.mxu1 %vm94_vm1, %v705_v34 }
 0x907   :  { %v677_v35 = vpop.permute.xlu2 %676 }
 0x908   :  { %697 = vmatpush.msrb.mxu0 %v677_v35  ;;  %v2296_v35 = vld [vmem:[%s3397_s3 + $0x80] sm:$0xff] }
 0x917   :  { %v638_v36 = vpop.permute.xlu0 %637 }
 0x918   :  { %2278 = vmatpush.xpose.msk.msrb.mxu3 %vm94_vm1, %v638_v36 }
 0x91b   :  { %2279 = vmatmul.msk.f32.vlgmr.msrb.gmra.mxu3 %vm94_vm1, %v2819_v31 }
 0x91f   :  { %v703_v38 = vpop.permute.xlu0 %702 }
 0x920   :  { %2282 = vmatmul.msk.f32.vlgmr.msra.gmra.mxu1 %vm94_vm1, %v703_v38 }
 0x925   :  { %v633_v39 = vpop.f32.mrf.mxu1 }
 0x926   :  { %v2838_v40 = vadd.f32 %v2412_v27, %v633_v39 }
 0x928   :  { %840 = vrot.lane.b32.xlu0 %v2838_v40, %s2569_s11 }
 0x99a   :  { %v841_v60 = vpop.permute.xlu0 %840 }
 0x99d   :  { %v727_v41 = vpop.f32.mrf.mxu1 }
 0x99e   :  { %v730_v42 = vmul.f32 0.25, %v727_v41  ;;  %v660_v43 = vpop.f32.mrf.mxu3 }
 0x99f   :  { %v663_v44 = vmul.f32 0.25, %v660_v43  ;;  %v2257_v43 = vld [vmem:[%s3398_s4 + $0x68] sm:$0xff] }
 0x9a0   :  { %v731_v45 = vadd.f32 %v730_v42, %v2659_v17  ;;  %v2259_v42 = vld [vmem:[%s3398_s4 + $0x78] sm:$0xff] }
 0x9a1   :  { %v664_v46 = vadd.f32 %v663_v44, %v2659_v17 }
 0x9a2   :  { %v732_v47 = vsel %vm121_vm2, %v731_v45, -inf }
 0x9a3   :  { %733 = vmax.xlane.f32.xlu2 %v732_v47  ;;  %v665_v48 = vsel %vm121_vm2, %v664_v46, -inf }
 0x9a4   :  { %666 = vmax.xlane.f32.xlu1 %v665_v48 }
 0x9bd   :  { %842 = vrot.lane.b32.xlu1 %v2838_v40, %s2571_s13 }
 0x9c5   :  { %775 = vrot.lane.b32.xlu1 %v2838_v40, %s2570_s12 }
 0xa16   :  { %v734_v49 = vpop.xlane.xlu2 %733 }
 0xa17   :  { %v667_v50 = vpop.xlane.xlu1 %666  ;;  %v735_v53 = vsub.f32 %v731_v45, %v734_v49  ;;  %v2256_v49 = vld [vmem:[%s3398_s4 + $0x60] sm:$0xff] }
 0xa18   :  { %v668_v52 = vsub.f32 %v664_v46, %v667_v50  ;;  %v2413_v46 = vld [vmem:[%s3399_s5 + $0x10] ss:$0 sm:$0xff] }
 0xa19   :  { %v736_v55 = vmul.f32 1.442695, %v735_v53 }
 0xa1a   :  { %v669_v54 = vmul.f32 1.442695, %v668_v52 }
 0xa1c   :  { %2463 = vpow2.f32 %v669_v54 }
 0xa1d   :  { %2465 = vpow2.f32 %v736_v55 }
 0xa22   :  { %v2464_v17 = vpop.eup %2463 }
 0xa23   :  { %v671_v56 = vsel %vm121_vm2, %v2464_v17, 0.0  ;;  %v2466_v57 = vpop.eup %2465 }
 0xa24   :  { %672 = vadd.xlane.f32.xlu0 %v671_v56  ;;  %v738_v58 = vsel %vm121_vm2, %v2466_v57, 0.0 }
 0xa2c   :  { %739 = vadd.xlane.f32.xlu0 %v738_v58  ;;  %v2414_v58 = vld [vmem:[%s3399_s5 + $0x9] ss:$0 sm:$0xff] }
 0xa2f   :  { %v843_v59 = vpop.permute.xlu1 %842 }
 0xa30   :  { %2287 = vmatpush.xpose.msk.msrb.mxu1 %vm94_vm1, %v843_v59 }
 0xa33   :  { %2288 = vmatmul.msk.f32.vlgmr.msrb.gmra.mxu1 %vm94_vm1, %v841_v60 }
 0xa37   :  { %v776_v61 = vpop.permute.xlu1 %775 }
 0xa38   :  { %2284 = vmatpush.xpose.msk.msra.mxu0 %vm94_vm1, %v776_v61 }
 0xa97   :  { %v673_v62 = vpop.xlane.xlu0 %672 }
 0xa98   :  { %2467 = vrcp.f32 %v673_v62 }
 0xa9e   :  { %v2468_v63 = vpop.eup %2467 }
 0xa9f   :  { %v675_v0 = vmul.f32 %v2468_v63, %v2464_v17  ;;  %v740_v19 = vpop.xlane.xlu0 %739 }
 0xaa1   :  { %2280 = vmatmul.msk.f32.vlgmr.msrb.gmra.mxu0 %vm121_vm2, %v675_v0 }
 0xaa2   :  { %931 = vmatpush.msrb.mxu0 %v2259_v42  ;;  %v2253_v42 = vld [vmem:[%s3397_s3 + $0x58] sm:$0xff] }
 0xaa9   :  { %2285 = vmatmul.msk.f32.vlgmr.msra.gmra.mxu0 %vm94_vm1, %v2838_v40 }
 0xab0   :  { %v865_v1 = vpop.f32.mrf.mxu1 }
 0xab1   :  { %v868_v2 = vmul.f32 0.25, %v865_v1 }
 0xab3   :  { %v869_v3 = vadd.f32 %v2687_v51, %v868_v2 }
 0xab5   :  { %v870_v4 = vsel %vm121_vm2, %v869_v3, -inf }
 0xab6   :  { %871 = vmax.xlane.f32.xlu1 %v870_v4 }
 0xacf   :  { %881 = vrot.lane.b32.xlu1 %v2838_v40, %s2573_s20 }
 0xb1e   :  { %v2862_v5 = vpop.f32.mrf.mxu0 }
 0xb26   :  { %v798_v7 = vpop.f32.mrf.mxu0 }
 0xb27   :  { %v801_v8 = vmul.f32 0.25, %v798_v7 }
 0xb29   :  { %v872_v9 = vpop.xlane.xlu1 %871  ;;  %v802_v10 = vadd.f32 %v2687_v51, %v801_v8 }
 0xb2a   :  { %v873_v11 = vsub.f32 %v869_v3, %v872_v9 }
 0xb2b   :  { %v803_v12 = vsel %vm121_vm2, %v802_v10, -inf }
 0xb2c   :  { %v874_v13 = vmul.f32 1.442695, %v873_v11  ;;  %804 = vmax.xlane.f32.xlu0 %v803_v12 }
 0xb2e   :  { %2469 = vpow2.f32 %v874_v13 }
 0xb34   :  { %v2470_v14 = vpop.eup %2469 }
 0xb35   :  { %v876_v18 = vsel %vm121_vm2, %v2470_v14, 0.0 }
 0xb36   :  { %877 = vadd.xlane.f32.xlu2 %v876_v18 }
 0xb40   :  { %743 = vrot.lane.b32.xlu0 %v2819_v31, %s2573_s20 }
 0xb41   :  { %v882_v29 = vpop.permute.xlu1 %881 }
 0xb9f   :  { %v805_v20 = vpop.xlane.xlu0 %804 }
 0xba0   :  { %v806_v21 = vsub.f32 %v802_v10, %v805_v20 }
 0xba2   :  { %v807_v22 = vmul.f32 1.442695, %v806_v21 }
 0xba4   :  { %2471 = vpow2.f32 %v807_v22 }
 0xba5   :  { %2473 = vrcp.f32 %v740_v19 }
 0xba9   :  { %v878_v24 = vpop.xlane.xlu2 %877 }
 0xbaa   :  { %v2472_v51 = vpop.eup %2471  ;;  %2475 = vrcp.f32 %v878_v24 }
 0xbab   :  { %v809_v23 = vsel %vm121_vm2, %v2472_v51, 0.0  ;;  %v2474_v25 = vpop.eup %2473 }
 0xbac   :  { %810 = vadd.xlane.f32.xlu2 %v809_v23  ;;  %v742_v26 = vmul.f32 %v2474_v25, %v2466_v57 }
 0xbb0   :  { %v2476_v31 = vpop.eup %2475 }
 0xbb1   :  { %v880_v34 = vmul.f32 %v2476_v31, %v2470_v14 }
 0xbb2   :  { %v744_v27 = vpop.permute.xlu0 %743 }
 0xbb3   :  { %764 = vmatpush.msra.mxu3 %v744_v27 }
 0xbb4   :  { %2283 = vmatmul.msk.f32.vlgmr.msra.gmra.mxu3 %vm121_vm2, %v742_v26 }
 0xbb5   :  { %902 = vmatpush.msrb.mxu3 %v882_v29 }
 0xbb7   :  { %1152 = vmatpush.msra.mxu3 %v2299_v28 }
 0xbb9   :  { %1153 = vmatpush.msra.mxu3 %v2298_v30 }
 0xbbb   :  { %1154 = vmatpush.msra.mxu3 %v2297_v32 }
 0xbbc   :  { %2289 = vmatmul.msk.f32.vlgmr.msrb.gmra.mxu3 %vm121_vm2, %v880_v34 }
 0xbbd   :  { %1155 = vmatpush.msra.mxu3 %v2296_v35 }
 0xbc4   :  { %814 = vrot.lane.b32.xlu2 %v2838_v40, %s2572_s0  ;;  %2324 = vmatmul.msk.f32.vlgmr.msra.gmra.mxu3 %vm60_vm0, %v2632_v6  ;;  %v2258_v40 = vld [vmem:[%s3398_s4 + $0x70] sm:$0xff] }
 0xbc5   :  { %932 = vmatpush.msrb.mxu0 %v2258_v40  ;;  %v2252_v40 = vld [vmem:[%s3397_s3 + $0x48] sm:$0xff] }
 0xbc7   :  { %933 = vmatpush.msrb.mxu0 %v2257_v43 }
 0xbc9   :  { %934 = vmatpush.msrb.mxu0 %v2256_v49 }
 0xbcc   :  { %2325 = vmatmul.msk.f32.gmra.mxu3 %vm60_vm0, %v2652_v15 }
 0xc1f   :  { %v811_v36 = vpop.xlane.xlu2 %810 }
 0xc20   :  { %2477 = vrcp.f32 %v811_v36 }
 0xc26   :  { %v2478_v38 = vpop.eup %2477 }
 0xc27   :  { %v813_v39 = vmul.f32 %v2478_v38, %v2472_v51  ;;  %v815_v41 = vpop.permute.xlu2 %814 }
 0xc28   :  { %835 = vmatpush.msrb.mxu2 %v815_v41  ;;  %v2254_v41 = vld [vmem:[%s3397_s3 + $0x68] sm:$0xff] }
 0xc29   :  { %2286 = vmatmul.msk.f32.vlgmr.msrb.gmra.mxu2 %vm121_vm2, %v813_v39  ;;  %v2255_v39 = vld [vmem:[%s3397_s3 + $0x78] sm:$0xff] }
 0xc2a   :  { %1013 = vmatpush.msra.mxu2 %v2255_v39  ;;  %v2307_v39 = vld [vmem:[%s3398_s4 + $0xd8] sm:$0xff] }
 0xc2c   :  { %1014 = vmatpush.msra.mxu2 %v2254_v41 }
 0xc2e   :  { %1015 = vmatpush.msra.mxu2 %v2253_v42 }
 0xc30   :  { %1016 = vmatpush.msra.mxu2 %v2252_v40 }
 0xc37   :  { %v766_v44 = vpop.f32.mrf.mxu3 }
 0xc38   :  { %770 = vrot.lane.b32.xlu0 %v766_v44, %s2574_s23 }
 0xc3f   :  { %v904_v45 = vpop.f32.mrf.mxu3 }
 0xc40   :  { %908 = vrot.lane.b32.xlu1 %v904_v45, %s2574_s23 }
 0xc47   :  { %v1157_v47 = vpop.f32.mrf.mxu3 }
 0xc48   :  { %v2905_v48 = vadd.f32 %v2413_v46, %v1157_v47 }
 0xc4a   :  { %1233 = vrot.lane.b32.xlu0 %v2905_v48, %s2571_s13  ;;  %1231 = vrot.lane.b32.xlu1 %v2905_v48, %s2569_s11 }
 0xc4f   :  { %v1160_v3 = vpop.f32.mrf.mxu3 }
 0xc50   :  { %v2942_v12 = vadd.f32 %v2413_v46, %v1160_v3  ;;  %v2267_v3 = vld [vmem:[%s3398_s4 + $0xb8] sm:$0xff] }
 0xc51   :  { %1041 = vmatpush.msra.mxu1 %v2267_v3 }
 0xc52   :  { %1166 = vrot.lane.b32.xlu0 %v2905_v48, %s2570_s12 }
 0xcaa   :  { %v771_v50 = vpop.permute.xlu0 %770 }
 0xcab   :  { %v773_v52 = vsel %vm94_vm1, %v2862_v5, %v771_v50  ;;  %v2936_v5 = vld [vmem:[%s3396_s2 + $0x8] sm:$0xff] }
 0xcac   :  { %2290 = vmatmul.msk.f32.vlgmr.msrb.gmra.mxu0 %vm60_vm0, %v773_v52  ;;  %v837_v53 = vpop.f32.mrf.mxu2 }
 0xcb2   :  { %v909_v54 = vpop.permute.xlu1 %908 }
 0xcb3   :  { %v911_v55 = vsel %vm94_vm1, %v837_v53, %v909_v54  ;;  %v2415_v53 = vld [vmem:[%s3399_s5 + $0xc] ss:$0 sm:$0xff] }
 0xcb4   :  { %2291 = vmatmul.msk.f32.gmra.mxu0 %vm60_vm0, %v911_v55 }
 0xcbc   :  { %v1234_v17 = vpop.permute.xlu0 %1233  ;;  %v1232_v56 = vpop.permute.xlu1 %1231 }
 0xcbd   :  { %2330 = vmatpush.xpose.msk.msrb.mxu3 %vm94_vm1, %v1234_v17  ;;  %v2416_v17 = vld [vmem:[%s3399_s5 + $0xd] ss:$0 sm:$0xff] }
 0xcc0   :  { %2331 = vmatmul.msk.f32.vlgmr.msrb.gmra.mxu3 %vm94_vm1, %v1232_v56 }
 0xcc4   :  { %v1167_v57 = vpop.permute.xlu0 %1166 }
 0xcc5   :  { %2327 = vmatpush.xpose.msk.msra.mxu0 %vm94_vm1, %v1167_v57 }
 0xcc8   :  { %2328 = vmatmul.msk.f32.vlgmr.msra.gmra.mxu0 %vm94_vm1, %v2905_v48 }
 0xd29   :  { %v936_v59 = vpop.f32.mrf.mxu0 }
 0xd2a   :  { %v937_v60 = vadd.f32 %v2414_v58, %v936_v59 }
 0xd2c   :  { %v942_v61 = vadd.f32 %v937_v60, %v2811_v16 }
 0xd2e   :  { %v944_v62 = vsel %vm60_vm0, %v942_v61, 0.0 }
 0xd2f   :  { %945 = vadd.xlane.f32.xlu2 %v944_v62 }
 0xd31   :  { %v939_v63 = vpop.f32.mrf.mxu0 }
 0xd32   :  { %v940_v0 = vadd.f32 %v2414_v58, %v939_v63 }
 0xd34   :  { %v943_v1 = vadd.f32 %v940_v0, %v2825_v33 }
 0xd36   :  { %v947_v2 = vsel %vm60_vm0, %v943_v1, 0.0 }
 0xd37   :  { %948 = vadd.xlane.f32.xlu1 %v947_v2 }
 0xd43   :  { %v1256_v4 = vpop.f32.mrf.mxu3 }
 0xd44   :  { %v1259_v7 = vmul.f32 0.25, %v1256_v4  ;;  %v2266_v4 = vld [vmem:[%s3398_s4 + $0xb0] sm:$0xff] }
 0xd45   :  { %v1189_v8 = vpop.f32.mrf.mxu0  ;;  %1042 = vmatpush.msra.mxu1 %v2266_v4 }
 0xd46   :  { %v1192_v16 = vmul.f32 0.25, %v1189_v8  ;;  %v1260_v9 = vadd.f32 %v2936_v5, %v1259_v7  ;;  %v2265_v8 = vld [vmem:[%s3398_s4 + $0xa8] sm:$0xff] }
 0xd47   :  { %1043 = vmatpush.msra.mxu1 %v2265_v8 }
 0xd48   :  { %v1261_v10 = vsel %vm121_vm2, %v1260_v9, -inf  ;;  %v1193_v11 = vadd.f32 %v2936_v5, %v1192_v16 }
 0xd49   :  { %1262 = vmax.xlane.f32.xlu2 %v1261_v10 }
 0xd4a   :  { %v1194_v33 = vsel %vm121_vm2, %v1193_v11, -inf }
 0xd4b   :  { %1195 = vmax.xlane.f32.xlu0 %v1194_v33 }
 0xd61   :  { %1373 = vrot.lane.b32.xlu2 %v2942_v12, %s2571_s13 }
 0xd69   :  { %1272 = vrot.lane.b32.xlu2 %v2905_v48, %s2573_s20 }
 0xda2   :  { %v946_v13 = vpop.xlane.xlu2 %945 }
 0xda3   :  { %v950_v14 = vmul.f32 %v946_v13, %v2724_v37 }
 0xda5   :  { %v952_v18 = vsub.f32 %v942_v61, %v950_v14 }
 0xda7   :  { %v954_v19 = vmul.f32 %v952_v18, %v952_v18 }
 0xda9   :  { %v956_v20 = vsel %vm60_vm0, %v954_v19, 0.0 }
 0xdaa   :  { %957 = vadd.xlane.f32.xlu1 %v956_v20  ;;  %v949_v23 = vpop.xlane.xlu1 %948 }
 0xdab   :  { %v951_v24 = vmul.f32 %v949_v23, %v2724_v37  ;;  %v2263_v23 = vld [vmem:[%s3398_s4 + $0x98] sm:$0xff] }
 0xdad   :  { %v2954_v29 = vsub.f32 %v943_v1, %v951_v24  ;;  %v2262_v24 = vld [vmem:[%s3398_s4 + $0x90] sm:$0xff] }
 0xdaf   :  { %v955_v34 = vmul.f32 %v2954_v29, %v2954_v29 }
 0xdb1   :  { %v959_v35 = vsel %vm60_vm0, %v955_v34, 0.0 }
 0xdbc   :  { %v1263_v21 = vpop.xlane.xlu2 %1262 }
 0xdbd   :  { %v1264_v22 = vsub.f32 %v1260_v9, %v1263_v21  ;;  %v2264_v9 = vld [vmem:[%s3398_s4 + $0xa0] sm:$0xff] }
 0xdbe   :  { %v1196_v25 = vpop.xlane.xlu0 %1195  ;;  %1044 = vmatpush.msra.mxu1 %v2264_v9 }
 0xdbf   :  { %v1265_v51 = vmul.f32 1.442695, %v1264_v22  ;;  %v1197_v28 = vsub.f32 %v1193_v11, %v1196_v25  ;;  %v2261_v25 = vld [vmem:[%s3398_s4 + $0x88] sm:$0xff] }
 0xdc0   :  { %1045 = vmatpush.msra.mxu1 %v2263_v23 }
 0xdc1   :  { %2479 = vpow2.f32 %v1265_v51  ;;  %v1198_v31 = vmul.f32 1.442695, %v1197_v28  ;;  %v3031_v28 = vld [vmem:[%s3396_s2 + $0x18] sm:$0xff] }
 0xdc2   :  { %1046 = vmatpush.msra.mxu1 %v2262_v24 }
 0xdc3   :  { %1371 = vrot.lane.b32.xlu1 %v2942_v12, %s2569_s11  ;;  %2481 = vpow2.f32 %v1198_v31 }
 0xdc4   :  { %v1374_v26 = vpop.permute.xlu2 %1373  ;;  %1047 = vmatpush.msra.mxu1 %v2261_v25 }
 0xdc5   :  { %2337 = vmatpush.xpose.msk.msra.mxu3 %vm94_vm1, %v1374_v26  ;;  %v2260_v26 = vld [vmem:[%s3398_s4 + $0x80] sm:$0xff] }
 0xdc6   :  { %1048 = vmatpush.msra.mxu1 %v2260_v26  ;;  %v2303_v26 = vld [vmem:[%s3397_s3 + $0xb8] sm:$0xff] }
 0xdc7   :  { %v2480_v27 = vpop.eup %2479 }
 0xdc8   :  { %v1267_v30 = vsel %vm121_vm2, %v2480_v27, 0.0 }
 0xdc9   :  { %1268 = vadd.xlane.f32.xlu0 %v1267_v30  ;;  %v2962_v36 = vpop.eup %2481  ;;  %v2417_v30 = vld [vmem:[%s3399_s5 + $0xa] ss:$0 sm:$0xff] }
 0xdca   :  { %v1200_v38 = vsel %vm121_vm2, %v2962_v36, 0.0 }
 0xdcb   :  { %1306 = vrot.lane.b32.xlu1 %v2942_v12, %s2570_s12 }
 0xdcc   :  { %v1273_v32 = vpop.permute.xlu2 %1272 }
 0xdcd   :  { %1293 = vmatpush.msrb.mxu0 %v1273_v32 }
 0xdd1   :  { %960 = vadd.xlane.f32.xlu0 %v959_v35 }
 0xdd9   :  { %1201 = vadd.xlane.f32.xlu0 %v1200_v38 }
 0xded   :  { %1205 = vrot.lane.b32.xlu0 %v2905_v48, %s2572_s0 }
 0xe1d   :  { %v958_v43 = vpop.xlane.xlu1 %957 }
 0xe1e   :  { %v962_v44 = vmul.f32 %v958_v43, %v2724_v37 }
 0xe20   :  { %v964_v45 = vadd.f32 1e-05, %v962_v44 }
 0xe22   :  { %2483 = vrsqrt.f32 %v964_v45  ;;  %vm972_vm5 = vweird.f32 %v964_v45 }
 0xe28   :  { %v2484_v46 = vpop.eup %2483 }
 0xe29   :  { %v967_v47 = vmul.f32 %v2484_v46, %v964_v45  ;;  %vm973_vm4 = vweird.f32 %v2484_v46 }
 0xe2a   :  { %vm974_vm6 = vmor %vm972_vm5, %vm973_vm4 }
 0xe2b   :  { %v968_v48 = vmul.f32 %v2484_v46, %v967_v47 }
 0xe2d   :  { %v969_v49 = vmul.f32 0.5, %v968_v48  ;;  %v2306_v48 = vld [vmem:[%s3398_s4 + $0xd0] sm:$0xff] }
 0xe2f   :  { %v970_v50 = vsub.f32 1.5, %v969_v49  ;;  %v2305_v49 = vld [vmem:[%s3398_s4 + $0xc8] sm:$0xff] }
 0xe31   :  { %v971_v52 = vmul.f32 %v2484_v46, %v970_v50  ;;  %v2304_v50 = vld [vmem:[%s3398_s4 + $0xc0] sm:$0xff] }
 0xe33   :  { %v975_v54 = vsel %vm974_vm6, %v2484_v46, %v971_v52 }
 0xe34   :  { %v986_v55 = vmul.f32 %v975_v54, %v952_v18 }
 0xe35   :  { %v1372_v56 = vpop.permute.xlu1 %1371 }
 0xe36   :  { %v989_v57 = vmul.f32 %v2415_v53, %v986_v55  ;;  %2338 = vmatmul.msk.f32.vlgmr.msra.gmra.mxu3 %vm94_vm1, %v1372_v56 }
 0xe38   :  { %v2988_v58 = vadd.f32 %v2416_v17, %v989_v57 }
 0xe3a   :  { %2292 = vmatmul.msk.f32.vlgmr.msra.gmra.mxu2 %vm60_vm0, %v2988_v58 }
 0xe3c   :  { %v1269_v59 = vpop.xlane.xlu0 %1268 }
 0xe3d   :  { %2485 = vrcp.f32 %v1269_v59  ;;  %v1307_v21 = vpop.permute.xlu1 %1306 }
 0xe43   :  { %v2486_v60 = vpop.eup %2485 }
 0xe44   :  { %v1271_v61 = vmul.f32 %v2486_v60, %v2480_v27  ;;  %v961_v62 = vpop.xlane.xlu0 %960 }
 0xe45   :  { %v963_v63 = vmul.f32 %v961_v62, %v2724_v37 }
 0xe46   :  { %2332 = vmatmul.msk.f32.vlgmr.msrb.gmra.mxu0 %vm121_vm2, %v1271_v61 }
 0xe47   :  { %v965_v0 = vadd.f32 1e-05, %v963_v63 }
 0xe49   :  { %2487 = vrsqrt.f32 %v965_v0  ;;  %vm982_vm8 = vweird.f32 %v965_v0 }
 0xe4c   :  { %v1202_v11 = vpop.xlane.xlu0 %1201 }
 0xe4d   :  { %2489 = vrcp.f32 %v1202_v11 }
 0xe4f   :  { %v2488_v1 = vpop.eup %2487 }
 0xe50   :  { %v977_v2 = vmul.f32 %v2488_v1, %v965_v0  ;;  %vm983_vm7 = vweird.f32 %v2488_v1 }
 0xe51   :  { %vm984_vm9 = vmor %vm982_vm8, %vm983_vm7 }
 0xe52   :  { %v978_v7 = vmul.f32 %v2488_v1, %v977_v2  ;;  %v3066_v2 = vld [vmem:[%s3399_s5 + $0x11] ss:$0 sm:$0xff] }
 0xe53   :  { %v2490_v22 = vpop.eup %2489 }
 0xe54   :  { %v979_v16 = vmul.f32 0.5, %v978_v7  ;;  %v1204_v51 = vmul.f32 %v2490_v22, %v2962_v36 }
 0xe56   :  { %v980_v10 = vsub.f32 1.5, %v979_v16 }
 0xe58   :  { %v981_v33 = vmul.f32 %v2488_v1, %v980_v10 }
 0xe5a   :  { %v985_v13 = vsel %vm984_vm9, %v2488_v1, %v981_v33 }
 0xe5b   :  { %v987_v14 = vmul.f32 %v985_v13, %v2954_v29 }
 0xe5d   :  { %v990_v18 = vmul.f32 %v2415_v53, %v987_v14 }
 0xe5f   :  { %v1206_v19 = vpop.permute.xlu0 %1205  ;;  %v3007_v20 = vadd.f32 %v2416_v17, %v990_v18 }
 0xe60   :  { %1226 = vmatpush.msrb.mxu2 %v1206_v19 }
 0xe61   :  { %2293 = vmatmul.msk.f32.gmra.mxu2 %vm60_vm0, %v3007_v20 }
 0xe62   :  { %2334 = vmatpush.xpose.msk.msra.mxu2 %vm94_vm1, %v1307_v21 }
 0xe69   :  { %2329 = vmatmul.msk.f32.vlgmr.msrb.gmra.mxu2 %vm121_vm2, %v1204_v51 }
 0xe6a   :  { %1462 = vmatpush.msrb.mxu2 %v2307_v39 }
 0xe6c   :  { %1463 = vmatpush.msrb.mxu2 %v2306_v48  ;;  %v2315_v48 = vld [vmem:[%s3398_s4 + $0x118] sm:$0xff] }
 0xe6d   :  { %1572 = vmatpush.msrb.mxu3 %v2315_v48 }
 0xe6e   :  { %1464 = vmatpush.msrb.mxu2 %v2305_v49  ;;  %v2314_v49 = vld [vmem:[%s3398_s4 + $0x110] sm:$0xff] }
 0xe6f   :  { %1573 = vmatpush.msrb.mxu3 %v2314_v49 }
 0xe70   :  { %1465 = vmatpush.msrb.mxu2 %v2304_v50  ;;  %v2313_v50 = vld [vmem:[%s3398_s4 + $0x108] sm:$0xff] }
 0xe71   :  { %2335 = vmatmul.msk.f32.vlgmr.msra.gmra.mxu2 %vm94_vm1, %v2942_v12  ;;  %1574 = vmatpush.msrb.mxu3 %v2313_v50 }
 0xeb9   :  { %v1396_v27 = vpop.f32.mrf.mxu3 }
 0xeba   :  { %v1399_v29 = vmul.f32 0.25, %v1396_v27  ;;  %v2302_v27 = vld [vmem:[%s3397_s3 + $0xa8] sm:$0xff] }
 0xebc   :  { %v1400_v31 = vadd.f32 %v3031_v28, %v1399_v29  ;;  %v2301_v29 = vld [vmem:[%s3397_s3 + $0x98] sm:$0xff] }
 0xebd   :  { %v1018_v32 = vpop.f32.mrf.mxu2 }
 0xebe   :  { %v1019_v34 = vadd.f32 %v2417_v30, %v1018_v32  ;;  %v1401_v35 = vsel %vm121_vm2, %v1400_v31, -inf }
 0xebf   :  { %1402 = vmax.xlane.f32.xlu2 %v1401_v35 }
 0xec0   :  { %v1024_v36 = vmax.f32 %v1019_v34, 0.0 }
 0xec2   :  { %2294 = vmatmul.msk.f32.vlgmr.msra.gmra.mxu1 %vm493_vm10, %v1024_v36 }
 0xec3   :  { %v1295_v38 = vpop.f32.mrf.mxu0 }
 0xec4   :  { %1299 = vrot.lane.b32.xlu1 %v1295_v38, %s2574_s23 }
 0xed7   :  { %1412 = vrot.lane.b32.xlu2 %v2942_v12, %s2573_s20 }
 0xee4   :  { %v1021_v41 = vpop.f32.mrf.mxu2 }
 0xee5   :  { %v1022_v42 = vadd.f32 %v2417_v30, %v1021_v41  ;;  %v2300_v30 = vld [vmem:[%s3397_s3 + $0x88] sm:$0xff] }
 0xee7   :  { %v1025_v40 = vmax.f32 %v1022_v42, 0.0 }
 0xee9   :  { %2295 = vmatmul.msk.f32.gmra.mxu1 %vm493_vm10, %v1025_v40  ;;  %v2420_v40 = vld [vmem:[%s3399_s5 + $0x14] ss:$0 sm:$0xff] }
 0xeec   :  { %v1228_v43 = vpop.f32.mrf.mxu2 }
 0xef4   :  { %v1329_v44 = vpop.f32.mrf.mxu2 }
 0xef5   :  { %v1332_v45 = vmul.f32 0.25, %v1329_v44 }
 0xef7   :  { %v1333_v46 = vadd.f32 %v3031_v28, %v1332_v45  ;;  %v2421_v45 = vld [vmem:[%s3399_s5 + $0x15] ss:$0 sm:$0xff] }
 0xef9   :  { %v1334_v47 = vsel %vm121_vm2, %v1333_v46, -inf }
 0xefa   :  { %1335 = vmax.xlane.f32.xlu0 %v1334_v47 }
 0xf32   :  { %v1403_v52 = vpop.xlane.xlu2 %1402 }
 0xf33   :  { %v1404_v53 = vsub.f32 %v1400_v31, %v1403_v52  ;;  %v2312_v52 = vld [vmem:[%s3398_s4 + $0x100] sm:$0xff] }
 0xf34   :  { %1575 = vmatpush.msrb.mxu3 %v2312_v52  ;;  %v2424_v52 = vld [vmem:[%s3399_s5 + $0x16] ss:$0 sm:$0xff] }
 0xf35   :  { %v1405_v54 = vmul.f32 1.442695, %v1404_v53  ;;  %v2311_v53 = vld [vmem:[%s3398_s4 + $0xf8] sm:$0xff] }
 0xf36   :  { %v1300_v55 = vpop.permute.xlu1 %1299  ;;  %1576 = vmatpush.msrb.mxu3 %v2311_v53 }
 0xf37   :  { %2491 = vpow2.f32 %v1405_v54  ;;  %v1302_v17 = vsel %vm94_vm1, %v1228_v43, %v1300_v55 }
 0xf38   :  { %2340 = vmatmul.msk.f32.vlgmr.msrb.gmra.mxu2 %vm60_vm0, %v1302_v17 }
 0xf3a   :  { %v1413_v56 = vpop.permute.xlu2 %1412 }
 0xf3b   :  { %1433 = vmatpush.msra.mxu0 %v1413_v56 }
 0xf3d   :  { %v2492_v57 = vpop.eup %2491 }
 0xf3e   :  { %v1407_v59 = vsel %vm121_vm2, %v2492_v57, 0.0 }
 0xf3f   :  { %1408 = vadd.xlane.f32.xlu1 %v1407_v59  ;;  %v3076_v22 = vpop.f32.mrf.mxu1  ;;  %v2309_v59 = vld [vmem:[%s3398_s4 + $0xe8] sm:$0xff] }
 0xf58   :  { %1345 = vrot.lane.b32.xlu1 %v2942_v12, %s2572_s0 }
 0xf66   :  { %v3078_v51 = vpop.f32.mrf.mxu1 }
 0xf6d   :  { %v1336_v60 = vpop.xlane.xlu0 %1335 }
 0xf6e   :  { %v1337_v61 = vsub.f32 %v1333_v46, %v1336_v60  ;;  %v2308_v60 = vld [vmem:[%s3398_s4 + $0xe0] sm:$0xff] }
 0xf70   :  { %v1338_v62 = vmul.f32 1.442695, %v1337_v61 }
 0xf72   :  { %2493 = vpow2.f32 %v1338_v62 }
 0xf78   :  { %v2494_v63 = vpop.eup %2493 }
 0xf79   :  { %v1340_v0 = vsel %vm121_vm2, %v2494_v63, 0.0 }
 0xf7a   :  { %1341 = vadd.xlane.f32.xlu0 %v1340_v0 }
 0xfb2   :  { %v1409_v1 = vpop.xlane.xlu1 %1408 }
 0xfb3   :  { %2495 = vrcp.f32 %v1409_v1 }
 0xfb9   :  { %v2496_v3 = vpop.eup %2495 }
 0xfba   :  { %v1411_v4 = vmul.f32 %v2496_v3, %v2492_v57  ;;  %v2310_v57 = vld [vmem:[%s3398_s4 + $0xf0] sm:$0xff] }
 0xfbb   :  { %v1467_v7 = vpop.f32.mrf.mxu2  ;;  %1577 = vmatpush.msrb.mxu3 %v2310_v57 }
 0xfbc   :  { %v1468_v12 = vadd.f32 %v3066_v2, %v1467_v7  ;;  %2339 = vmatmul.msk.f32.vlgmr.msra.gmra.mxu0 %vm121_vm2, %v1411_v4  ;;  %v3138_v7 = vld [vmem:[%s3399_s5 + $0x13] ss:$0 sm:$0xff] }
 0xfbd   :  { %1578 = vmatpush.msrb.mxu3 %v2309_v59 }
 0xfbe   :  { %v1473_v8 = vadd.f32 %v1468_v12, %v2632_v6 }
 0xfbf   :  { %1579 = vmatpush.msrb.mxu3 %v2308_v60 }
 0xfc0   :  { %v1475_v16 = vsel %vm60_vm0, %v1473_v8, 0.0 }
 0xfc1   :  { %1476 = vadd.xlane.f32.xlu0 %v1475_v16 }
 0xfca   :  { %v1346_v9 = vpop.permute.xlu1 %1345 }
 0xfcb   :  { %1366 = vmatpush.msrb.mxu1 %v1346_v9 }
 0xfcd   :  { %1544 = vmatpush.msra.mxu1 %v2303_v26 }
 0xfcf   :  { %1545 = vmatpush.msra.mxu1 %v2302_v27 }
 0xfd1   :  { %1546 = vmatpush.msra.mxu1 %v2301_v29 }
 0xfd3   :  { %1547 = vmatpush.msra.mxu1 %v2300_v30 }
 0xfed   :  { %v1342_v10 = vpop.xlane.xlu0 %1341 }
 0xfee   :  { %2497 = vrcp.f32 %v1342_v10 }
 0xff4   :  { %v2498_v11 = vpop.eup %2497 }
 0xff5   :  { %v1344_v33 = vmul.f32 %v2498_v11, %v2494_v63 }
 0xff7   :  { %2336 = vmatmul.msk.f32.vlgmr.msrb.gmra.mxu1 %vm121_vm2, %v1344_v33 }
0x1034   :  { %v1477_v13 = vpop.xlane.xlu0 %1476 }
0x1035   :  { %v1481_v14 = vmul.f32 %v1477_v13, %v2724_v37 }
0x1037   :  { %v1483_v18 = vsub.f32 %v1473_v8, %v1481_v14 }
0x1039   :  { %v1435_v19 = vpop.f32.mrf.mxu0  ;;  %v1485_v21 = vmul.f32 %v1483_v18, %v1483_v18 }
0x103a   :  { %1439 = vrot.lane.b32.xlu2 %v1435_v19, %s2574_s23 }
0x103b   :  { %v1487_v6 = vsel %vm60_vm0, %v1485_v21, 0.0 }
0x103c   :  { %1488 = vadd.xlane.f32.xlu0 %v1487_v6 }
0x1074   :  { %v1368_v23 = vpop.f32.mrf.mxu1 }
0x1094   :  { %v1440_v24 = vpop.permute.xlu2 %1439 }
0x1095   :  { %v1442_v25 = vsel %vm94_vm1, %v1368_v23, %v1440_v24 }
0x1096   :  { %2341 = vmatmul.msk.f32.gmra.mxu2 %vm60_vm0, %v1442_v25 }
0x10af   :  { %v1489_v31 = vpop.xlane.xlu0 %1488 }
0x10b0   :  { %v1493_v32 = vmul.f32 %v1489_v31, %v2724_v37 }
0x10b2   :  { %v1495_v34 = vadd.f32 1e-05, %v1493_v32 }
0x10b4   :  { %2499 = vrsqrt.f32 %v1495_v34  ;;  %vm1503_vm12 = vweird.f32 %v1495_v34 }
0x10ba   :  { %v2500_v35 = vpop.eup %2499 }
0x10bb   :  { %v1498_v36 = vmul.f32 %v2500_v35, %v1495_v34  ;;  %vm1504_vm11 = vweird.f32 %v2500_v35 }
0x10bc   :  { %vm1505_vm13 = vmor %vm1503_vm12, %vm1504_vm11 }
0x10bd   :  { %v1499_v38 = vmul.f32 %v2500_v35, %v1498_v36 }
0x10bf   :  { %v1500_v39 = vmul.f32 0.5, %v1499_v38  ;;  %v2349_v38 = vld [vmem:[%s3397_s3 + $0xf0] sm:$0xff] }
0x10c0   :  { %1689 = vmatpush.msrb.mxu0 %v2349_v38 }
0x10c1   :  { %v1501_v41 = vsub.f32 1.5, %v1500_v39  ;;  %v2348_v39 = vld [vmem:[%s3397_s3 + $0xe0] sm:$0xff] }
0x10c2   :  { %1690 = vmatpush.msrb.mxu0 %v2348_v39 }
0x10c3   :  { %v1502_v42 = vmul.f32 %v2500_v35, %v1501_v41  ;;  %v2347_v41 = vld [vmem:[%s3397_s3 + $0xd0] sm:$0xff] }
0x10c4   :  { %1691 = vmatpush.msrb.mxu0 %v2347_v41 }
0x10c5   :  { %v1506_v43 = vsel %vm1505_vm13, %v2500_v35, %v1502_v42  ;;  %v2346_v42 = vld [vmem:[%s3397_s3 + $0xc0] sm:$0xff] }
0x10c6   :  { %v1517_v44 = vmul.f32 %v1506_v43, %v1483_v18  ;;  %1692 = vmatpush.msrb.mxu0 %v2346_v42 }
0x10c8   :  { %v1520_v46 = vmul.f32 %v2420_v40, %v1517_v44 }
0x10ca   :  { %v1523_v47 = vadd.f32 %v2421_v45, %v1520_v46 }
0x10cc   :  { %2342 = vmatmul.msk.f32.vlgmr.msra.gmra.mxu1 %vm60_vm0, %v1523_v47 }
0x1119   :  { %v1470_v54 = vpop.f32.mrf.mxu2 }
0x111a   :  { %v1471_v55 = vadd.f32 %v3066_v2, %v1470_v54 }
0x111c   :  { %v1474_v17 = vadd.f32 %v1471_v55, %v2652_v15  ;;  %v2422_v15 = vld [vmem:[%s3399_s5 + $0x12] ss:$0 sm:$0xff]  ;;  %v2425_v55 = vld [vmem:[%s3399_s5 + $0x17] ss:$0 sm:$0xff] }
0x111e   :  { %v1478_v56 = vsel %vm60_vm0, %v1474_v17, 0.0 }
0x111f   :  { %1479 = vadd.xlane.f32.xlu2 %v1478_v56 }
0x1149   :  { %v1549_v61 = vpop.f32.mrf.mxu1 }
0x114a   :  { %v1550_v62 = vadd.f32 %v2422_v15, %v1549_v61  ;;  %v2426_v61 = vld [vmem:[%s3399_s5 + $0x18] ss:$0 sm:$0xff] }
0x114c   :  { %v1555_v63 = vmax.f32 %v1550_v62, 0.0 }
0x114e   :  { %2344 = vmatmul.msk.f32.vlgmr.msrb.gmra.mxu3 %vm493_vm10, %v1555_v63 }
0x1192   :  { %v1480_v0 = vpop.xlane.xlu2 %1479 }
0x1193   :  { %v1482_v1 = vmul.f32 %v1480_v0, %v2724_v37 }
0x1195   :  { %v1484_v2 = vsub.f32 %v1474_v17, %v1482_v1 }
0x1197   :  { %v1486_v3 = vmul.f32 %v1484_v2, %v1484_v2 }
0x1199   :  { %v1490_v4 = vsel %vm60_vm0, %v1486_v3, 0.0 }
0x119a   :  { %1491 = vadd.xlane.f32.xlu0 %v1490_v4 }
0x11d1   :  { %v1581_v12 = vpop.f32.mrf.mxu3 }
0x11d2   :  { %v1582_v8 = vadd.f32 %v3138_v7, %v1581_v12 }
0x11d4   :  { %v1587_v16 = vadd.f32 %v1582_v8, %v1523_v47 }
0x11d6   :  { %v1589_v9 = vsel %vm60_vm0, %v1587_v16, 0.0 }
0x11d7   :  { %1590 = vadd.xlane.f32.xlu1 %v1589_v9 }
0x120d   :  { %v1492_v10 = vpop.xlane.xlu0 %1491 }
0x120e   :  { %v1494_v11 = vmul.f32 %v1492_v10, %v2724_v37 }
0x1210   :  { %v1496_v33 = vadd.f32 1e-05, %v1494_v11 }
0x1212   :  { %2501 = vrsqrt.f32 %v1496_v33  ;;  %vm1513_vm15 = vweird.f32 %v1496_v33 }
0x1218   :  { %v2502_v13 = vpop.eup %2501 }
0x1219   :  { %v1508_v14 = vmul.f32 %v2502_v13, %v1496_v33  ;;  %vm1514_vm14 = vweird.f32 %v2502_v13 }
0x121a   :  { %vm1515_vm3 = vmor %vm1513_vm15, %vm1514_vm14 }
0x121b   :  { %v1509_v18 = vmul.f32 %v2502_v13, %v1508_v14 }
0x121d   :  { %v1510_v19 = vmul.f32 0.5, %v1509_v18 }
0x121f   :  { %v1511_v21 = vsub.f32 1.5, %v1510_v19 }
0x1221   :  { %v1512_v6 = vmul.f32 %v2502_v13, %v1511_v21 }
0x1223   :  { %v1516_v23 = vsel %vm1515_vm3, %v2502_v13, %v1512_v6 }
0x1224   :  { %v1518_v24 = vmul.f32 %v1516_v23, %v1484_v2 }
0x1226   :  { %v1521_v25 = vmul.f32 %v2420_v40, %v1518_v24 }
0x1228   :  { %v1524_v26 = vadd.f32 %v2421_v45, %v1521_v25 }
0x122a   :  { %2343 = vmatmul.msk.f32.gmra.mxu1 %vm60_vm0, %v1524_v26 }
0x124a   :  { %v1591_v27 = vpop.xlane.xlu1 %1590 }
0x124b   :  { %v1595_v29 = vmul.f32 %v1591_v27, %v2724_v37 }
0x124d   :  { %v1597_v30 = vsub.f32 %v1587_v16, %v1595_v29 }
0x124f   :  { %v1599_v31 = vmul.f32 %v1597_v30, %v1597_v30 }
0x1251   :  { %v1601_v32 = vsel %vm60_vm0, %v1599_v31, 0.0 }
0x1252   :  { %1602 = vadd.xlane.f32.xlu0 %v1601_v32 }
0x12a7   :  { %v1552_v34 = vpop.f32.mrf.mxu1 }
0x12a8   :  { %v1553_v35 = vadd.f32 %v2422_v15, %v1552_v34 }
0x12aa   :  { %v1556_v36 = vmax.f32 %v1553_v35, 0.0 }
0x12ac   :  { %2345 = vmatmul.msk.f32.gmra.mxu3 %vm493_vm10, %v1556_v36 }
0x12c5   :  { %v1603_v40 = vpop.xlane.xlu0 %1602 }
0x12c6   :  { %v1607_v43 = vmul.f32 %v1603_v40, %v2724_v37 }
0x12c8   :  { %v1609_v44 = vadd.f32 1e-05, %v1607_v43 }
0x12ca   :  { %2503 = vrsqrt.f32 %v1609_v44  ;;  %vm1617_vm5 = vweird.f32 %v1609_v44 }
0x12d0   :  { %v2504_v45 = vpop.eup %2503 }
0x12d1   :  { %v1612_v46 = vmul.f32 %v2504_v45, %v1609_v44  ;;  %vm1618_vm4 = vweird.f32 %v2504_v45 }
0x12d2   :  { %vm1619_vm6 = vmor %vm1617_vm5, %vm1618_vm4 }
0x12d3   :  { %v1613_v47 = vmul.f32 %v2504_v45, %v1612_v46 }
0x12d5   :  { %v1614_v48 = vmul.f32 0.5, %v1613_v47 }
0x12d7   :  { %v1615_v49 = vsub.f32 1.5, %v1614_v48 }
0x12d9   :  { %v1616_v50 = vmul.f32 %v2504_v45, %v1615_v49 }
0x12db   :  { %v1620_v53 = vsel %vm1619_vm6, %v2504_v45, %v1616_v50 }
0x12dc   :  { %v1631_v54 = vmul.f32 %v1620_v53, %v1597_v30 }
0x12de   :  { %v1634_v17 = vmul.f32 %v2424_v52, %v1631_v54 }
0x12e0   :  { %v3166_v56 = vadd.f32 %v2425_v55, %v1634_v17 }
0x12e2   :  { %2374 = vmatmul.msk.f32.vlgmr.msrb.gmra.mxu0 %vm60_vm0, %v3166_v56 }
0x132f   :  { %v1584_v57 = vpop.f32.mrf.mxu3 }
0x1330   :  { %v1585_v59 = vadd.f32 %v3138_v7, %v1584_v57 }
0x1332   :  { %v1588_v60 = vadd.f32 %v1585_v59, %v1524_v26 }
0x1334   :  { %v1592_v15 = vsel %vm60_vm0, %v1588_v60, 0.0 }
0x1335   :  { %1593 = vadd.xlane.f32.xlu0 %v1592_v15 }
0x135f   :  { %v1694_v62 = vpop.f32.mrf.mxu0 }
0x1360   :  { %v3175_v63 = vadd.f32 %v2426_v61, %v1694_v62 }
0x1362   :  { %1766 = vrot.lane.b32.xlu1 %v3175_v63, %s2569_s11  ;;  %1701 = vrot.lane.b32.xlu0 %v3175_v63, %s2570_s12 }
0x13a8   :  { %v1594_v0 = vpop.xlane.xlu0 %1593 }
0x13a9   :  { %v1596_v1 = vmul.f32 %v1594_v0, %v2724_v37 }
0x13ab   :  { %v1598_v2 = vsub.f32 %v1588_v60, %v1596_v1 }
0x13ad   :  { %v1600_v3 = vmul.f32 %v1598_v2, %v1598_v2 }
0x13af   :  { %v1604_v4 = vsel %vm60_vm0, %v1600_v3, 0.0 }
0x13b0   :  { %1605 = vadd.xlane.f32.xlu2 %v1604_v4 }
0x13c8   :  { %1768 = vrot.lane.b32.xlu2 %v3175_v63, %s2571_s13 }
0x13d4   :  { %v1702_v7 = vpop.permute.xlu0 %1701  ;;  %v1767_v24 = vpop.permute.xlu1 %1766 }
0x13d5   :  { %2376 = vmatpush.xpose.msk.msra.mxu2 %vm94_vm1, %v1702_v7 }
0x13d8   :  { %2377 = vmatmul.msk.f32.vlgmr.msra.gmra.mxu2 %vm94_vm1, %v3175_v63 }
0x1423   :  { %v1606_v12 = vpop.xlane.xlu2 %1605 }
0x1424   :  { %v1608_v8 = vmul.f32 %v1606_v12, %v2724_v37 }
0x1426   :  { %v1610_v16 = vadd.f32 1e-05, %v1608_v8 }
0x1428   :  { %2505 = vrsqrt.f32 %v1610_v16  ;;  %vm1627_vm8 = vweird.f32 %v1610_v16 }
0x142b   :  { %v1769_v9 = vpop.permute.xlu2 %1768 }
0x142c   :  { %2379 = vmatpush.xpose.msk.msra.mxu0 %vm94_vm1, %v1769_v9 }
0x142e   :  { %v2506_v10 = vpop.eup %2505 }
0x142f   :  { %v1622_v11 = vmul.f32 %v2506_v10, %v1610_v16  ;;  %vm1628_vm7 = vweird.f32 %v2506_v10 }
0x1430   :  { %vm1629_vm9 = vmor %vm1627_vm8, %vm1628_vm7 }
0x1431   :  { %v1623_v33 = vmul.f32 %v2506_v10, %v1622_v11 }
0x1433   :  { %v1624_v13 = vmul.f32 0.5, %v1623_v33 }
0x1435   :  { %v1625_v14 = vsub.f32 1.5, %v1624_v13 }
0x1437   :  { %v1626_v18 = vmul.f32 %v2506_v10, %v1625_v14 }
0x1439   :  { %v1630_v19 = vsel %vm1629_vm9, %v2506_v10, %v1626_v18 }
0x143a   :  { %v1632_v21 = vmul.f32 %v1630_v19, %v1598_v2 }
0x143c   :  { %v1635_v6 = vmul.f32 %v2424_v52, %v1632_v21 }
0x143e   :  { %v3190_v23 = vadd.f32 %v2425_v55, %v1635_v6 }
0x1440   :  { %2375 = vmatmul.msk.f32.gmra.mxu0 %vm60_vm0, %v3190_v23 }
0x1448   :  { %2380 = vmatmul.msk.f32.vlgmr.msra.gmra.mxu0 %vm94_vm1, %v1767_v24 }
0x145b   :  { %v1724_v25 = vpop.f32.mrf.mxu2 }
0x145c   :  { %v1727_v26 = vmul.f32 0.25, %v1724_v25 }
0x145e   :  { %v1728_v27 = vadd.f32 %v2936_v5, %v1727_v26 }
0x1460   :  { %v1729_v29 = vsel %vm121_vm2, %v1728_v27, -inf }
0x1461   :  { %1730 = vmax.xlane.f32.xlu0 %v1729_v29  ;;  %v2356_v29 = vld [vmem:[%s3398_s4 + $0x130] sm:$0xff] }
0x14bd   :  { %v1697_v30 = vpop.f32.mrf.mxu0 }
0x14be   :  { %v3197_v31 = vadd.f32 %v2426_v61, %v1697_v30  ;;  %v2355_v30 = vld [vmem:[%s3398_s4 + $0x128] sm:$0xff] }
0x14c0   :  { %1904 = vrot.lane.b32.xlu1 %v3197_v31, %s2569_s11  ;;  %1906 = vrot.lane.b32.xlu2 %v3197_v31, %s2571_s13  ;;  %s2577_s13 = smov 128  }
0x14c1   :  { %1839 = vrot.lane.b32.xlu0 %v3197_v31, %s2570_s12  ;;  %s2215_s12 = sshll.u32 %s3400_s6, 4  ;;  %s2216_s12 = int_to_ptr.hbm [resolvable:$true] %s2215_s12 }
0x14c5   :  { %v1791_v38 = vpop.f32.mrf.mxu0 }
0x14c6   :  { %v1794_v41 = vmul.f32 0.25, %v1791_v38 }
0x14c8   :  { %1740 = vrot.lane.b32.xlu1 %v3175_v63, %s2572_s0  ;;  %v1795_v42 = vadd.f32 %v2936_v5, %v1794_v41  ;;  %v2427_v41 = vld [vmem:[%s3399_s5 + $0x19] ss:$0 sm:$0xff] }
0x14ca   :  { %v1796_v40 = vsel %vm121_vm2, %v1795_v42, -inf }
0x14d4   :  { %v1731_v32 = vpop.xlane.xlu0 %1730 }
0x14d5   :  { %v1732_v34 = vsub.f32 %v1728_v27, %v1731_v32  ;;  %v2357_v27 = vld [vmem:[%s3398_s4 + $0x138] sm:$0xff] }
0x14d7   :  { %v1733_v35 = vmul.f32 1.442695, %v1732_v34 }
0x14d9   :  { %2507 = vpow2.f32 %v1733_v35 }
0x14df   :  { %v2508_v36 = vpop.eup %2507 }
0x14e0   :  { %v1735_v39 = vsel %vm121_vm2, %v2508_v36, 0.0 }
0x14e9   :  { %1736 = vadd.xlane.f32.xlu2 %v1735_v39 }
0x14f2   :  { %1797 = vmax.xlane.f32.xlu1 %v1796_v40 }
0x151a   :  { %v1907_v43 = vpop.permute.xlu2 %1906 }
0x151b   :  { %2385 = vmatpush.xpose.msk.msrb.mxu0 %vm94_vm1, %v1907_v43 }
0x1532   :  { %v1905_v44 = vpop.permute.xlu1 %1904 }
0x1533   :  { %2386 = vmatmul.msk.f32.vlgmr.msrb.gmra.mxu0 %vm94_vm1, %v1905_v44  ;;  %v1840_v46 = vpop.permute.xlu0 %1839 }
0x153a   :  { %v1741_v45 = vpop.permute.xlu1 %1740 }
0x153b   :  { %1761 = vmatpush.msrb.mxu1 %v1741_v45 }
0x153d   :  { %2382 = vmatpush.xpose.msk.msra.mxu1 %vm94_vm1, %v1840_v46  ;;  %v2418_v46 = vld [vmem:[%s3399_s5 + $0xb] ss:$0 sm:$0xff] }
0x155c   :  { %v1737_v47 = vpop.xlane.xlu2 %1736 }
0x155d   :  { %2509 = vrcp.f32 %v1737_v47 }
0x1563   :  { %v2510_v48 = vpop.eup %2509 }
0x1564   :  { %v1739_v49 = vmul.f32 %v2510_v48, %v2508_v36 }
0x1565   :  { %v1798_v50 = vpop.xlane.xlu1 %1797 }
0x1566   :  { %v1799_v5 = vsub.f32 %v1795_v42, %v1798_v50  ;;  %2378 = vmatmul.msk.f32.vlgmr.msrb.gmra.mxu1 %vm121_vm2, %v1739_v49  ;;  %v1051_v49 = vadd.f32 %v2418_v46, %v3076_v22 }
0x1567   :  { %1995 = vmatpush.msrb.mxu1 %v2357_v27  ;;  %v2365_v27 = vld [vmem:[%s3398_s4 + $0x178] sm:$0xff] }
0x1568   :  { %v1800_v52 = vmul.f32 1.442695, %v1799_v5  ;;  %v1056_v5 = vadd.f32 %v1051_v49, %v2988_v58  ;;  %v2353_v58 = vld [vmem:[%s3397_s3 + $0xf8] sm:$0xff]  ;;  %2105 = vmatpush.msra.mxu0 %v2365_v27 }
0x1569   :  { %1996 = vmatpush.msrb.mxu1 %v2356_v29  ;;  %v2364_v29 = vld [vmem:[%s3398_s4 + $0x170] sm:$0xff] }
0x156a   :  { %2511 = vpow2.f32 %v1800_v52  ;;  %2106 = vmatpush.msra.mxu0 %v2364_v29 }
0x156b   :  { %1997 = vmatpush.msrb.mxu1 %v2355_v30  ;;  %v2363_v30 = vld [vmem:[%s3398_s4 + $0x168] sm:$0xff] }
0x156c   :  { %2107 = vmatpush.msra.mxu0 %v2363_v30 }
0x156e   :  { %2383 = vmatmul.msk.f32.vlgmr.msra.gmra.mxu1 %vm94_vm1, %v3197_v31 }
0x1570   :  { %v2512_v53 = vpop.eup %2511 }
0x1571   :  { %v1802_v54 = vsel %vm121_vm2, %v2512_v53, 0.0 }
0x1572   :  { %1803 = vadd.xlane.f32.xlu2 %v1802_v54 }
0x15b0   :  { %v1929_v55 = vpop.f32.mrf.mxu0 }
0x15b1   :  { %v1932_v17 = vmul.f32 0.25, %v1929_v55 }
0x15b3   :  { %v1933_v57 = vadd.f32 %v3031_v28, %v1932_v17 }
0x15b5   :  { %v1934_v59 = vsel %vm121_vm2, %v1933_v57, -inf }
0x15b6   :  { %1935 = vmax.xlane.f32.xlu0 %v1934_v59 }
0x15e3   :  { %v1763_v60 = vpop.f32.mrf.mxu1 }
0x15e5   :  { %v1804_v12 = vpop.xlane.xlu2 %1803 }
0x15eb   :  { %v1862_v15 = vpop.f32.mrf.mxu1 }
0x15ec   :  { %v1865_v61 = vmul.f32 0.25, %v1862_v15  ;;  %v1054_v15 = vadd.f32 %v2418_v46, %v3078_v51 }
0x15ee   :  { %v1866_v62 = vadd.f32 %v3031_v28, %v1865_v61 }
0x15f0   :  { %v1867_v0 = vsel %vm121_vm2, %v1866_v62, -inf }
0x15f1   :  { %1868 = vmax.xlane.f32.xlu2 %v1867_v0 }
0x1609   :  { %1807 = vrot.lane.b32.xlu2 %v3175_v63, %s2573_s20 }
0x1629   :  { %v1936_v1 = vpop.xlane.xlu0 %1935 }
0x162a   :  { %v1937_v2 = vsub.f32 %v1933_v57, %v1936_v1  ;;  %v2350_v1 = vld [vmem:[%s3397_s3 + $0xc8] sm:$0xff] }
0x162c   :  { %v1938_v3 = vmul.f32 1.442695, %v1937_v2 }
0x162e   :  { %2513 = vpow2.f32 %v1938_v3  ;;  %v3286_v3 = vadd.f32 %v1054_v15, %v3007_v20  ;;  %v2431_v15 = vld [vmem:[%s3399_s5 + $0x1b] ss:$0 sm:$0xff] }
0x162f   :  { %2515 = vrcp.f32 %v1804_v12 }
0x1630   :  { %v1061_v12 = vsel %vm60_vm0, %v3286_v3, 0.0 }
0x1634   :  { %v2514_v4 = vpop.eup %2513 }
0x1635   :  { %v1940_v7 = vsel %vm121_vm2, %v2514_v4, 0.0  ;;  %v2516_v9 = vpop.eup %2515 }
0x1636   :  { %1941 = vadd.xlane.f32.xlu1 %v1940_v7  ;;  %v1806_v10 = vmul.f32 %v2516_v9, %v2512_v53  ;;  %v1058_v53 = vsel %vm60_vm0, %v1056_v5, 0.0 }
0x164f   :  { %1945 = vrot.lane.b32.xlu1 %v3197_v31, %s2573_s20 }
0x1664   :  { %v1869_v28 = vpop.xlane.xlu2 %1868 }
0x1665   :  { %v1870_v8 = vsub.f32 %v1866_v62, %v1869_v28  ;;  %v2351_v62 = vld [vmem:[%s3397_s3 + $0xd8] sm:$0xff] }
0x1667   :  { %v1871_v16 = vmul.f32 1.442695, %v1870_v8 }
0x1669   :  { %2517 = vpow2.f32 %v1871_v16 }
0x166c   :  { %v1808_v63 = vpop.permute.xlu2 %1807 }
0x166d   :  { %1828 = vmatpush.msrb.mxu2 %v1808_v63 }
0x166e   :  { %2381 = vmatmul.msk.f32.vlgmr.msrb.gmra.mxu2 %vm121_vm2, %v1806_v10 }
0x166f   :  { %v2518_v11 = vpop.eup %2517 }
0x1670   :  { %v1873_v33 = vsel %vm121_vm2, %v2518_v11, 0.0 }
0x1671   :  { %1874 = vadd.xlane.f32.xlu0 %v1873_v33 }
0x1685   :  { %1878 = vrot.lane.b32.xlu0 %v3197_v31, %s2572_s0  ;;  %v2354_v31 = vld [vmem:[%s3398_s4 + $0x120] sm:$0xff]  ;;  %s2578_s0 = smov 8  }
0x1686   :  { %1998 = vmatpush.msrb.mxu1 %v2354_v31  ;;  %v2362_v31 = vld [vmem:[%s3398_s4 + $0x160] sm:$0xff] }
0x1687   :  { %2108 = vmatpush.msra.mxu0 %v2362_v31 }
0x16a9   :  { %v1942_v13 = vpop.xlane.xlu1 %1941 }
0x16aa   :  { %2519 = vrcp.f32 %v1942_v13  ;;  %v2428_v13 = vld [vmem:[%s3399_s5 + $0x1c] ss:$0 sm:$0xff] }
0x16b0   :  { %v2520_v14 = vpop.eup %2519 }
0x16b1   :  { %v1944_v18 = vmul.f32 %v2520_v14, %v2514_v4 }
0x16c1   :  { %v1946_v19 = vpop.permute.xlu1 %1945 }
0x16c2   :  { %1966 = vmatpush.msra.mxu2 %v1946_v19  ;;  %v2429_v19 = vld [vmem:[%s3399_s5 + $0x1d] ss:$0 sm:$0xff] }
0x16c3   :  { %2387 = vmatmul.msk.f32.vlgmr.msra.gmra.mxu2 %vm121_vm2, %v1944_v18 }
0x16e4   :  { %v1875_v21 = vpop.xlane.xlu0 %1874 }
0x16e5   :  { %2521 = vrcp.f32 %v1875_v21 }
0x16eb   :  { %v2522_v24 = vpop.eup %2521 }
0x16ec   :  { %v1877_v25 = vmul.f32 %v2522_v24, %v2518_v11 }
0x16f1   :  { %v1830_v6 = vpop.f32.mrf.mxu2 }
0x16f2   :  { %1834 = vrot.lane.b32.xlu2 %v1830_v6, %s2574_s23 }
0x16f7   :  { %v1879_v26 = vpop.permute.xlu0 %1878 }
0x16f8   :  { %1899 = vmatpush.msra.mxu3 %v1879_v26 }
0x16f9   :  { %2384 = vmatmul.msk.f32.vlgmr.msra.gmra.mxu3 %vm121_vm2, %v1877_v25 }
0x16fa   :  { %2077 = vmatpush.msrb.mxu3 %v2353_v58 }
0x1746   :  { %v1968_v32 = vpop.f32.mrf.mxu2 }
0x1747   :  { %1972 = vrot.lane.b32.xlu1 %v1968_v32, %s2574_s23 }
0x174c   :  { %v1835_v34 = vpop.permute.xlu2 %1834 }
0x174d   :  { %v1837_v35 = vsel %vm94_vm1, %v1763_v60, %v1835_v34  ;;  %v2352_v60 = vld [vmem:[%s3397_s3 + $0xe8] sm:$0xff] }
0x174e   :  { %2388 = vmatmul.msk.f32.vlgmr.msrb.gmra.mxu1 %vm60_vm0, %v1837_v35  ;;  %2078 = vmatpush.msrb.mxu3 %v2352_v60  ;;  %v2361_v35 = vld [vmem:[%s3398_s4 + $0x158] sm:$0xff] }
0x174f   :  { %2109 = vmatpush.msra.mxu0 %v2361_v35 }
0x1750   :  { %2079 = vmatpush.msrb.mxu3 %v2351_v62 }
0x1752   :  { %2080 = vmatpush.msrb.mxu3 %v2350_v1 }
0x177c   :  { %v1901_v36 = vpop.f32.mrf.mxu3 }
0x17b9   :  { %v1973_v38 = vpop.permute.xlu1 %1972 }
0x17ba   :  { %v1975_v39 = vsel %vm94_vm1, %v1901_v36, %v1973_v38 }
0x17bb   :  { %2389 = vmatmul.msk.f32.gmra.mxu1 %vm60_vm0, %v1975_v39 }
0x17cb   :  { %v2000_v42 = vpop.f32.mrf.mxu1 }
0x17cc   :  { %v2001_v40 = vadd.f32 %v2427_v41, %v2000_v42 }
0x17ce   :  { %v2006_v43 = vadd.f32 %v2001_v40, %v3166_v56  ;;  %v2359_v40 = vld [vmem:[%s3398_s4 + $0x148] sm:$0xff] }
0x17d0   :  { %v2008_v44 = vsel %vm60_vm0, %v2006_v43, 0.0 }
0x17d1   :  { %2009 = vadd.xlane.f32.xlu2 %v2008_v44  ;;  %v2358_v44 = vld [vmem:[%s3398_s4 + $0x140] sm:$0xff] }
0x1838   :  { %v2003_v45 = vpop.f32.mrf.mxu1 }
0x1839   :  { %v2004_v47 = vadd.f32 %v2427_v41, %v2003_v45  ;;  %v2360_v41 = vld [vmem:[%s3398_s4 + $0x150] sm:$0xff] }
0x183a   :  { %2110 = vmatpush.msra.mxu0 %v2360_v41 }
0x183b   :  { %v2007_v48 = vadd.f32 %v2004_v47, %v3190_v23 }
0x183c   :  { %2111 = vmatpush.msra.mxu0 %v2359_v40 }
0x183d   :  { %v2011_v50 = vsel %vm60_vm0, %v2007_v48, 0.0 }
0x183e   :  { %2012 = vadd.xlane.f32.xlu1 %v2011_v50  ;;  %2112 = vmatpush.msra.mxu0 %v2358_v44 }
0x1844   :  { %v2010_v52 = vpop.xlane.xlu2 %2009 }
0x1845   :  { %v2014_v56 = vmul.f32 %v2010_v52, %v2724_v37 }
0x1846   :  { %1059 = vadd.xlane.f32.xlu1 %v1058_v53 }
0x1847   :  { %v2016_v54 = vsub.f32 %v2006_v43, %v2014_v56 }
0x1849   :  { %v2018_v55 = vmul.f32 %v2016_v54, %v2016_v54 }
0x184b   :  { %v2020_v17 = vsel %vm60_vm0, %v2018_v55, 0.0 }
0x184c   :  { %2021 = vadd.xlane.f32.xlu0 %v2020_v17 }
0x18b1   :  { %v2013_v57 = vpop.xlane.xlu1 %2012 }
0x18b2   :  { %v2015_v23 = vmul.f32 %v2013_v57, %v2724_v37 }
0x18b4   :  { %v3266_v22 = vsub.f32 %v2007_v48, %v2015_v23  ;;  %v2430_v48 = vld [vmem:[%s3399_s5 + $0x1a] ss:$0 sm:$0xff] }
0x18b6   :  { %v2019_v59 = vmul.f32 %v3266_v22, %v3266_v22 }
0x18b8   :  { %v2023_v61 = vsel %vm60_vm0, %v2019_v59, 0.0 }
0x18b9   :  { %2024 = vadd.xlane.f32.xlu2 %v2023_v61  ;;  %v1060_v0 = vpop.xlane.xlu1 %1059 }
0x18ba   :  { %v1064_v2 = vmul.f32 %v1060_v0, %v2724_v37 }
0x18bc   :  { %v3288_v4 = vsub.f32 %v1056_v5, %v1064_v2 }
0x18be   :  { %v1068_v8 = vmul.f32 %v3288_v4, %v3288_v4 }
0x18bf   :  { %v2022_v51 = vpop.xlane.xlu0 %2021 }
0x18c0   :  { %v2026_v7 = vmul.f32 %v2022_v51, %v2724_v37  ;;  %v1070_v16 = vsel %vm60_vm0, %v1068_v8, 0.0  ;;  %v2432_v8 = vld [vmem:[%s3399_s5 + $0xe] ss:$0 sm:$0xff] }
0x18c1   :  { %1062 = vadd.xlane.f32.xlu2 %v1061_v12 }
0x18c2   :  { %v2028_v28 = vadd.f32 1e-05, %v2026_v7 }
0x18c4   :  { %2523 = vrsqrt.f32 %v2028_v28  ;;  %vm2036_vm2 = vweird.f32 %v2028_v28 }
0x18c9   :  { %1071 = vadd.xlane.f32.xlu2 %v1070_v16 }
0x18ca   :  { %v2524_v20 = vpop.eup %2523 }
0x18cb   :  { %v2031_v9 = vmul.f32 %v2524_v20, %v2028_v28  ;;  %vm2037_vm1 = vweird.f32 %v2524_v20 }
0x18cc   :  { %vm2038_vm11 = vmor %vm2036_vm2, %vm2037_vm1 }
0x18cd   :  { %v2032_v10 = vmul.f32 %v2524_v20, %v2031_v9  ;;  %v2433_v9 = vld [vmem:[%s3399_s5 + $0xf] ss:$0 sm:$0xff] }
0x18cf   :  { %v2033_v63 = vmul.f32 0.5, %v2032_v10 }
0x18d1   :  { %v2034_v11 = vsub.f32 1.5, %v2033_v63 }
0x18d3   :  { %v2035_v33 = vmul.f32 %v2524_v20, %v2034_v11 }
0x18d5   :  { %v2039_v14 = vsel %vm2038_vm11, %v2524_v20, %v2035_v33 }
0x18d6   :  { %v2050_v18 = vmul.f32 %v2039_v14, %v2016_v54 }
0x18d8   :  { %v2053_v21 = vmul.f32 %v2428_v13, %v2050_v18 }
0x18da   :  { %v3302_v6 = vadd.f32 %v2429_v19, %v2053_v21 }
0x18dc   :  { %2390 = vmatmul.msk.f32.vlgmr.msrb.gmra.mxu3 %vm60_vm0, %v3302_v6 }
0x192c   :  { %v2025_v24 = vpop.xlane.xlu2 %2024 }
0x192d   :  { %v2027_v25 = vmul.f32 %v2025_v24, %v2724_v37 }
0x192f   :  { %v2029_v26 = vadd.f32 1e-05, %v2027_v25 }
0x1931   :  { %2525 = vrsqrt.f32 %v2029_v26  ;;  %vm2046_vm13 = vweird.f32 %v2029_v26 }
0x1934   :  { %v1063_v52 = vpop.xlane.xlu2 %1062 }
0x1935   :  { %v1065_v0 = vmul.f32 %v1063_v52, %v2724_v37 }
0x1937   :  { %v2526_v32 = vpop.eup %2525  ;;  %v1067_v7 = vsub.f32 %v3286_v3, %v1065_v0  ;;  %v3359_v3 = vld [vmem:[%s3395_s1 + $0x10] ss:$0 sm:$0xff] }
0x1938   :  { %v2041_v34 = vmul.f32 %v2526_v32, %v2029_v26  ;;  %vm2047_vm12 = vweird.f32 %v2526_v32 }
0x1939   :  { %vm2048_vm14 = vmor %vm2046_vm13, %vm2047_vm12  ;;  %v1069_v16 = vmul.f32 %v1067_v7, %v1067_v7 }
0x193a   :  { %v2042_v36 = vmul.f32 %v2526_v32, %v2041_v34 }
0x193b   :  { %v1073_v10 = vsel %vm60_vm0, %v1069_v16, 0.0 }
0x193c   :  { %v2043_v38 = vmul.f32 0.5, %v2042_v36  ;;  %v1072_v56 = vpop.xlane.xlu2 %1071 }
0x193d   :  { %v1076_v53 = vmul.f32 %v1072_v56, %v2724_v37 }
0x193e   :  { %v2044_v39 = vsub.f32 1.5, %v2043_v38 }
0x193f   :  { %v1078_v54 = vadd.f32 1e-05, %v1076_v53 }
0x1940   :  { %v2045_v42 = vmul.f32 %v2526_v32, %v2044_v39 }
0x1941   :  { %2527 = vrsqrt.f32 %v1078_v54  ;;  %vm1086_vm3 = vweird.f32 %v1078_v54 }
0x1942   :  { %v2049_v43 = vsel %vm2048_vm14, %v2526_v32, %v2045_v42 }
0x1943   :  { %v2051_v45 = vmul.f32 %v2049_v43, %v3266_v22 }
0x1945   :  { %v2054_v46 = vmul.f32 %v2428_v13, %v2051_v45 }
0x1947   :  { %v2057_v47 = vadd.f32 %v2429_v19, %v2054_v46  ;;  %v2528_v55 = vpop.eup %2527 }
0x1948   :  { %v1081_v23 = vmul.f32 %v2528_v55, %v1078_v54  ;;  %vm1087_vm15 = vweird.f32 %v2528_v55 }
0x1949   :  { %2391 = vmatmul.msk.f32.gmra.mxu3 %vm60_vm0, %v2057_v47  ;;  %vm1088_vm4 = vmor %vm1086_vm3, %vm1087_vm15 }
0x194a   :  { %v1082_v58 = vmul.f32 %v2528_v55, %v1081_v23 }
0x194c   :  { %v1083_v59 = vmul.f32 0.5, %v1082_v58  ;;  %v2436_v58 = vld [vmem:[%s3399_s5 + $0x1f] ss:$0 sm:$0xff] }
0x194e   :  { %v1084_v60 = vsub.f32 1.5, %v1083_v59 }
0x1950   :  { %v1085_v61 = vmul.f32 %v2528_v55, %v1084_v60 }
0x1952   :  { %v1089_v2 = vsel %vm1088_vm4, %v2528_v55, %v1085_v61 }
0x1953   :  { %v1100_v28 = vmul.f32 %v1089_v2, %v3288_v4 }
0x1955   :  { %v1103_v20 = vmul.f32 %v2432_v8, %v1100_v28 }
0x1957   :  { %v3354_v63 = vadd.f32 %v2433_v9, %v1103_v20 }
0x1959   :  { %v2173_v4 = vmul.f32 %v3359_v3, %v3354_v63 }
0x195b   :  { %v2175_v11 = vsel %vm60_vm0, %v2173_v4, 0.0 }
0x195f   :  { %v2082_v49 = vpop.f32.mrf.mxu3 }
0x1960   :  { %v2083_v50 = vadd.f32 %v2430_v48, %v2082_v49 }
0x1962   :  { %v2088_v5 = vmax.f32 %v2083_v50, 0.0 }
0x1964   :  { %2392 = vmatmul.msk.f32.vlgmr.msra.gmra.mxu0 %vm493_vm10, %v2088_v5 }
0x19cc   :  { %v2085_v17 = vpop.f32.mrf.mxu3 }
0x19cd   :  { %v2086_v57 = vadd.f32 %v2430_v48, %v2085_v17 }
0x19cf   :  { %v2089_v22 = vmax.f32 %v2086_v57, 0.0  ;;  %v2435_v57 = vld [vmem:[%s3399_s5 + $0x1e] ss:$0 sm:$0xff]  ;;  %s2576_s5 = smov [#allocation2]  }
0x19d0   :  { %s2213_s9 = sshll.u32 %s2576_s5, 4  ;;  %s2214_s9 = int_to_ptr.vmem [resolvable:$true] %s2213_s9 }
0x19d1   :  { %2393 = vmatmul.msk.f32.gmra.mxu0 %vm493_vm10, %v2089_v22 }
0x19e1   :  { %v2114_v62 = vpop.f32.mrf.mxu0 }
0x19e2   :  { %v2115_v1 = vadd.f32 %v2431_v15, %v2114_v62 }
0x19e4   :  { %v2120_v51 = vadd.f32 %v2115_v1, %v3302_v6 }
0x19e6   :  { %v2122_v12 = vsel %vm60_vm0, %v2120_v51, 0.0 }
0x19e7   :  { %2123 = vadd.xlane.f32.xlu0 %v2122_v12 }
0x19ef   :  { %1074 = vadd.xlane.f32.xlu0 %v1073_v10 }
0x19f7   :  { %2176 = vadd.xlane.f32.xlu0 %v2175_v11 }
0x1a4e   :  { %v2117_v33 = vpop.f32.mrf.mxu0 }
0x1a4f   :  { %v2118_v13 = vadd.f32 %v2431_v15, %v2117_v33 }
0x1a51   :  { %v2121_v14 = vadd.f32 %v2118_v13, %v2057_v47 }
0x1a53   :  { %v2125_v18 = vsel %vm60_vm0, %v2121_v14, 0.0 }
0x1a54   :  { %2126 = vadd.xlane.f32.xlu1 %v2125_v18 }
0x1a5a   :  { %v2124_v19 = vpop.xlane.xlu0 %2123 }
0x1a5b   :  { %v2128_v21 = vmul.f32 %v2124_v19, %v2724_v37 }
0x1a5d   :  { %v2130_v6 = vsub.f32 %v2120_v51, %v2128_v21 }
0x1a5f   :  { %v2132_v24 = vmul.f32 %v2130_v6, %v2130_v6 }
0x1a61   :  { %v2134_v25 = vsel %vm60_vm0, %v2132_v24, 0.0 }
0x1a62   :  { %2135 = vadd.xlane.f32.xlu1 %v2134_v25  ;;  %v1075_v26 = vpop.xlane.xlu0 %1074 }
0x1a63   :  { %v1077_v27 = vmul.f32 %v1075_v26, %v2724_v37 }
0x1a65   :  { %v1079_v29 = vadd.f32 1e-05, %v1077_v27 }
0x1a67   :  { %2529 = vrsqrt.f32 %v1079_v29  ;;  %vm1096_vm5 = vweird.f32 %v1079_v29 }
0x1a6d   :  { %v2530_v30 = vpop.eup %2529 }
0x1a6e   :  { %v1091_v31 = vmul.f32 %v2530_v30, %v1079_v29  ;;  %vm1097_vm10 = vweird.f32 %v2530_v30 }
0x1a6f   :  { %vm1098_vm6 = vmor %vm1096_vm5, %vm1097_vm10 }
0x1a70   :  { %v1092_v32 = vmul.f32 %v2530_v30, %v1091_v31 }
0x1a72   :  { %v1093_v34 = vmul.f32 0.5, %v1092_v32 }
0x1a74   :  { %v1094_v35 = vsub.f32 1.5, %v1093_v34 }
0x1a76   :  { %v1095_v36 = vmul.f32 %v2530_v30, %v1094_v35 }
0x1a78   :  { %v1099_v38 = vsel %vm1098_vm6, %v2530_v30, %v1095_v36 }
0x1a79   :  { %v1101_v39 = vmul.f32 %v1099_v38, %v1067_v7 }
0x1a7b   :  { %v1104_v41 = vmul.f32 %v2432_v8, %v1101_v39 }
0x1a7d   :  { %v3368_v42 = vadd.f32 %v2433_v9, %v1104_v41 }
0x1a7f   :  { %v2174_v40 = vmul.f32 %v3359_v3, %v3368_v42 }
0x1a81   :  { %v2178_v43 = vsel %vm60_vm0, %v2174_v40, 0.0 }
0x1a82   :  { %2179 = vadd.xlane.f32.xlu1 %v2178_v43 }
0x1ac7   :  { %v2127_v44 = vpop.xlane.xlu1 %2126 }
0x1ac8   :  { %v2129_v45 = vmul.f32 %v2127_v44, %v2724_v37 }
0x1aca   :  { %v2131_v46 = vsub.f32 %v2121_v14, %v2129_v45 }
0x1acc   :  { %v2133_v47 = vmul.f32 %v2131_v46, %v2131_v46 }
0x1ace   :  { %v2137_v48 = vsel %vm60_vm0, %v2133_v47, 0.0 }
0x1acf   :  { %2138 = vadd.xlane.f32.xlu2 %v2137_v48 }
0x1ad5   :  { %v2136_v49 = vpop.xlane.xlu1 %2135 }
0x1ad6   :  { %v2140_v50 = vmul.f32 %v2136_v49, %v2724_v37 }
0x1ad8   :  { %v2142_v5 = vadd.f32 1e-05, %v2140_v50 }
0x1ada   :  { %2531 = vrsqrt.f32 %v2142_v5  ;;  %vm2150_vm8 = vweird.f32 %v2142_v5 }
0x1ae0   :  { %v2532_v52 = vpop.eup %2531 }
0x1ae1   :  { %v2145_v56 = vmul.f32 %v2532_v52, %v2142_v5  ;;  %vm2151_vm7 = vweird.f32 %v2532_v52 }
0x1ae2   :  { %vm2152_vm9 = vmor %vm2150_vm8, %vm2151_vm7 }
0x1ae3   :  { %v2146_v53 = vmul.f32 %v2532_v52, %v2145_v56 }
0x1ae5   :  { %v2147_v54 = vmul.f32 0.5, %v2146_v53 }
0x1ae7   :  { %v2148_v55 = vsub.f32 1.5, %v2147_v54 }
0x1ae9   :  { %v2149_v17 = vmul.f32 %v2532_v52, %v2148_v55 }
0x1aeb   :  { %v2153_v23 = vsel %vm2152_vm9, %v2532_v52, %v2149_v17 }
0x1aec   :  { %v2164_v22 = vmul.f32 %v2153_v23, %v2130_v6 }
0x1aee   :  { %v2167_v59 = vmul.f32 %v2435_v57, %v2164_v22 }
0x1af0   :  { %v2170_v60 = vadd.f32 %v2436_v58, %v2167_v59 }
0x1af2   :  { %v2181_v15 = vmul.f32 %v3359_v3, %v2170_v60 }
0x1af4   :  { %v2183_v61 = vsel %vm60_vm0, %v2181_v15, 0.0 }
0x1af5   :  { %2184 = vadd.xlane.f32.xlu2 %v2183_v61 }
0x1b42   :  { %v2139_v62 = vpop.xlane.xlu2 %2138 }
0x1b43   :  { %v2141_v0 = vmul.f32 %v2139_v62, %v2724_v37  ;;  %v2177_v37 = vpop.xlane.xlu0 %2176 }
0x1b45   :  { %v2143_v1 = vadd.f32 1e-05, %v2141_v0 }
0x1b47   :  { %2533 = vrsqrt.f32 %v2143_v1  ;;  %vm2160_vm2 = vweird.f32 %v2143_v1 }
0x1b4d   :  { %v2534_v2 = vpop.eup %2533 }
0x1b4e   :  { %v2155_v51 = vmul.f32 %v2534_v2, %v2143_v1  ;;  %vm2161_vm1 = vweird.f32 %v2534_v2 }
0x1b4f   :  { %vm2162_vm11 = vmor %vm2160_vm2, %vm2161_vm1 }
0x1b50   :  { %v2156_v7 = vmul.f32 %v2534_v2, %v2155_v51 }
0x1b52   :  { %v2157_v12 = vmul.f32 0.5, %v2156_v7 }
0x1b54   :  { %v2158_v28 = vsub.f32 1.5, %v2157_v12 }
0x1b56   :  { %v2159_v8 = vmul.f32 %v2534_v2, %v2158_v28 }
0x1b58   :  { %v2163_v16 = vsel %vm2162_vm11, %v2534_v2, %v2159_v8 }
0x1b59   :  { %v2165_v20 = vmul.f32 %v2163_v16, %v2131_v46 }
0x1b5b   :  { %v2168_v9 = vmul.f32 %v2435_v57, %v2165_v20 }
0x1b5d   :  { %v2171_v10 = vadd.f32 %v2436_v58, %v2168_v9 }
0x1b5f   :  { %v2182_v4 = vmul.f32 %v3359_v3, %v2171_v10  ;;  %v2180_v3 = vpop.xlane.xlu1 %2179 }
0x1b61   :  { %v2186_v11 = vsel %vm60_vm0, %v2182_v4, 0.0 }
0x1b62   :  { %2187 = vadd.xlane.f32.xlu0 %v2186_v11 }
0x1b68   :  { %v2185_v33 = vpop.xlane.xlu2 %2184 }
0x1b69   :  { %v2189_v13 = vsub.f32 %v2185_v33, %v2177_v37 }
0x1b6b   :  { %v2191_v14 = vmul.f32 1.442695, %v2189_v13 }
0x1b6d   :  { %2535 = vpow2.f32 %v2191_v14 }
0x1b73   :  { %v2536_v18 = vpop.eup %2535 }
0x1b74   :  { %v2195_v19 = vadd.f32 1.0, %v2536_v18 }
0x1b76   :  { %2537 = vrcp.f32 %v2195_v19 }
0x1b7c   :  { %v2538_v21 = vpop.eup %2537 }
0x1b7d   :  { %v2201_v6 = vsub.f32 1.0, %v2538_v21  ;;  %v2199_v24 = vmul.f32 %v2538_v21, %v3354_v63 }
0x1b7f   :  { %v2203_v25 = vmul.f32 %v2201_v6, %v2170_v60 }
0x1b81   :  { %v2205_v26 = vadd.f32 %v2203_v25, %v2199_v24 }
0x1b83   :  { %2207 = vst.msk [vmem:[#allocation2] sm:$0xff] %vm60_vm0, %v2205_v26 }
0x1bd5   :  { %v2188_v27 = vpop.xlane.xlu0 %2187 }
0x1bd6   :  { %v2190_v29 = vsub.f32 %v2188_v27, %v2180_v3 }
0x1bd8   :  { %v2193_v30 = vmul.f32 1.442695, %v2190_v29 }
0x1bda   :  { %2539 = vpow2.f32 %v2193_v30 }
0x1be0   :  { %v2540_v31 = vpop.eup %2539 }
0x1be1   :  { %v2196_v32 = vadd.f32 1.0, %v2540_v31 }
0x1be3   :  { %2541 = vrcp.f32 %v2196_v32 }
0x1be9   :  { %v2542_v34 = vpop.eup %2541 }
0x1bea   :  { %v2202_v35 = vsub.f32 1.0, %v2542_v34  ;;  %v2200_v63 = vmul.f32 %v2542_v34, %v3368_v42 }
0x1bec   :  { %v2204_v36 = vmul.f32 %v2202_v35, %v2171_v10 }
0x1bee   :  { %v2206_v38 = vadd.f32 %v2204_v36, %v2200_v63 }
0x1bf0   :  { %2208 = vst.msk [vmem:[#allocation2 + $0x8] sm:$0xff] %vm60_vm0, %v2206_v38 }
0x1bf1   :  { %2221 = dma.vmem_to_hbm [thread:$0]  %s2214_s9, 256, %s2216_s12, [#allocation3], %s2577_s13, %s2577_s13, %s2578_s0  }
0x1bf2   :  { %2567 = dma.done.wait [#allocation3], 256  }
0x1bf3   :  { %2568 = vsyncadd [#allocation3], 4294967040 }
0x1bf4   :  { %2226 = vsyncpa [#allocation3], 1 }

</bundles_post_ra>
